<compile_context>
chip_gen: v6e
topology: v6e:2x2x1
jax: 0.10.0
libtpu: 0.0.40
codegen_flags: <defaults>
</compile_context>

<pallas_src>
import functools

import jax
import jax.numpy as jnp
import numpy as np
from jax.experimental import pallas as pl
from jax.experimental.pallas import tpu as pltpu


# 3x3 taps in row-major (ky, kx) order, expressed as (dy, dx) = (ky-1, kx-1).
_TAPS = ((-1, -1), (-1, 0), (-1, 1),
         (0, -1),  (0, 0),  (0, 1),
         (1, -1),  (1, 0),  (1, 1))
_CENTER = 4  # index of (0, 0) in _TAPS


def _round_up(n, m):
    return (n + m - 1) // m * m


# -----------------------------------------------------------------------------
# Pallas kernel: one batch image per grid step, channel-last, lane-dense out.
# -----------------------------------------------------------------------------
def _arm_kernel(x_ref, w_ref, b1_ref, wa_ref, b2_ref, out_ref, *, W):
    HW, _ = x_ref.shape            # (H*W, Cin)
    _, cout = out_ref.shape        # (H*W, Cout_pad)
    H = HW // W

    x = x_ref[...]                 # (HW, Cin) f32

    # ---- trace-time boundary predicates (no mask operand, no lane slices) ---
    pix = jax.lax.broadcasted_iota(jnp.int32, (HW, 1), 0)        # flat pixel id
    if W & (W - 1) == 0:
        col = jnp.bitwise_and(pix, W - 1)                        # pix % W (pow2)
    else:
        # exact floor(pix / W) for realistic image sizes: the +0.5 keeps the
        # quotient strictly inside (k, k+1) so a 1-ulp division error can
        # never flip the truncation.
        row_f = (pix.astype(jnp.float32) + 0.5) * (1.0 / W)
        col = pix - row_f.astype(jnp.int32) * W
    not_top = pix >= W                     # source row exists for dy = -1
    not_bot = pix < (H - 1) * W            # source row exists for dy = +1
    not_lft = col >= 1                     # source col exists for dx = -1
    not_rgt = col <= W - 2                 # source col exists for dx = +1

    # ---- 3x3 conv (+ folded BN) as 9 shifted MXU matmuls, bf16 operands -----
    # Centre tap first: no roll, no mask -> initializes the accumulator
    # (no bias broadcast; bias is added once before the ReLU).
    acc = jnp.dot(x.astype(jnp.bfloat16), w_ref[_CENTER],
                  preferred_element_type=jnp.float32)            # (HW, Cout) f32

    for t, (dy, dx) in enumerate(_TAPS):
        if dy == 0 and dx == 0:
            continue
        off = dy * W + dx                                        # flat pixel offset
        # shifted[p] = x[p + off]  (wrapped values are masked to zero below)
        xs = pltpu.roll(x, (-off) % HW, axis=0)

        keep = None                                              # (HW, 1) bool
        for cond, use in ((not_top, dy < 0), (not_bot, dy > 0),
                          (not_lft, dx < 0), (not_rgt, dx > 0)):
            if use:
                keep = cond if keep is None else jnp.logical_and(keep, cond)
        xs = xs * keep.astype(jnp.float32)                       # zero out-of-image

        acc = acc + jnp.dot(xs.astype(jnp.bfloat16), w_ref[t],
                            preferred_element_type=jnp.float32)

    feat = jnp.maximum(acc + b1_ref[...], 0.0)                   # bias once + ReLU

    # ---- global average pool -> 1x1 attention conv -> sigmoid ---------------
    mean = jnp.sum(feat, axis=0, keepdims=True) * (1.0 / HW)     # (1, Cout) f32
    # M=8 (one vreg) keeps the matmul on the well-supported >=8-sublane path;
    # the 7 redundant MXU rows are negligible next to the 3x3 conv.
    z = jnp.dot(jnp.broadcast_to(mean, (8, cout)), wa_ref[...],
                preferred_element_type=jnp.float32)[0:1, :] + b2_ref[...]
    atten = 1.0 / (1.0 + jnp.exp(-z))                            # sigmoid (EUP)

    # ---- channel re-weighting; dense 128-lane store --------------------------
    out_ref[...] = (feat * atten).astype(out_ref.dtype)


# -----------------------------------------------------------------------------
# Wrapper: BN folding, bf16 weight prep, cout padding to 128 lanes, pallas_call.
# -----------------------------------------------------------------------------
def attention_refinement_pallas(x_nhwc, params, *, lane=128, out_dtype=jnp.float32):
    B, H, W, cin = x_nhwc.shape
    cout = params["w_conv"].shape[-1]
    HW = H * W
    eps = 1e-5
    cout_p = _round_up(cout, lane)

    # Fold eval-mode BatchNorm into weights / biases (host-side, once).
    s1 = params["bn1_gamma"] * jax.lax.rsqrt(params["bn1_var"] + eps)
    b1 = params["bn1_beta"] - params["bn1_mean"] * s1
    w9 = (params["w_conv"] * s1).reshape(9, cin, cout)           # (ky,kx) row-major
    s2 = params["bn2_gamma"] * jax.lax.rsqrt(params["bn2_var"] + eps)
    b2 = params["bn2_beta"] - params["bn2_mean"] * s2
    wa = params["w_att"] * s2

    # Pad only the Cout axis to a full 128-lane multiple (lane-dense stores).
    # Conv weights go bf16 (MXU-native); the tiny 1x1 attention weight and the
    # biases stay f32.  The input x is passed unpadded (block dim == full dim).
    w9 = jnp.pad(w9, ((0, 0), (0, 0), (0, cout_p - cout))).astype(jnp.bfloat16)
    wa = jnp.pad(wa, ((0, cout_p - cout), (0, cout_p - cout))).astype(jnp.float32)
    b1 = jnp.pad(b1, (0, cout_p - cout)).reshape(1, cout_p).astype(jnp.float32)
    b2 = jnp.pad(b2, (0, cout_p - cout)).reshape(1, cout_p).astype(jnp.float32)
    xf = x_nhwc.reshape(B, HW, cin)                              # metadata-only

    # Explicit scoped-VMEM budget: double-buffered x/out blocks + (possibly
    # double-buffered) resident weights, with headroom.
    x_blk = HW * cin * 4
    o_blk = HW * cout_p * jnp.dtype(out_dtype).itemsize
    w_res = 9 * cin * cout_p * 2 + cout_p * cout_p * 4 + 2 * cout_p * 4
    need = 2 * (x_blk + o_blk + w_res) + (2 << 20)
    vmem_limit = int(min(max(need, 16 << 20), 100 << 20))

    full = lambda shape: pl.BlockSpec(shape, lambda b: (0,) * len(shape))

    out = pl.pallas_call(
        functools.partial(_arm_kernel, W=W),
        out_shape=jax.ShapeDtypeStruct((B, HW, cout_p), out_dtype),
        grid_spec=pltpu.PrefetchScalarGridSpec(
            num_scalar_prefetch=0,
            grid=(B,),
            in_specs=[
                pl.BlockSpec((None, HW, cin), lambda b: (b, 0, 0)),   # x (unpadded)
                full((9, cin, cout_p)),                               # conv weights (bf16)
                full((1, cout_p)),                                    # conv bias
                full((cout_p, cout_p)),                               # 1x1 atten weight
                full((1, cout_p)),                                    # atten bias
            ],
            out_specs=pl.BlockSpec((None, HW, cout_p), lambda b: (b, 0, 0)),
        ),
        compiler_params=pltpu.CompilerParams(
            dimension_semantics=("parallel",),
            vmem_limit_bytes=vmem_limit),
    )(xf, w9, b1, wa, b2)

    return out.reshape(B, H, W, cout_p)[..., :cout]


# -----------------------------------------------------------------------------
# Pure-JAX reference (lax conv, unfolded BN) for verification.
# -----------------------------------------------------------------------------
def attention_refinement_reference(x_nhwc, p):
    hi = jax.lax.Precision.HIGHEST
    eps = 1e-5

    def bn(x, g, b, m, v):
        return (x - m) * jax.lax.rsqrt(v + eps) * g + b

    feat = jax.lax.conv_general_dilated(
        x_nhwc, p["w_conv"], window_strides=(1, 1), padding=[(1, 1), (1, 1)],
        dimension_numbers=("NHWC", "HWIO", "NHWC"), precision=hi)
    feat = jnp.maximum(
        bn(feat, p["bn1_gamma"], p["bn1_beta"], p["bn1_mean"], p["bn1_var"]), 0.0)

    atten = jnp.mean(feat, axis=(1, 2), keepdims=True)               # (B,1,1,C)
    atten = jnp.einsum("bijc,cd->bijd", atten, p["w_att"], precision=hi)
    atten = jax.nn.sigmoid(
        bn(atten, p["bn2_gamma"], p["bn2_beta"], p["bn2_mean"], p["bn2_var"]))
    return feat * atten


# -----------------------------------------------------------------------------
# Deterministic parameter construction (matches the nn.Module __init__).
# -----------------------------------------------------------------------------
def make_params(key, cin, cout):
    k = jax.random.split(key, 4)
    # kaiming_normal_(a=1): gain=1, std = 1/sqrt(fan_in)
    w_conv = jax.random.normal(k[0], (3, 3, cin, cout), jnp.float32) / np.sqrt(9 * cin)
    w_att = jax.random.normal(k[1], (cout, cout), jnp.float32) / np.sqrt(cout)
    g1 = 1.0 + 0.02 * jax.random.normal(k[2], (cout,), jnp.float32)
    g2 = 1.0 + 0.02 * jax.random.normal(k[3], (cout,), jnp.float32)
    zeros = jnp.zeros((cout,), jnp.float32)
    ones = jnp.ones((cout,), jnp.float32)
    return dict(
        w_conv=w_conv, w_att=w_att,
        bn1_gamma=g1, bn1_beta=zeros, bn1_mean=zeros, bn1_var=ones,
        bn2_gamma=g2, bn2_beta=zeros, bn2_mean=zeros, bn2_var=ones,
    )


if __name__ == "__main__":
    B, CIN, COUT, H, W = 2, 64, 128, 16, 16
    key = jax.random.PRNGKey(0)
    k_x, k_p = jax.random.split(key)

    # module input is NCHW; convert to the kernel's NHWC layout
    x_nchw = jax.random.normal(k_x, (B, CIN, H, W), jnp.float32)
    x_nhwc = jnp.transpose(x_nchw, (0, 2, 3, 1))

    params = make_params(k_p, CIN, COUT)

    out = jax.block_until_ready(attention_refinement_pallas(x_nhwc, params))
    ref = jax.block_until_ready(attention_refinement_reference(x_nhwc, params))

    # Tolerance accommodates bf16 MXU operands (f32 accumulation); structural
    # bugs (wrong tap / mask / weight layout) would give O(1) errors.
    np.testing.assert_allclose(np.asarray(out), np.asarray(ref), rtol=2e-2, atol=2e-2)

    print("KERNEL_OK")
</pallas_src>

<mosaic_0001>
module attributes {stable_mosaic.version = 11 : i64} {
  func.func @_arm_kernel(%arg0: i32, %arg1: memref<1x256x64xf32, #tpu.memory_space<vmem>>, %arg2: memref<9x64x128xbf16, #tpu.memory_space<vmem>>, %arg3: memref<1x128xf32, #tpu.memory_space<vmem>>, %arg4: memref<128x128xf32, #tpu.memory_space<vmem>>, %arg5: memref<1x128xf32, #tpu.memory_space<vmem>>, %arg6: memref<1x256x128xf32, #tpu.memory_space<vmem>>) attributes {dimension_semantics = [#tpu.dimension_semantics<parallel>], iteration_bounds = array<i64: 2>, scalar_prefetch = 0 : i64, scratch_operands = 0 : i64, tpu.core_type = #tpu.core_type<tc>, window_params = [{transform_indices = @transform_0, window_bounds = array<i64: 1, 256, 64>}, {pipeline_mode = #tpu.pipeline_mode<synchronous>, transform_indices = @transform_1, window_bounds = array<i64: 9, 64, 128>}, {pipeline_mode = #tpu.pipeline_mode<synchronous>, transform_indices = @transform_2, window_bounds = array<i64: 1, 128>}, {pipeline_mode = #tpu.pipeline_mode<synchronous>, transform_indices = @transform_3, window_bounds = array<i64: 128, 128>}, {pipeline_mode = #tpu.pipeline_mode<synchronous>, transform_indices = @transform_4, window_bounds = array<i64: 1, 128>}, {transform_indices = @transform_5, window_bounds = array<i64: 1, 256, 128>}]} {
    %c0 = arith.constant 0 : index
    %c0_0 = arith.constant 0 : index
    %c0_1 = arith.constant 0 : index
    %0 = vector.load %arg1[%c0, %c0_0, %c0_1] : memref<1x256x64xf32, #tpu.memory_space<vmem>>, vector<1x256x64xf32>
    %1 = vector.shape_cast %0 : vector<1x256x64xf32> to vector<256x64xf32>
    %2 = tpu.iota {dimensions = array<i32: 0>} : vector<256x1xi32>
    %c15_i32 = arith.constant 15 : i32
    %3 = vector.broadcast %c15_i32 : i32 to vector<256x1xi32>
    %4 = arith.andi %2, %3 : vector<256x1xi32>
    %c16_i32 = arith.constant 16 : i32
    %5 = vector.broadcast %c16_i32 : i32 to vector<256x1xi32>
    %6 = arith.cmpi sge, %2, %5 : vector<256x1xi32>
    %c240_i32 = arith.constant 240 : i32
    %7 = vector.broadcast %c240_i32 : i32 to vector<256x1xi32>
    %8 = arith.cmpi slt, %2, %7 : vector<256x1xi32>
    %c1_i32 = arith.constant 1 : i32
    %9 = vector.broadcast %c1_i32 : i32 to vector<256x1xi32>
    %10 = arith.cmpi sge, %4, %9 : vector<256x1xi32>
    %c14_i32 = arith.constant 14 : i32
    %11 = vector.broadcast %c14_i32 : i32 to vector<256x1xi32>
    %12 = arith.cmpi sle, %4, %11 : vector<256x1xi32>
    %13 = arith.truncf %1 : vector<256x64xf32> to vector<256x64xbf16>
    %c4 = arith.constant 4 : index
    %c0_2 = arith.constant 0 : index
    %c0_3 = arith.constant 0 : index
    %14 = vector.load %arg2[%c4, %c0_2, %c0_3] : memref<9x64x128xbf16, #tpu.memory_space<vmem>>, vector<1x64x128xbf16>
    %15 = vector.shape_cast %14 : vector<1x64x128xbf16> to vector<64x128xbf16>
    %cst = arith.constant dense<0.000000e+00> : vector<256x128xf32>
    %16 = tpu.matmul %13, %15, %cst {dimension_numbers = #tpu.dot_dimension_numbers<[1], [0], [0], [1], [0, 0, 1, 1], [], []>} : vector<256x64xbf16>, vector<64x128xbf16>, vector<256x128xf32> -> vector<256x128xf32>
    %c17_i32 = arith.constant 17 : i32
    %17 = tpu.dynamic_rotate %1 by %c17_i32 dim 0 : vector<256x64xf32>, i32 -> vector<256x64xf32>
    %18 = arith.andi %6, %10 : vector<256x1xi1>
    %19 = arith.extui %18 : vector<256x1xi1> to vector<256x1xi32>
    %20 = arith.sitofp %19 : vector<256x1xi32> to vector<256x1xf32>
    %21 = vector.broadcast %20 : vector<256x1xf32> to vector<256x64xf32>
    %22 = arith.mulf %17, %21 : vector<256x64xf32>
    %23 = arith.truncf %22 : vector<256x64xf32> to vector<256x64xbf16>
    %c0_4 = arith.constant 0 : index
    %c0_5 = arith.constant 0 : index
    %c0_6 = arith.constant 0 : index
    %24 = vector.load %arg2[%c0_4, %c0_5, %c0_6] : memref<9x64x128xbf16, #tpu.memory_space<vmem>>, vector<1x64x128xbf16>
    %25 = vector.shape_cast %24 : vector<1x64x128xbf16> to vector<64x128xbf16>
    %cst_7 = arith.constant dense<0.000000e+00> : vector<256x128xf32>
    %26 = tpu.matmul %23, %25, %cst_7 {dimension_numbers = #tpu.dot_dimension_numbers<[1], [0], [0], [1], [0, 0, 1, 1], [], []>} : vector<256x64xbf16>, vector<64x128xbf16>, vector<256x128xf32> -> vector<256x128xf32>
    %27 = arith.addf %16, %26 : vector<256x128xf32>
    %c16_i32_8 = arith.constant 16 : i32
    %28 = tpu.dynamic_rotate %1 by %c16_i32_8 dim 0 : vector<256x64xf32>, i32 -> vector<256x64xf32>
    %29 = arith.extui %6 : vector<256x1xi1> to vector<256x1xi32>
    %30 = arith.sitofp %29 : vector<256x1xi32> to vector<256x1xf32>
    %31 = vector.broadcast %30 : vector<256x1xf32> to vector<256x64xf32>
    %32 = arith.mulf %28, %31 : vector<256x64xf32>
    %33 = arith.truncf %32 : vector<256x64xf32> to vector<256x64xbf16>
    %c1 = arith.constant 1 : index
    %c0_9 = arith.constant 0 : index
    %c0_10 = arith.constant 0 : index
    %34 = vector.load %arg2[%c1, %c0_9, %c0_10] : memref<9x64x128xbf16, #tpu.memory_space<vmem>>, vector<1x64x128xbf16>
    %35 = vector.shape_cast %34 : vector<1x64x128xbf16> to vector<64x128xbf16>
    %cst_11 = arith.constant dense<0.000000e+00> : vector<256x128xf32>
    %36 = tpu.matmul %33, %35, %cst_11 {dimension_numbers = #tpu.dot_dimension_numbers<[1], [0], [0], [1], [0, 0, 1, 1], [], []>} : vector<256x64xbf16>, vector<64x128xbf16>, vector<256x128xf32> -> vector<256x128xf32>
    %37 = arith.addf %27, %36 : vector<256x128xf32>
    %c15_i32_12 = arith.constant 15 : i32
    %38 = tpu.dynamic_rotate %1 by %c15_i32_12 dim 0 : vector<256x64xf32>, i32 -> vector<256x64xf32>
    %39 = arith.andi %6, %12 : vector<256x1xi1>
    %40 = arith.extui %39 : vector<256x1xi1> to vector<256x1xi32>
    %41 = arith.sitofp %40 : vector<256x1xi32> to vector<256x1xf32>
    %42 = vector.broadcast %41 : vector<256x1xf32> to vector<256x64xf32>
    %43 = arith.mulf %38, %42 : vector<256x64xf32>
    %44 = arith.truncf %43 : vector<256x64xf32> to vector<256x64xbf16>
    %c2 = arith.constant 2 : index
    %c0_13 = arith.constant 0 : index
    %c0_14 = arith.constant 0 : index
    %45 = vector.load %arg2[%c2, %c0_13, %c0_14] : memref<9x64x128xbf16, #tpu.memory_space<vmem>>, vector<1x64x128xbf16>
    %46 = vector.shape_cast %45 : vector<1x64x128xbf16> to vector<64x128xbf16>
    %cst_15 = arith.constant dense<0.000000e+00> : vector<256x128xf32>
    %47 = tpu.matmul %44, %46, %cst_15 {dimension_numbers = #tpu.dot_dimension_numbers<[1], [0], [0], [1], [0, 0, 1, 1], [], []>} : vector<256x64xbf16>, vector<64x128xbf16>, vector<256x128xf32> -> vector<256x128xf32>
    %48 = arith.addf %37, %47 : vector<256x128xf32>
    %c1_i32_16 = arith.constant 1 : i32
    %49 = tpu.dynamic_rotate %1 by %c1_i32_16 dim 0 : vector<256x64xf32>, i32 -> vector<256x64xf32>
    %50 = arith.extui %10 : vector<256x1xi1> to vector<256x1xi32>
    %51 = arith.sitofp %50 : vector<256x1xi32> to vector<256x1xf32>
    %52 = vector.broadcast %51 : vector<256x1xf32> to vector<256x64xf32>
    %53 = arith.mulf %49, %52 : vector<256x64xf32>
    %54 = arith.truncf %53 : vector<256x64xf32> to vector<256x64xbf16>
    %c3 = arith.constant 3 : index
    %c0_17 = arith.constant 0 : index
    %c0_18 = arith.constant 0 : index
    %55 = vector.load %arg2[%c3, %c0_17, %c0_18] : memref<9x64x128xbf16, #tpu.memory_space<vmem>>, vector<1x64x128xbf16>
    %56 = vector.shape_cast %55 : vector<1x64x128xbf16> to vector<64x128xbf16>
    %cst_19 = arith.constant dense<0.000000e+00> : vector<256x128xf32>
    %57 = tpu.matmul %54, %56, %cst_19 {dimension_numbers = #tpu.dot_dimension_numbers<[1], [0], [0], [1], [0, 0, 1, 1], [], []>} : vector<256x64xbf16>, vector<64x128xbf16>, vector<256x128xf32> -> vector<256x128xf32>
    %58 = arith.addf %48, %57 : vector<256x128xf32>
    %c255_i32 = arith.constant 255 : i32
    %59 = tpu.dynamic_rotate %1 by %c255_i32 dim 0 : vector<256x64xf32>, i32 -> vector<256x64xf32>
    %60 = arith.extui %12 : vector<256x1xi1> to vector<256x1xi32>
    %61 = arith.sitofp %60 : vector<256x1xi32> to vector<256x1xf32>
    %62 = vector.broadcast %61 : vector<256x1xf32> to vector<256x64xf32>
    %63 = arith.mulf %59, %62 : vector<256x64xf32>
    %64 = arith.truncf %63 : vector<256x64xf32> to vector<256x64xbf16>
    %c5 = arith.constant 5 : index
    %c0_20 = arith.constant 0 : index
    %c0_21 = arith.constant 0 : index
    %65 = vector.load %arg2[%c5, %c0_20, %c0_21] : memref<9x64x128xbf16, #tpu.memory_space<vmem>>, vector<1x64x128xbf16>
    %66 = vector.shape_cast %65 : vector<1x64x128xbf16> to vector<64x128xbf16>
    %cst_22 = arith.constant dense<0.000000e+00> : vector<256x128xf32>
    %67 = tpu.matmul %64, %66, %cst_22 {dimension_numbers = #tpu.dot_dimension_numbers<[1], [0], [0], [1], [0, 0, 1, 1], [], []>} : vector<256x64xbf16>, vector<64x128xbf16>, vector<256x128xf32> -> vector<256x128xf32>
    %68 = arith.addf %58, %67 : vector<256x128xf32>
    %c241_i32 = arith.constant 241 : i32
    %69 = tpu.dynamic_rotate %1 by %c241_i32 dim 0 : vector<256x64xf32>, i32 -> vector<256x64xf32>
    %70 = arith.andi %8, %10 : vector<256x1xi1>
    %71 = arith.extui %70 : vector<256x1xi1> to vector<256x1xi32>
    %72 = arith.sitofp %71 : vector<256x1xi32> to vector<256x1xf32>
    %73 = vector.broadcast %72 : vector<256x1xf32> to vector<256x64xf32>
    %74 = arith.mulf %69, %73 : vector<256x64xf32>
    %75 = arith.truncf %74 : vector<256x64xf32> to vector<256x64xbf16>
    %c6 = arith.constant 6 : index
    %c0_23 = arith.constant 0 : index
    %c0_24 = arith.constant 0 : index
    %76 = vector.load %arg2[%c6, %c0_23, %c0_24] : memref<9x64x128xbf16, #tpu.memory_space<vmem>>, vector<1x64x128xbf16>
    %77 = vector.shape_cast %76 : vector<1x64x128xbf16> to vector<64x128xbf16>
    %cst_25 = arith.constant dense<0.000000e+00> : vector<256x128xf32>
    %78 = tpu.matmul %75, %77, %cst_25 {dimension_numbers = #tpu.dot_dimension_numbers<[1], [0], [0], [1], [0, 0, 1, 1], [], []>} : vector<256x64xbf16>, vector<64x128xbf16>, vector<256x128xf32> -> vector<256x128xf32>
    %79 = arith.addf %68, %78 : vector<256x128xf32>
    %c240_i32_26 = arith.constant 240 : i32
    %80 = tpu.dynamic_rotate %1 by %c240_i32_26 dim 0 : vector<256x64xf32>, i32 -> vector<256x64xf32>
    %81 = arith.extui %8 : vector<256x1xi1> to vector<256x1xi32>
    %82 = arith.sitofp %81 : vector<256x1xi32> to vector<256x1xf32>
    %83 = vector.broadcast %82 : vector<256x1xf32> to vector<256x64xf32>
    %84 = arith.mulf %80, %83 : vector<256x64xf32>
    %85 = arith.truncf %84 : vector<256x64xf32> to vector<256x64xbf16>
    %c7 = arith.constant 7 : index
    %c0_27 = arith.constant 0 : index
    %c0_28 = arith.constant 0 : index
    %86 = vector.load %arg2[%c7, %c0_27, %c0_28] : memref<9x64x128xbf16, #tpu.memory_space<vmem>>, vector<1x64x128xbf16>
    %87 = vector.shape_cast %86 : vector<1x64x128xbf16> to vector<64x128xbf16>
    %cst_29 = arith.constant dense<0.000000e+00> : vector<256x128xf32>
    %88 = tpu.matmul %85, %87, %cst_29 {dimension_numbers = #tpu.dot_dimension_numbers<[1], [0], [0], [1], [0, 0, 1, 1], [], []>} : vector<256x64xbf16>, vector<64x128xbf16>, vector<256x128xf32> -> vector<256x128xf32>
    %89 = arith.addf %79, %88 : vector<256x128xf32>
    %c239_i32 = arith.constant 239 : i32
    %90 = tpu.dynamic_rotate %1 by %c239_i32 dim 0 : vector<256x64xf32>, i32 -> vector<256x64xf32>
    %91 = arith.andi %8, %12 : vector<256x1xi1>
    %92 = arith.extui %91 : vector<256x1xi1> to vector<256x1xi32>
    %93 = arith.sitofp %92 : vector<256x1xi32> to vector<256x1xf32>
    %94 = vector.broadcast %93 : vector<256x1xf32> to vector<256x64xf32>
    %95 = arith.mulf %90, %94 : vector<256x64xf32>
    %96 = arith.truncf %95 : vector<256x64xf32> to vector<256x64xbf16>
    %c8 = arith.constant 8 : index
    %c0_30 = arith.constant 0 : index
    %c0_31 = arith.constant 0 : index
    %97 = vector.load %arg2[%c8, %c0_30, %c0_31] : memref<9x64x128xbf16, #tpu.memory_space<vmem>>, vector<1x64x128xbf16>
    %98 = vector.shape_cast %97 : vector<1x64x128xbf16> to vector<64x128xbf16>
    %cst_32 = arith.constant dense<0.000000e+00> : vector<256x128xf32>
    %99 = tpu.matmul %96, %98, %cst_32 {dimension_numbers = #tpu.dot_dimension_numbers<[1], [0], [0], [1], [0, 0, 1, 1], [], []>} : vector<256x64xbf16>, vector<64x128xbf16>, vector<256x128xf32> -> vector<256x128xf32>
    %100 = arith.addf %89, %99 : vector<256x128xf32>
    %c0_33 = arith.constant 0 : index
    %c0_34 = arith.constant 0 : index
    %101 = vector.load %arg3[%c0_33, %c0_34] : memref<1x128xf32, #tpu.memory_space<vmem>>, vector<1x128xf32>
    %102 = vector.broadcast %101 : vector<1x128xf32> to vector<256x128xf32>
    %103 = arith.addf %100, %102 : vector<256x128xf32>
    %cst_35 = arith.constant 0.000000e+00 : f32
    %104 = vector.broadcast %cst_35 : f32 to vector<256x128xf32>
    %105 = arith.maximumf %103, %104 : vector<256x128xf32>
    %cst_36 = arith.constant dense<0.000000e+00> : vector<128xf32>
    %106 = vector.multi_reduction <add>, %105, %cst_36 [0] : vector<256x128xf32> to vector<128xf32>
    %107 = vector.shape_cast %106 : vector<128xf32> to vector<1x128xf32>
    %cst_37 = arith.constant 3.906250e-03 : f32
    %108 = vector.broadcast %cst_37 : f32 to vector<1x128xf32>
    %109 = arith.mulf %107, %108 : vector<1x128xf32>
    %110 = vector.shape_cast %109 : vector<1x128xf32> to vector<1x128xf32>
    %111 = vector.broadcast %110 : vector<1x128xf32> to vector<8x128xf32>
    %c0_38 = arith.constant 0 : index
    %c0_39 = arith.constant 0 : index
    %112 = vector.load %arg4[%c0_38, %c0_39] : memref<128x128xf32, #tpu.memory_space<vmem>>, vector<128x128xf32>
    %cst_40 = arith.constant dense<0.000000e+00> : vector<8x128xf32>
    %113 = tpu.matmul %111, %112, %cst_40 {dimension_numbers = #tpu.dot_dimension_numbers<[1], [0], [0], [1], [0, 0, 1, 1], [], []>} : vector<8x128xf32>, vector<128x128xf32>, vector<8x128xf32> -> vector<8x128xf32>
    %114 = vector.extract_strided_slice %113 {offsets = [0, 0], sizes = [1, 128], strides = [1, 1]} : vector<8x128xf32> to vector<1x128xf32>
    %c0_41 = arith.constant 0 : index
    %c0_42 = arith.constant 0 : index
    %115 = vector.load %arg5[%c0_41, %c0_42] : memref<1x128xf32, #tpu.memory_space<vmem>>, vector<1x128xf32>
    %116 = arith.addf %114, %115 : vector<1x128xf32>
    %cst_43 = arith.constant 0.000000e+00 : f32
    %117 = vector.broadcast %cst_43 : f32 to vector<1x128xf32>
    %118 = arith.subf %117, %116 : vector<1x128xf32>
    %119 = math.exp %118 : vector<1x128xf32>
    %cst_44 = arith.constant 1.000000e+00 : f32
    %120 = vector.broadcast %cst_44 : f32 to vector<1x128xf32>
    %121 = arith.addf %120, %119 : vector<1x128xf32>
    %cst_45 = arith.constant 1.000000e+00 : f32
    %122 = vector.broadcast %cst_45 : f32 to vector<1x128xf32>
    %123 = arith.divf %122, %121 : vector<1x128xf32>
    %124 = vector.broadcast %123 : vector<1x128xf32> to vector<256x128xf32>
    %125 = arith.mulf %105, %124 : vector<256x128xf32>
    %c0_46 = arith.constant 0 : index
    %c0_47 = arith.constant 0 : index
    %c0_48 = arith.constant 0 : index
    %126 = vector.load %arg6[%c0_46, %c0_47, %c0_48] : memref<1x256x128xf32, #tpu.memory_space<vmem>>, vector<1x256x128xf32>
    %127 = vector.shape_cast %126 : vector<1x256x128xf32> to vector<256x128xf32>
    %128 = vector.shape_cast %125 : vector<256x128xf32> to vector<1x256x128xf32>
    tpu.vector_store %arg6[%c0_46, %c0_47, %c0_48], %128 {strides = array<i32>} : memref<1x256x128xf32, #tpu.memory_space<vmem>>, vector<1x256x128xf32>,
    return
  }
  func.func @transform_0(%arg0: i32) -> (i32, i32, i32) {
    %c0_i32 = arith.constant 0 : i32
    %c0_i32_0 = arith.constant 0 : i32
    %c0_i32_1 = arith.constant 0 : i32
    return %arg0, %c0_i32, %c0_i32_0 : i32, i32, i32
  }
  func.func @transform_1(%arg0: i32) -> (i32, i32, i32) {
    %c0_i32 = arith.constant 0 : i32
    %c0_i32_0 = arith.constant 0 : i32
    %c0_i32_1 = arith.constant 0 : i32
    %c0_i32_2 = arith.constant 0 : i32
    return %c0_i32, %c0_i32_0, %c0_i32_1 : i32, i32, i32
  }
  func.func @transform_2(%arg0: i32) -> (i32, i32) {
    %c0_i32 = arith.constant 0 : i32
    %c0_i32_0 = arith.constant 0 : i32
    %c0_i32_1 = arith.constant 0 : i32
    return %c0_i32, %c0_i32_0 : i32, i32
  }
  func.func @transform_3(%arg0: i32) -> (i32, i32) {
    %c0_i32 = arith.constant 0 : i32
    %c0_i32_0 = arith.constant 0 : i32
    %c0_i32_1 = arith.constant 0 : i32
    return %c0_i32, %c0_i32_0 : i32, i32
  }
  func.func @transform_4(%arg0: i32) -> (i32, i32) {
    %c0_i32 = arith.constant 0 : i32
    %c0_i32_0 = arith.constant 0 : i32
    %c0_i32_1 = arith.constant 0 : i32
    return %c0_i32, %c0_i32_0 : i32, i32
  }
  func.func @transform_5(%arg0: i32) -> (i32, i32, i32) {
    %c0_i32 = arith.constant 0 : i32
    %c0_i32_0 = arith.constant 0 : i32
    %c0_i32_1 = arith.constant 0 : i32
    return %arg0, %c0_i32, %c0_i32_0 : i32, i32, i32
  }
}

</mosaic_0001>

<bundles_post_ra>
// kernel: tpu_custom_call.1
= control target key start
LH: loop header
LB: loop body
LE: loop exit
PB: predicated region body
PF: predicated region fallthrough
CT: control target
= control target key end

     0   :  { %10 = vsyncpa [#allocation3], 0  ;;  %s7792_s0 = inlined_call_operand.vmem [shape: f32[2,256,64], index: 0, kind: input, shape index: {}]   ;;  %s7793_s1 = inlined_call_operand.vmem [shape: bf16[9,64,128], index: 1, kind: input, shape index: {}]   ;;  %s7794_s2 = inlined_call_operand.vmem [shape: f32[1,128], index: 2, kind: input, shape index: {}]   ;;  %s7795_s3 = inlined_call_operand.vmem [shape: f32[128,128], index: 3, kind: input, shape index: {}]   ;;  %s7796_s4 = inlined_call_operand.vmem [shape: f32[1,128], index: 4, kind: input, shape index: {}]   ;;  %s7797_s5 = inlined_call_operand.hbm [shape: f32[2,256,128], index: 5, kind: output, shape index: {}]  }
   0x1   :  { %12 = vsyncpa [#allocation3 + $0x1], 0  ;;  %s5504_s18 = smov 0   ;;  %s5506_s19 = smov 0  }
   0x2   :  { %s5508_s20 = smov 0   ;;  %s5510_s21 = smov 0  }
   0x3 LB: > { %s5525_s22 = sadd.s32 4294967295, %s5467_s21   ;;  %s4368_s23 = sadd.s32 4294967294, %s5467_s21   ;;  %s5467_s21 = sphi %s5510_s21, %s8263_s21   ;;  %s5463_s20 = sphi %s5508_s20, %s8262_s20   ;;  %s5459_s19 = sphi %s5506_s19, %s8261_s19   ;;  %s5455_s18 = sphi %s5504_s18, %s8260_s18  }
   0x4   : > { %s5529_s24 = sadd.s32 1, %s5467_s21   ;;  %s135_s25 = sadd.s32 1, %s5463_s20 }
   0x5   : > { %s132_s26 = ssub.s32 %s5467_s21, %s5529_s24  ;;  %p145_p0 = scmp.ne.s32.totalorder %s5463_s20, %s5459_s19 }
   0x6   : > { %p133_p1 = scmp.eq.s32.totalorder %s132_s26, 0  ;;  %p146_p2 = scmp.eq.s32.totalorder %s5525_s22, 1 }
   0x7   : > { %p151_p3 = scmp.ne.s32.totalorder %s5459_s19, %s5455_s18  ;;  %p152_p4 = scmp.eq.s32.totalorder %s4368_s23, 1 }
   0x8   : > { %s5540_s27 = scalar_select %p133_p1, %s5463_s20, %s135_s25  }
   0x9   : > { %p5542_p5 = por %p146_p2, %p145_p0  ;;  %p5546_p6 = por %p152_p4, %p151_p3 }
   0xa   : > { %p4371_p7 = scmp.ge.s32.totalorder %s5467_s21, 1  ;;  %p190_p8 = scmp.lt.s32.totalorder %s5467_s21, 3 }
   0xc   : > { %p191_p9 = pnand %p4371_p7, %p190_p8 }
   0xe   : > { %194 = sbr.rel (%p191_p9) target bundleno = 822 (0x336), region = 40 }
  0x13   : > { %v5362_v0 = vld [vmem:[%s7793_s1 + $0x18] sm:$0xff]   ;;  %p218_p10 = scmp.lt.s32.totalorder %s5525_s22, 1  ;;  %v256_v1 = vlaneseq  ;;  %v5363_v2 = vld [vmem:[%s7793_s1 + $0x10] sm:$0xff]   ;;  %v5364_v4 = vld [vmem:[%s7793_s1 + $0x8] sm:$0xff]   ;;  %v7800_v27 = vmov 0.0   ;;  %vm715_vm2 = vcmask 523264  }
  0x14   : > { %4916 = vmatprep.subr.bf16.mxu0 %v5362_v0  ;;  %5311 = vmatprep.subr.bf16.mxu1 %v5362_v0  ;;  %v5365_v16 = vld [vmem:[%s7793_s1] sm:$0xff]   ;;  %v5638_v37 = vld [vmem:[%s7793_s1 + $0x38] sm:$0xff]   ;;  %v5368_v33 = vld [vmem:[%s7793_s1 + $0x30] sm:$0xff]   ;;  %s5471_s25 = smov [#allocation2]  }
  0x15   : > { %s219_s9 = scalar_select %p218_p10, %s5525_s22, 1  ;;  %4917 = vmatpush3.bf16.msra.mxu0 %v5362_v0  ;;  %5315 = vmatpush3.bf16.msra.mxu1 %v5362_v0  ;;  %v5560_v3 = vshrl.u32 %v256_v1, 7  ;;  %v5643_v38 = vld [vmem:[%s7793_s1 + $0x98] sm:$0xff]  }
  0x16   : > { %4918 = vmatprep.subr.bf16.mxu0 %v5363_v2  ;;  %5312 = vmatprep.subr.bf16.mxu1 %v5363_v2  ;;  %s5411_s26 = sshll.u32 %s5471_s25, 4  ;;  %s5412_s26 = int_to_ptr.vmem [resolvable:$false] %s5411_s26 }
  0x17   : > { %7954 = vst [vmem:[#allocation5_spill] sm:$0xff] %v5560_v3  ;;  %s4717_s12 = sshll.u32 %s219_s9, 8  ;;  %v285_v5 = vadd.s32 224, %v5560_v3  ;;  %v287_v6 = vadd.s32 240, %v5560_v3  ;;  %v273_v7 = vadd.s32 128, %v5560_v3  ;;  %vm506_vm0 = vcmp.lt.s32.totalorder %v5560_v3, 1 }
  0x18   : > { %s5568_s15 = scalar_lea.vmem %s7792_s0, %s4717_s12  ;;  %v275_v11 = vadd.s32 144, %v5560_v3  ;;  %v277_v12 = vadd.s32 160, %v5560_v3  ;;  %v259_v42 = vadd.s32 16, %v5560_v3  ;;  %v279_v0 = vadd.s32 176, %v5560_v3  ;;  %s215_s9 = sand.u32 1, %s5459_s19  }
  0x19   : > { %v5574_v8 = vld [vmem:[%s5568_s15 + $0xe8] sm:$0xff]  ;;  %v5577_v9 = vld [vmem:[%s5568_s15 + $0xf0] sm:$0xff]  ;;  %v5580_v10 = vld [vmem:[%s5568_s15 + $0xf8] sm:$0xff]  ;;  %4919 = vmatpush3.bf16.msra.mxu0 %v5363_v2  ;;  %5316 = vmatpush3.bf16.msra.mxu1 %v5363_v2  ;;  %v319_v13 = vand.u32 15, %v287_v6  ;;  %v305_v23 = vand.u32 15, %v273_v7  ;;  %v317_v25 = vand.u32 15, %v285_v5 }
  0x1a   : > { %7955 = vst [vmem:[#allocation6_spill] sm:$0xff] %v5574_v8  ;;  %7956 = vst [vmem:[#allocation7_spill] sm:$0xff] %v5577_v9  ;;  %v7799_v14 = vrot.slane %v5574_v8, 7  ;;  %v504_v15 = vrot.slane %v5577_v9, 7  ;;  %4920 = vmatprep.subr.bf16.mxu0 %v5364_v4  ;;  %5313 = vmatprep.subr.bf16.mxu1 %v5364_v4  ;;  %v505_v17 = vrot.slane %v5580_v10, 7  ;;  %v307_v18 = vand.u32 15, %v275_v11 }
  0x1b   : > { %7957 = vst [vmem:[#allocation8_spill] sm:$0xff] %v5580_v10  ;;  %v5593_v19 = vpack.c.bf16 %v5580_v10, %v5577_v9  ;;  %vm415_vm1 = vcmp.ge.s32.totalorder %v319_v13, 1  ;;  %v5602_v21 = vld [vmem:[%s5568_s15 + $0x88] sm:$0xff]  ;;  %v5605_v22 = vld [vmem:[%s5568_s15 + $0x90] sm:$0xff]  ;;  %v309_v24 = vand.u32 15, %v277_v12  ;;  %v5618_v30 = vld [vmem:[%s5568_s15 + $0x98] sm:$0xff] }
  0x1c   : > { %v5599_v20 = vsel %vm506_vm0, %v7799_v14, %v504_v15  ;;  %v5611_v26 = vsel %vm506_vm0, %v504_v15, %v505_v17  ;;  %v5614_v28 = vsel %vm415_vm1, 1.0, %v7800_v27  ;;  %vm5625_vm3 = vcmp.ge.s32.totalorder %v307_v18, 1  ;;  %v5646_v40 = vld [vmem:[%s5568_s15 + $0xa0] sm:$0xff]  ;;  %v5658_v45 = vld [vmem:[%s5568_s15 + $0x8] sm:$0xff]  ;;  %v5695_v57 = vld [vmem:[%s5568_s15 + $0xb0] sm:$0xff]  ;;  %s4372_s10 = sshll.u32 %s215_s9, 8 }
  0x1d   : > { %7958 = vst [vmem:[#allocation9_spill] sm:$0xff] %v5593_v19  ;;  %7959 = vst [vmem:[#allocation10_spill] sm:$0xff] %v5599_v20  ;;  %v635_v29 = vmul.f32 0.0, %v5599_v20  ;;  %4921 = vmatpush3.bf16.msra.mxu0 %v5364_v4  ;;  %5317 = vmatpush3.bf16.msra.mxu1 %v5364_v4  ;;  %v636_v31 = vmul.f32 0.0, %v5611_v26  ;;  %v5623_v32 = vmul.f32 %v5614_v28, %v5599_v20  ;;  %vm5629_vm4 = vcmp.ge.s32.totalorder %v309_v24, 1  ;;  %v5655_v44 = vld [vmem:[%s5568_s15] sm:$0xff] }
  0x1e   : > { %7960 = vst [vmem:[#allocation11_spill] sm:$0xff] %v5611_v26  ;;  %4922 = vmatprep.subr.bf16.mxu0 %v5365_v16  ;;  %5314 = vmatprep.subr.bf16.mxu1 %v5365_v16  ;;  %v7798_v35 = vrot.slane %v5602_v21, 7  ;;  %v492_v36 = vrot.slane %v5605_v22, 7  ;;  %vm401_vm5 = vcmp.ge.s32.totalorder %v305_v23, 1  ;;  %v493_v41 = vrot.slane %v5618_v30, 7  ;;  %7966 = vst [vmem:[#allocation13_spill] sm:$0xff] %v5655_v44 }
  0x1f   : > { %7961 = vst [vmem:[#allocation12_spill] sm:$0xff] %v5623_v32  ;;  %v667_v39 = vpack.c.bf16 %v636_v31, %v635_v29  ;;  %vm413_vm6 = vcmp.ge.s32.totalorder %v317_v25, 1  ;;  %7967 = vst [vmem:[#allocation14_spill] sm:$0xff] %v5658_v45  ;;  %v5667_v47 = vsel %vm5625_vm3, 1.0, %v7800_v27  ;;  %v5672_v48 = vsel %vm5629_vm4, 1.0, %v7800_v27  ;;  %v5687_v53 = vld [vmem:[%s5568_s15 + $0xa8] sm:$0xff] }
  0x20   : > { %v520_v43 = vsel %vm506_vm0, %v7798_v35, %v492_v36  ;;  %v5662_v46 = vsel %vm506_vm0, %v492_v36, %v493_v41  ;;  %7969 = vst [vmem:[#allocation16_spill] sm:$0xff] %v5667_v47  ;;  %7970 = vst [vmem:[#allocation17_spill] sm:$0xff] %v5672_v48  ;;  %v5676_v49 = vsel %vm401_vm5, 1.0, %v7800_v27  ;;  %v5684_v52 = vsel %vm413_vm6, 1.0, %v7800_v27  ;;  %v5703_v62 = vld [vmem:[%s5568_s15 + $0x10] sm:$0xff]  ;;  %v5709_v1 = vld [vmem:[%s5568_s15 + $0x18] sm:$0xff] }
  0x21   : > { %4923 = vmatpush3.bf16.msra.mxu0 %v5365_v16  ;;  %5318 = vmatpush3.bf16.msra.mxu1 %v5365_v16  ;;  %7968 = vst [vmem:[#allocation15_spill] sm:$0xff] %v5662_v46  ;;  %v655_v50 = vmul.f32 %v5672_v48, %v520_v43  ;;  %v5680_v51 = vmul.f32 %v5667_v47, %v520_v43  ;;  %7972 = vst [vmem:[#allocation19_spill] sm:$0xff] %v5684_v52  ;;  %v494_v54 = vrot.slane %v5646_v40, 7  ;;  %v5712_v2 = vld [vmem:[%s5568_s15 + $0xb8] sm:$0xff]  ;;  %v5743_v31 = vld [vmem:[%s5568_s15 + $0x20] sm:$0xff]  ;;  %s7667_s11 = scalar_lea.vmem [#allocation2], %s4372_s10 }
  0x22   : > { %4924 = vmatprep.mubr.msk.bf16.mxu0 %vm715_vm2, %v667_v39  ;;  %4996 = vmatprep.subr.bf16.mxu0 %v5638_v37  ;;  %v5691_v55 = vmul.f32 %v5676_v49, %v520_v43  ;;  %v291_v56 = vand.u32 15, %v259_v42  ;;  %7974 = vst [vmem:[#allocation21_spill] sm:$0xff] %v5695_v57  ;;  %v474_v60 = vrot.slane %v5655_v44, 7  ;;  %v475_v61 = vrot.slane %v5658_v45, 7  ;;  %v5815_v63 = vld [vmem:[%s5568_s15 + $0xd0] sm:$0xff]  ;;  %v5370_v20 = vld [vmem:[%s7793_s1 + $0x88] sm:$0xff]  }
  0x23   : > { %7971 = vst [vmem:[#allocation18_spill] sm:$0xff] %v5680_v51  ;;  %4956 = vmatprep.subr.bf16.mxu1 %v5643_v38  ;;  %v677_v58 = vpack.c.bf16 %v5662_v46, %v655_v50  ;;  %v495_v4 = vrot.slane %v5687_v53, 7  ;;  %v496_v11 = vrot.slane %v5695_v57, 7  ;;  %v311_v13 = vand.u32 15, %v279_v0  ;;  %v5783_v0 = vld [vmem:[%s5568_s15 + $0xc8] sm:$0xff]  ;;  %s4718_s12 = sshll.u32 %s5525_s22, 12 }
  0x24   : > { %7973 = vst [vmem:[#allocation20_spill] sm:$0xff] %v5691_v55  ;;  %vm387_vm7 = vcmp.ge.s32.totalorder %v291_v56, 1  ;;  %v5718_v5 = vsel %vm506_vm0, %v474_v60, %v475_v61  ;;  %v5724_v6 = vsel %vm506_vm0, %v505_v17, %v474_v60  ;;  %v261_v15 = vadd.s32 32, %v5560_v3  ;;  %v5774_v56 = vld [vmem:[%s5568_s15 + $0xc0] sm:$0xff]  ;;  %s4306_s13 = sshll.u32 %s7667_s11, 4  ;;  %s7726_s16 = scalar_lea.hbm %s7797_s5, %s4718_s12  ;;  %s7728_s13 = int_to_ptr.vmem [resolvable:$true] %s4306_s13 }
  0x25   : > { %4944 = vmatprep.mubr.msk.bf16.mxu1 %vm715_vm2, %v677_v58  ;;  %7975 = vst [vmem:[#allocation22_spill] sm:$0xff] %v5718_v5  ;;  %7976 = vst [vmem:[#allocation23_spill] sm:$0xff] %v5724_v6  ;;  %v5727_v7 = vsel %vm387_vm7, 1.0, %v7800_v27  ;;  %v5735_v16 = vsel %vm506_vm0, %v493_v41, %v494_v54  ;;  %v476_v18 = vrot.slane %v5703_v62, 7  ;;  %v477_v17 = vrot.slane %v5709_v1, 7  ;;  %s7752_s17 = scalar_lea.sflag [#allocation3], %s215_s9  ;;  %p5414_p0 = scmp.lt.s32.totalorder %s7728_s13, %s5412_s26 }
  0x26   : > { %7977 = vst [vmem:[#allocation24_spill] sm:$0xff] %v5727_v7  ;;  %v637_v12 = vmul.f32 %v5727_v7, %v5724_v6  ;;  %7978 = vst [vmem:[#allocation25_spill] sm:$0xff] %v5735_v16  ;;  %v281_v23 = vadd.s32 192, %v5560_v3  ;;  %vm407_vm8 = vcmp.ge.s32.totalorder %v311_v13, 1  ;;  %v293_v25 = vand.u32 15, %v261_v15  ;;  %s5407_s23 = scalar_lea.vmem %s7728_s13, 4096 }
  0x27   : > { %v497_v29 = vrot.slane %v5712_v2, 7  ;;  %v5750_v34 = vsel %vm506_vm0, %v494_v54, %v495_v4  ;;  %v5753_v36 = vsel %vm407_vm8, 1.0, %v7800_v27  ;;  %v5757_v39 = vsel %vm506_vm0, %v475_v61, %v476_v18  ;;  %v5771_v54 = vld [vmem:[%s5568_s15 + $0x28] sm:$0xff]  ;;  %p5408_p11 = scmp.ne.s32.totalorder %s7728_s13, %s5407_s23  ;;  %s5413_s30 = scalar_lea.vmem %s5412_s26, 8192 }
  0x28   : > { %v668_v24 = vpack.c.bf16 %v5718_v5, %v637_v12  ;;  %7979 = vst [vmem:[#allocation26_spill] sm:$0xff] %v5750_v34  ;;  %7980 = vst [vmem:[#allocation27_spill] sm:$0xff] %v5753_v36  ;;  %v313_v41 = vand.u32 15, %v281_v23  ;;  %v5761_v42 = vsel %vm506_vm0, %v495_v4, %v496_v11  ;;  %v657_v43 = vmul.f32 %v5753_v36, %v5735_v16  ;;  %v5369_v4 = vld [vmem:[%s7793_s1 + $0x90] sm:$0xff]   ;;  %v5372_v23 = vld [vmem:[%s7793_s1 + $0x28] sm:$0xff]   ;;  %p5415_p1 = scmp.lt.s32.totalorder %s5413_s30, %s5407_s23 }
  0x29   : > { %7981 = vst [vmem:[#allocation28_spill] sm:$0xff] %v5757_v39  ;;  %7982 = vst [vmem:[#allocation29_spill] sm:$0xff] %v5761_v42  ;;  %vm389_vm9 = vcmp.ge.s32.totalorder %v293_v25, 1  ;;  %v5768_v50 = vsel %vm506_vm0, %v476_v18, %v477_v17  ;;  %v263_v60 = vadd.s32 48, %v5560_v3  ;;  %v478_v61 = vrot.slane %v5743_v31, 7  ;;  %v5799_v18 = vld [vmem:[%s5568_s15 + $0x30] sm:$0xff]  ;;  %p5409_p12 = pnand %p5408_p11, %p5542_p5 }
  0x2a   : > { %4925 = vmatmul.mubr.msk.bf16.vlgmr.msra.gmra.mxu0 %vm715_vm2, %v668_v24  ;;  %7983 = vst [vmem:[#allocation30_spill] sm:$0xff] %v5768_v50  ;;  %v5778_v58 = vsel %vm389_vm9, 1.0, %v7800_v27  ;;  %vm409_vm10 = vcmp.ge.s32.totalorder %v313_v41, 1  ;;  %v678_v12 = vpack.c.bf16 %v5750_v34, %v657_v43  ;;  %v5793_v13 = vsel %vm506_vm0, %v496_v11, %v497_v29  ;;  %v5812_v43 = vld [vmem:[%s5568_s15 + $0x38] sm:$0xff]  ;;  %v5923_v16 = vld [vmem:[%s5568_s15 + $0x60] sm:$0xff]  ;;  %p5416_p2 = por %p5415_p1, %p5414_p0 }
  0x2b   : > { %4997 = vmatpush3.bf16.msra.mxu0 %v5638_v37  ;;  %7984 = vst [vmem:[#allocation31_spill] sm:$0xff] %v5778_v58  ;;  %v639_v37 = vmul.f32 %v5778_v58, %v5757_v39  ;;  %7985 = vst [vmem:[#allocation32_spill] sm:$0xff] %v5793_v13  ;;  %v5796_v15 = vsel %vm409_vm10, 1.0, %v7800_v27  ;;  %v295_v25 = vand.u32 15, %v263_v60  ;;  %v479_v41 = vrot.slane %v5771_v54, 7  ;;  %p5410_p13 = pneg %p5409_p12 }
  0x2c   : > { %7986 = vst [vmem:[#allocation33_spill] sm:$0xff] %v5796_v15  ;;  %4998 = vmatprep.subr.bf16.mxu0 %v5368_v33  ;;  %v659_v24 = vmul.f32 %v5796_v15, %v5761_v42  ;;  %v5809_v11 = vsel %vm506_vm0, %v477_v17, %v478_v61  ;;  %4945 = vmatmul.mubr.msk.bf16.vlgmr.msra.gmra.mxu1 %vm715_vm2, %v678_v12  ;;  %v283_v60 = vadd.s32 208, %v5560_v3  ;;  %v498_v14 = vrot.slane %v5774_v56, 7  ;;  %v5371_v15 = vld [vmem:[%s7793_s1 + $0x80] sm:$0xff]  }
  0x2d   : > { %v669_v59 = vpack.c.bf16 %v5768_v50, %v639_v37  ;;  %v5821_v35 = vmul.f32 %v5727_v7, %v5809_v11  ;;  %vm391_vm11 = vcmp.ge.s32.totalorder %v295_v25, 1  ;;  %v5828_v27 = vsel %vm506_vm0, %v478_v61, %v479_v41  ;;  %4957 = vmatpush3.bf16.msra.mxu1 %v5643_v38  ;;  %v5833_v37 = vld [vmem:[%s5568_s15 + $0xd8] sm:$0xff]  ;;  %v5861_v61 = vld [vmem:[%s5568_s15 + $0x48] sm:$0xff]  ;;  %p5417_p3 = pnand %p5416_p2, %p5410_p13 }
  0x2e   : > { %v679_v17 = vpack.c.bf16 %v5793_v13, %v659_v24  ;;  %v499_v12 = vrot.slane %v5783_v0, 7  ;;  %7988 = vst [vmem:[#allocation35_spill] sm:$0xff] %v5833_v37  ;;  %v7989_v24 = vmov 0.0   ;;  %v315_v55 = vand.u32 15, %v283_v60  ;;  %4958 = vmatprep.subr.bf16.mxu1 %v5369_v4  ;;  %v5926_v50 = vld [vmem:[%s5568_s15 + $0x68] sm:$0xff] }
  0x2f   : > { %7987 = vst [vmem:[#allocation34_spill] sm:$0xff] %v5821_v35  ;;  %4999 = vmatpush3.bf16.msra.mxu0 %v5368_v33  ;;  %4928 = vmatprep.mubr.msk.bf16.mxu0 %vm715_vm2, %v669_v59  ;;  %v5840_v25 = vsel %vm391_vm11, 1.0, %v7989_v24  ;;  %v5846_v38 = vsel %vm506_vm0, %v497_v29, %v498_v14  ;;  %v5849_v33 = vld [vmem:[%s5568_s15 + $0x40] sm:$0xff]  ;;  %v265_v32 = vadd.s32 64, %v5560_v3  ;;  %v480_v60 = vrot.slane %v5799_v18, 7 }
  0x30   : > { %7990 = vst [vmem:[#allocation36_spill] sm:$0xff] %v5840_v25  ;;  %7991 = vst [vmem:[#allocation37_spill] sm:$0xff] %v5846_v38  ;;  %4948 = vmatprep.mubr.msk.bf16.mxu1 %vm715_vm2, %v679_v17  ;;  %v641_v26 = vmul.f32 %v5840_v25, %v5809_v11  ;;  %v5856_v59 = vsel %vm506_vm0, %v498_v14, %v499_v12  ;;  %v5864_v29 = vld [vmem:[%s5568_s15 + $0xe0] sm:$0xff]  ;;  %5000 = vmatprep.subr.bf16.mxu0 %v5372_v23  ;;  %vm411_vm12 = vcmp.ge.s32.totalorder %v315_v55, 1 }
  0x31   : > { %7992 = vst [vmem:[#allocation38_spill] sm:$0xff] %v5856_v59  ;;  %7993 = vst [vmem:[#allocation39_spill] sm:$0xff] %v5864_v29  ;;  %v5373_v17 = vld [vmem:[%s7793_s1 + $0x20] sm:$0xff]   ;;  %v481_v35 = vrot.slane %v5812_v43, 7  ;;  %v500_v14 = vrot.slane %v5815_v63, 7  ;;  %v501_v13 = vrot.slane %v5833_v37, 7  ;;  %4959 = vmatpush3.bf16.msra.mxu1 %v5369_v4  ;;  %v5881_v55 = vsel %vm506_vm0, %v479_v41, %v480_v60 }
  0x32   : > { %v670_v36 = vpack.c.bf16 %v5828_v27, %v641_v26  ;;  %v5877_v42 = vsel %vm411_vm12, 1.0, %v7989_v24  ;;  %v297_v51 = vand.u32 15, %v265_v32  ;;  %7995 = vst [vmem:[#allocation41_spill] sm:$0xff] %v5881_v55  ;;  %4960 = vmatprep.subr.bf16.mxu1 %v5370_v20  ;;  %v5898_v4 = vld [vmem:[%s5568_s15 + $0x50] sm:$0xff]  ;;  %v267_v41 = vadd.s32 80, %v5560_v3 }
  0x33   : > { %7994 = vst [vmem:[#allocation40_spill] sm:$0xff] %v5877_v42  ;;  %5001 = vmatpush3.bf16.msra.mxu0 %v5372_v23  ;;  %v661_v46 = vmul.f32 %v5877_v42, %v5846_v38  ;;  %v5887_v34 = vsel %vm506_vm0, %v480_v60, %v481_v35  ;;  %v5891_v26 = vsel %vm506_vm0, %v500_v14, %v501_v13  ;;  %v482_v60 = vrot.slane %v5849_v33, 7 }
  0x34   : > { %7996 = vst [vmem:[#allocation42_spill] sm:$0xff] %v5887_v34  ;;  %7997 = vst [vmem:[#allocation43_spill] sm:$0xff] %v5891_v26  ;;  %v5895_v32 = vsel %vm506_vm0, %v499_v12, %v500_v14  ;;  %4929 = vmatmul.mubr.msk.bf16.gmra.mxu0 %vm715_vm2, %v670_v36  ;;  %vm393_vm13 = vcmp.ge.s32.totalorder %v297_v51, 1  ;;  %5002 = vmatprep.subr.bf16.mxu0 %v5373_v17  ;;  %v5908_v12 = vld [vmem:[%s7793_s1 + $0x78] sm:$0xff]   ;;  %v483_v51 = vrot.slane %v5861_v61, 7  ;;  %v502_v42 = vrot.slane %v5864_v29, 7 }
  0x35   : > { %7998 = vst [vmem:[#allocation44_spill] sm:$0xff] %v5895_v32  ;;  %v663_v23 = vmul.f32 %v5684_v52, %v5895_v32  ;;  %v680_v14 = vpack.c.bf16 %v5856_v59, %v661_v46  ;;  %v5912_v36 = vsel %vm393_vm13, 1.0, %v7989_v24  ;;  %v5917_v52 = vld [vmem:[%s5568_s15 + $0x58] sm:$0xff]  ;;  %v299_v48 = vand.u32 15, %v267_v41  ;;  %4961 = vmatpush3.bf16.msra.mxu1 %v5370_v20 }
  0x36   : > { %v643_v32 = vmul.f32 %v5912_v36, %v5881_v55  ;;  %v5931_v46 = vsel %vm506_vm0, %v481_v35, %v482_v60  ;;  %v7999_v59 = vrot.slane %v5574_v8, 7  ;;  %v5941_v20 = vsel %vm506_vm0, %v501_v13, %v502_v42  ;;  %4962 = vmatprep.subr.bf16.mxu1 %v5371_v15 }
  0x37   : > { %v681_v38 = vpack.c.bf16 %v5891_v26, %v663_v23  ;;  %5003 = vmatpush3.bf16.msra.mxu0 %v5373_v17  ;;  %4949 = vmatmul.mubr.msk.bf16.gmra.mxu1 %vm715_vm2, %v680_v14  ;;  %8001 = vst [vmem:[#allocation46_spill] sm:$0xff] %v5941_v20  ;;  %v269_v17 = vadd.s32 96, %v5560_v3  ;;  %v5947_v23 = vld [vmem:[%s7793_s1 + $0x58] sm:$0xff]   ;;  %vm395_vm14 = vcmp.ge.s32.totalorder %v299_v48, 1  ;;  %v5957_v13 = vsel %vm506_vm0, %v482_v60, %v483_v51  ;;  %v5964_v14 = vld [vmem:[%s5568_s15 + $0x70] sm:$0xff] }
  0x38   : > { %v5937_v55 = vsel %vm506_vm0, %v502_v42, %v7999_v59  ;;  %v671_v35 = vpack.c.bf16 %v5887_v34, %v643_v32  ;;  %v665_v59 = vmul.f32 %v5614_v28, %v5941_v20  ;;  %v484_v42 = vrot.slane %v5898_v4, 7  ;;  %5076 = vmatprep.subr.bf16.mxu0 %v5908_v12  ;;  %v5979_v26 = vld [vmem:[%s5568_s15 + $0x78] sm:$0xff] }
  0x39   : > { %8000 = vst [vmem:[#allocation45_spill] sm:$0xff] %v5937_v55  ;;  %4952 = vmatprep.mubr.msk.bf16.mxu1 %vm715_vm2, %v681_v38  ;;  %v5960_v41 = vsel %vm395_vm14, 1.0, %v7989_v24  ;;  %v301_v32 = vand.u32 15, %v269_v17  ;;  %v485_v38 = vrot.slane %v5917_v52, 7  ;;  %4963 = vmatpush3.bf16.msra.mxu1 %v5371_v15  ;;  %v5975_v60 = vpack.c.bf16 %v5658_v45, %v5655_v44  ;;  %v5985_v15 = vld [vmem:[%s5568_s15 + $0x80] sm:$0xff] }
  0x3a   : > { %4932 = vmatprep.mubr.msk.bf16.mxu0 %vm715_vm2, %v671_v35  ;;  %v645_v28 = vmul.f32 %v5960_v41, %v5931_v46  ;;  %v5971_v48 = vsel %vm506_vm0, %v483_v51, %v484_v42  ;;  %v271_v17 = vadd.s32 112, %v5560_v3  ;;  %v682_v20 = vpack.c.bf16 %v5937_v55, %v665_v59  ;;  %5036 = vmatprep.subr.bf16.mxu1 %v5947_v23 }
  0x3b   : > { %vm397_vm15 = vcmp.ge.s32.totalorder %v301_v32, 1  ;;  %v486_v35 = vrot.slane %v5923_v16, 7  ;;  %v487_v34 = vrot.slane %v5926_v50, 7  ;;  %v5991_v7 = vsel %vm506_vm0, %v484_v42, %v485_v38 }
  0x3c   : > { %v672_v51 = vpack.c.bf16 %v5957_v13, %v645_v28  ;;  %v5994_v39 = vsel %vm397_vm15, 1.0, %v7989_v24  ;;  %v303_v5 = vand.u32 15, %v271_v17  ;;  %v488_v55 = vrot.slane %v5964_v14, 7 }
  0x3d   : > { %v647_v59 = vmul.f32 %v5994_v39, %v5971_v48  ;;  %v6000_v32 = vsel %vm506_vm0, %v485_v38, %v486_v35  ;;  %v489_v28 = vrot.slane %v5979_v26, 7  ;;  %v490_v42 = vrot.slane %v5985_v15, 7 }
  0x3e   : > { %4933 = vmatmul.mubr.msk.bf16.gmra.mxu0 %vm715_vm2, %v672_v51  ;;  %vm399_vm1 = vcmp.ge.s32.totalorder %v303_v5, 1  ;;  %v6010_v6 = vsel %vm506_vm0, %v486_v35, %v487_v34  ;;  %v6017_v19 = vsel %vm506_vm0, %v487_v34, %v488_v55  ;;  %v6046_v45 = vpack.c.bf16 %v5618_v30, %v5605_v22 }
  0x3f   : > { %4953 = vmatmul.mubr.msk.bf16.gmra.mxu1 %vm715_vm2, %v682_v20  ;;  %v673_v17 = vpack.c.bf16 %v5991_v7, %v647_v59  ;;  %v6013_v38 = vsel %vm399_vm1, 1.0, %v7989_v24  ;;  %v6025_v20 = vsel %vm506_vm0, %v488_v55, %v489_v28  ;;  %v651_v35 = vmul.f32 %v5676_v49, %v6017_v19 }
  0x40   : > { %4964 = vmatprep.mubr.msk.bf16.mxu1 %vm715_vm2, %v5975_v60  ;;  %v649_v5 = vmul.f32 %v6013_v38, %v6000_v32  ;;  %v6033_v34 = vsel %vm506_vm0, %v489_v28, %v490_v42  ;;  %v6037_v59 = vpack.c.bf16 %v5709_v1, %v5703_v62  ;;  %v6042_v55 = vpack.c.bf16 %v5771_v54, %v5743_v31 }
  0x41   : > { %4936 = vmatprep.mubr.msk.bf16.mxu0 %vm715_vm2, %v673_v17  ;;  %v675_v25 = vpack.c.bf16 %v6025_v20, %v651_v35  ;;  %8004 = vst [vmem:[#allocation49_spill] sm:$0xff] %v6046_v45  ;;  %v8005_v17 = vrot.slane %v5602_v21, 7  ;;  %v5376_v35 = vld [vmem:[%s7793_s1 + $0x50] sm:$0xff]   ;;  %v6061_v44 = vpack.c.bf16 %v5833_v37, %v5815_v63  ;;  %v7868_v8 = vrot.slane %v5577_v9, 1 }
  0x42   : > { %v674_v51 = vpack.c.bf16 %v6010_v6, %v649_v5  ;;  %8002 = vst [vmem:[#allocation47_spill] sm:$0xff] %v6037_v59  ;;  %8003 = vst [vmem:[#allocation48_spill] sm:$0xff] %v6042_v55  ;;  %v653_v5 = vmul.f32 %v5667_v47, %v6033_v34  ;;  %v7869_v29 = vrot.slane %v5580_v10, 1  ;;  %v1222_v47 = vmul.f32 0.0, %v5577_v9 }
  0x43   : > { %v6052_v28 = vsel %vm506_vm0, %v490_v42, %v8005_v17  ;;  %8007 = vst [vmem:[#allocation51_spill] sm:$0xff] %v6061_v44  ;;  %vm1576_vm0 = vcmp.lt.s32.totalorder %v5560_v3, 7  ;;  %v260_v42 = vadd.s32 24, %v5560_v3  ;;  %v1223_v44 = vmul.f32 0.0, %v5580_v10 }
  0x44   : > { %8006 = vst [vmem:[#allocation50_spill] sm:$0xff] %v6052_v28  ;;  %v6084_v17 = vsel %vm1576_vm0, %v7868_v8, %v7869_v29  ;;  %v1548_v57 = vrot.slane %v5743_v31, 1  ;;  %v676_v37 = vpack.c.bf16 %v6052_v28, %v653_v5  ;;  %v264_v31 = vadd.s32 56, %v5560_v3 }
  0x45   : > { %8008 = vst [vmem:[#allocation52_spill] sm:$0xff] %v6084_v17  ;;  %v1549_v5 = vrot.slane %v5771_v54, 1  ;;  %v1254_v29 = vpack.c.bf16 %v1223_v44, %v1222_v47  ;;  %v1550_v9 = vrot.slane %v5799_v18, 1 }
  0x46   : > { %4937 = vmatmul.mubr.msk.bf16.gmra.mxu0 %vm715_vm2, %v674_v51  ;;  %v1547_v51 = vrot.slane %v5709_v1, 1  ;;  %v5378_v1 = vld [vmem:[%s7793_s1 + $0x48] sm:$0xff]  }
  0x47   : > { %4965 = vmatmul.mubr.msk.bf16.vlgmr.msra.gmra.mxu1 %vm715_vm2, %v6037_v59  ;;  %4940 = vmatprep.mubr.msk.bf16.mxu0 %vm715_vm2, %v675_v25  ;;  %v292_v25 = vand.u32 15, %v260_v42  ;;  %v6105_v42 = vpack.c.bf16 %v5812_v43, %v5799_v18  ;;  %v6124_v44 = vsel %vm1576_vm0, %v1548_v57, %v1549_v5 }
  0x48   : > { %4968 = vmatprep.mubr.msk.bf16.mxu1 %vm715_vm2, %v6042_v55  ;;  %5037 = vmatpush3.bf16.msra.mxu1 %v5947_v23  ;;  %v8009_v23 = vrot.slane %v5703_v62, 1  ;;  %v6099_v8 = vsel %vm1576_vm0, %v1547_v51, %v1548_v57 }
  0x49   : > { %5038 = vmatprep.subr.bf16.mxu1 %v5376_v35  ;;  %vm420_vm3 = vcmp.le.s32.totalorder %v292_v25, 14  ;;  %8011 = vst [vmem:[#allocation54_spill] sm:$0xff] %v6105_v42  ;;  %v296_v25 = vand.u32 15, %v264_v31  ;;  %v1552_v31 = vrot.slane %v5849_v33, 1 }
  0x4a   : > { %v6095_v10 = vsel %vm1576_vm0, %v8009_v23, %v1547_v51  ;;  %v6110_v23 = vpack.c.bf16 %v5861_v61, %v5849_v33  ;;  %v5380_v51 = vld [vmem:[%s7793_s1 + $0x40] sm:$0xff]   ;;  %v6116_v54 = vsel %vm420_vm3, 1.0, %v7989_v24  ;;  %v6165_v33 = vpack.c.bf16 %v5917_v52, %v5898_v4 }
  0x4b   : > { %8010 = vst [vmem:[#allocation53_spill] sm:$0xff] %v6095_v10  ;;  %v6120_v10 = vsel %vm1576_vm0, %v1549_v5, %v1550_v9  ;;  %vm424_vm4 = vcmp.le.s32.totalorder %v296_v25, 14  ;;  %v1556_v5 = vrot.slane %v5923_v16, 1 }
  0x4c   : > { %8012 = vst [vmem:[#allocation55_spill] sm:$0xff] %v6110_v23  ;;  %5039 = vmatpush3.bf16.msra.mxu1 %v5376_v35  ;;  %v6129_v47 = vmul.f32 %v6116_v54, %v6120_v10  ;;  %v6135_v18 = vsel %vm424_vm4, 1.0, %v7989_v24  ;;  %v1551_v35 = vrot.slane %v5812_v43, 1  ;;  %8015 = vst [vmem:[#allocation58_spill] sm:$0xff] %v6165_v33 }
  0x4d   : > { %5040 = vmatprep.subr.bf16.mxu1 %v5378_v1  ;;  %8014 = vst [vmem:[#allocation57_spill] sm:$0xff] %v6135_v18  ;;  %v6142_v57 = vmul.f32 %v6135_v18, %v6120_v10 }
  0x4e   : > { %4941 = vmatmul.mubr.msk.bf16.gmra.mxu0 %vm715_vm2, %v676_v37  ;;  %8013 = vst [vmem:[#allocation56_spill] sm:$0xff] %v6129_v47  ;;  %v6154_v43 = vsel %vm1576_vm0, %v1550_v9, %v1551_v35  ;;  %v6161_v25 = vsel %vm1576_vm0, %v1551_v35, %v1552_v31  ;;  %v1554_v37 = vrot.slane %v5898_v4, 1  ;;  %v6170_v47 = vpack.c.bf16 %v5926_v50, %v5923_v16  ;;  %v5377_v35 = vld [vmem:[%s7793_s1 + $0x70] sm:$0xff]   ;;  %v5379_v16 = vld [vmem:[%s7793_s1 + $0x68] sm:$0xff]  }
  0x4f   : > { %4969 = vmatmul.mubr.msk.bf16.gmra.mxu1 %vm715_vm2, %v6105_v42  ;;  %5004 = vmatprep.mubr.msk.bf16.mxu0 %vm715_vm2, %v1254_v29  ;;  %v6150_v29 = vld [vmem:[%s7793_s1 + $0xb8] sm:$0xff]  }
  0x50   : > { %4972 = vmatprep.mubr.msk.bf16.mxu1 %vm715_vm2, %v6110_v23  ;;  %5041 = vmatpush3.bf16.msra.mxu1 %v5378_v1  ;;  %v1553_v1 = vrot.slane %v5861_v61, 1  ;;  %8016 = vst [vmem:[#allocation59_spill] sm:$0xff] %v6170_v47  ;;  %v1555_v61 = vrot.slane %v5917_v52, 1 }
  0x51   : > { %5042 = vmatprep.subr.bf16.mxu1 %v5380_v51 }
  0x52   : > { %v6174_v9 = vsel %vm1576_vm0, %v1552_v31, %v1553_v1  ;;  %v6183_v4 = vsel %vm1576_vm0, %v1553_v1, %v1554_v37  ;;  %v6197_v52 = vsel %vm1576_vm0, %v1555_v61, %v1556_v5  ;;  %v6201_v31 = vmul.f32 %v5778_v58, %v5809_v11 }
  0x53   : > { %v6234_v58 = vmul.f32 %v5912_v36, %v5931_v46 }
  0x54   : > { %5043 = vmatpush3.bf16.msra.mxu1 %v5380_v51  ;;  %v6190_v51 = vsel %vm1576_vm0, %v1554_v37, %v1555_v61  ;;  %v6224_v61 = vpack.c.bf16 %v5979_v26, %v5964_v14  ;;  %v6230_v37 = vpack.c.bf16 %v5602_v21, %v5985_v15 }
  0x55   : > { %5116 = vmatprep.subr.bf16.mxu1 %v6150_v29 }
  0x56   : > { %5005 = vmatmul.mubr.msk.bf16.vlgmr.msra.gmra.mxu0 %vm715_vm2, %v5975_v60  ;;  %v1558_v60 = vrot.slane %v5964_v14, 1  ;;  %8017 = vst [vmem:[#allocation60_spill] sm:$0xff] %v6224_v61  ;;  %8018 = vst [vmem:[#allocation61_spill] sm:$0xff] %v6230_v37 }
  0x57   : > { %4973 = vmatmul.mubr.msk.bf16.gmra.mxu1 %vm715_vm2, %v6165_v33  ;;  %5077 = vmatpush3.bf16.msra.mxu0 %v5908_v12  ;;  %v1557_v12 = vrot.slane %v5926_v50, 1  ;;  %v1559_v50 = vrot.slane %v5979_v26, 1 }
  0x58   : > { %4976 = vmatprep.mubr.msk.bf16.mxu1 %vm715_vm2, %v6170_v47  ;;  %5008 = vmatprep.mubr.msk.bf16.mxu0 %vm715_vm2, %v6037_v59  ;;  %v7875_v59 = vrot.slane %v5985_v15, 1 }
  0x59   : > { %5078 = vmatprep.subr.bf16.mxu0 %v5377_v35  ;;  %v6216_v11 = vsel %vm1576_vm0, %v1557_v12, %v1558_v60  ;;  %v6220_v1 = vsel %vm1576_vm0, %v1556_v5, %v1557_v12  ;;  %v5381_v5 = vld [vmem:[%s7793_s1 + $0x60] sm:$0xff]   ;;  %v6247_v14 = vsel %vm1576_vm0, %v1558_v60, %v1559_v50  ;;  %v7879_v12 = vrot.slane %v5605_v22, 1 }
  0x5a   : > { %v6243_v26 = vsel %vm1576_vm0, %v1559_v50, %v7875_v59  ;;  %v7878_v60 = vrot.slane %v5618_v30, 1  ;;  %v6268_v50 = vld [vmem:[%s7793_s1 + $0xd8] sm:$0xff]  }
  0x5b   : > { %5079 = vmatpush3.bf16.msra.mxu0 %v5377_v35  ;;  %v6255_v35 = vmul.f32 %v5960_v41, %v5971_v48 }
  0x5c   : > { %5080 = vmatprep.subr.bf16.mxu0 %v5379_v16  ;;  %v6278_v21 = vsel %vm1576_vm0, %v7879_v12, %v7878_v60  ;;  %v7887_v60 = vrot.slane %v5712_v2, 1  ;;  %v1568_v12 = vrot.slane %v5774_v56, 1 }
  0x5d   : > { %8019 = vst [vmem:[#allocation62_spill] sm:$0xff] %v6255_v35  ;;  %8020 = vst [vmem:[#allocation63_spill] sm:$0xff] %v6278_v21 }
  0x5e   : > { %5009 = vmatmul.mubr.msk.bf16.gmra.mxu0 %vm715_vm2, %v6042_v55  ;;  %v6293_v55 = vmul.f32 %v6013_v38, %v6017_v19  ;;  %v6316_v59 = vsel %vm1576_vm0, %v7887_v60, %v1568_v12  ;;  %v6333_v60 = vpack.c.bf16 %v5783_v0, %v5774_v56  ;;  %v8034_v56 = vld [vmem:[#allocation6_spill] sm:$0xff] }
  0x5f   : > { %4977 = vmatmul.mubr.msk.bf16.gmra.mxu1 %vm715_vm2, %v6224_v61  ;;  %5012 = vmatprep.mubr.msk.bf16.mxu0 %vm715_vm2, %v6105_v42  ;;  %v6286_v42 = vpack.c.bf16 %v5687_v53, %v5646_v40  ;;  %v6307_v53 = vmul.f32 %v5676_v49, %v6033_v34  ;;  %8025 = vst [vmem:[#allocation68_spill] sm:$0xff] %v6316_v59  ;;  %v1569_v40 = vrot.slane %v5783_v0, 1  ;;  %v8026_v49 = vld [vmem:[#allocation35_spill] sm:$0xff]  ;;  %v7893_v0 = vrot.slane %v8034_v56, 1 }
  0x60   : > { %4980 = vmatprep.mubr.msk.bf16.mxu1 %vm715_vm2, %v6230_v37  ;;  %5081 = vmatpush3.bf16.msra.mxu0 %v5379_v16  ;;  %v6282_v16 = vmul.f32 %v5994_v39, %v6000_v32  ;;  %8023 = vst [vmem:[#allocation66_spill] sm:$0xff] %v6293_v55  ;;  %v1571_v18 = vrot.slane %v8026_v49, 1  ;;  %v8027_v55 = vld [vmem:[#allocation21_spill] sm:$0xff]  ;;  %8030 = vst [vmem:[#allocation69_spill] sm:$0xff] %v6333_v60 }
  0x61   : > { %5082 = vmatprep.subr.bf16.mxu0 %v5381_v5  ;;  %8022 = vst [vmem:[#allocation65_spill] sm:$0xff] %v6286_v42  ;;  %8024 = vst [vmem:[#allocation67_spill] sm:$0xff] %v6307_v53  ;;  %v6329_v35 = vsel %vm1576_vm0, %v1568_v12, %v1569_v40 }
  0x62   : > { %8021 = vst [vmem:[#allocation64_spill] sm:$0xff] %v6282_v16  ;;  %v6325_v16 = vpack.c.bf16 %v5712_v2, %v8027_v55  ;;  %8029 = vst [vmem:[#allocation21_spill] sm:$0xff] %v6329_v35 }
  0x64   : > { %5083 = vmatpush3.bf16.msra.mxu0 %v5381_v5  ;;  %v262_v5 = vadd.s32 40, %v5560_v3  ;;  %8028 = vst [vmem:[#allocation35_spill] sm:$0xff] %v6325_v16 }
  0x65   : > { %5156 = vmatprep.subr.bf16.mxu0 %v6268_v50 }
  0x66   : > { %5013 = vmatmul.mubr.msk.bf16.gmra.mxu0 %vm715_vm2, %v6110_v23  ;;  %v1570_v23 = vrot.slane %v5815_v63, 1  ;;  %v294_v59 = vand.u32 15, %v262_v5  ;;  %v8031_v63 = vld [vmem:[#allocation39_spill] sm:$0xff] }
  0x67   : > { %4981 = vmatmul.mubr.msk.bf16.gmra.mxu1 %vm715_vm2, %v6046_v45  ;;  %5016 = vmatprep.mubr.msk.bf16.mxu0 %vm715_vm2, %v6165_v33  ;;  %v1572_v53 = vrot.slane %v8031_v63, 1 }
  0x68   : > { %4984 = vmatprep.mubr.msk.bf16.mxu1 %vm715_vm2, %v6286_v42  ;;  %v6337_v33 = vsel %vm1576_vm0, %v1569_v40, %v1570_v23  ;;  %v6342_v49 = vsel %vm1576_vm0, %v1570_v23, %v1571_v18  ;;  %vm422_vm5 = vcmp.le.s32.totalorder %v294_v59, 14  ;;  %v8035_v23 = vld [vmem:[#allocation13_spill] sm:$0xff]  ;;  %v8040_v59 = vld [vmem:[#allocation8_spill] sm:$0xff] }
  0x69   : > { %8032 = vst [vmem:[#allocation39_spill] sm:$0xff] %v6342_v49  ;;  %v6348_v12 = vsel %vm1576_vm0, %v1571_v18, %v1572_v53  ;;  %v1544_v40 = vrot.slane %v8035_v23, 1  ;;  %v6362_v18 = vsel %vm1576_vm0, %v1572_v53, %v7893_v0  ;;  %v6365_v5 = vsel %vm422_vm5, 1.0, %v7989_v24  ;;  %v8043_v0 = vld [vmem:[#allocation51_spill] sm:$0xff] }
  0x6a   : > { %8033 = vst [vmem:[#allocation70_spill] sm:$0xff] %v6348_v12  ;;  %8036 = vst [vmem:[#allocation13_spill] sm:$0xff] %v6362_v18  ;;  %v8041_v49 = vrot.slane %v8040_v59, 1  ;;  %v266_v53 = vadd.s32 72, %v5560_v3 }
  0x6b   : > { %8037 = vst [vmem:[#allocation71_spill] sm:$0xff] %v6365_v5 }
  0x6c   : > { %v6379_v23 = vsel %vm1576_vm0, %v8041_v49, %v1544_v40  ;;  %v1705_v49 = vmul.f32 0.0, %v6084_v17 }
  0x6d   : > { %8042 = vst [vmem:[#allocation8_spill] sm:$0xff] %v6379_v23  ;;  %v1706_v59 = vmul.f32 0.0, %v6379_v23  ;;  %v8047_v23 = vrot.slane %v5703_v62, 1 }
  0x6e   : > { %5017 = vmatmul.mubr.msk.bf16.gmra.mxu0 %vm715_vm2, %v6170_v47  ;;  %v6373_v47 = vmul.f32 %v6365_v5, %v6120_v10  ;;  %v8044_v10 = vld [vmem:[#allocation14_spill] sm:$0xff] }
  0x6f   : > { %4985 = vmatmul.mubr.msk.bf16.gmra.mxu1 %vm715_vm2, %v6325_v16  ;;  %5020 = vmatprep.mubr.msk.bf16.mxu0 %vm715_vm2, %v6224_v61  ;;  %v6369_v61 = vpack.c.bf16 %v8034_v56, %v8031_v63  ;;  %v1545_v63 = vrot.slane %v8044_v10, 1  ;;  %v6407_v10 = vmul.f32 %v5960_v41, %v6000_v32  ;;  %v1737_v17 = vpack.c.bf16 %v1706_v59, %v1705_v49  ;;  %v8051_v32 = vld [vmem:[#allocation9_spill] sm:$0xff]  ;;  %v8055_v41 = vld [vmem:[#allocation22_spill] sm:$0xff] }
  0x70   : > { %4988 = vmatprep.mubr.msk.bf16.mxu1 %vm715_vm2, %v6333_v60  ;;  %8039 = vst [vmem:[#allocation73_spill] sm:$0xff] %v6373_v47  ;;  %v6417_v56 = vmul.f32 %v5994_v39, %v6017_v19  ;;  %v6421_v47 = vmul.f32 %v6013_v38, %v6033_v34  ;;  %v270_v49 = vadd.s32 104, %v5560_v3  ;;  %v8053_v39 = vld [vmem:[#allocation53_spill] sm:$0xff] }
  0x71   : > { %8038 = vst [vmem:[#allocation72_spill] sm:$0xff] %v6369_v61  ;;  %8046 = vst [vmem:[#allocation14_spill] sm:$0xff] %v6407_v10  ;;  %v6443_v34 = vsel %vm1576_vm0, %v1544_v40, %v1545_v63 }
  0x72   : > { %8049 = vst [vmem:[#allocation74_spill] sm:$0xff] %v6417_v56  ;;  %8050 = vst [vmem:[#allocation75_spill] sm:$0xff] %v6421_v47  ;;  %v8063_v56 = vrot.slane %v5605_v22, 1  ;;  %v5389_v22 = vld [vmem:[%s7793_s1 + $0xc0] sm:$0xff]  }
  0x73   : > { %8052 = vst [vmem:[#allocation76_spill] sm:$0xff] %v6443_v34 }
  0x76   : > { %5021 = vmatmul.mubr.msk.bf16.gmra.mxu0 %vm715_vm2, %v6230_v37  ;;  %v8045_v37 = vld [vmem:[#allocation36_spill] sm:$0xff] }
  0x77   : > { %4989 = vmatmul.mubr.msk.bf16.gmra.mxu1 %vm715_vm2, %v8043_v0  ;;  %5024 = vmatprep.mubr.msk.bf16.mxu0 %vm715_vm2, %v6046_v45  ;;  %v6396_v18 = vmul.f32 %v8045_v37, %v5931_v46  ;;  %v6403_v45 = vmul.f32 %v5912_v36, %v5971_v48  ;;  %v6413_v46 = vsel %vm1576_vm0, %v1545_v63, %v8047_v23  ;;  %v289_v36 = vand.u32 15, %v5560_v3  ;;  %v5384_v63 = vld [vmem:[%s7793_s1 + $0xb0] sm:$0xff]  }
  0x78   : > { %4992 = vmatprep.mubr.msk.bf16.mxu1 %vm715_vm2, %v6369_v61  ;;  %8048 = vst [vmem:[#allocation36_spill] sm:$0xff] %v6413_v46  ;;  %v298_v48 = vand.u32 15, %v266_v53  ;;  %v1708_v38 = vmul.f32 %v6116_v54, %v6413_v46  ;;  %v1710_v23 = vmul.f32 %v6365_v5, %v6099_v8  ;;  %v268_v53 = vadd.s32 88, %v5560_v3 }
  0x79   : > { %vm385_vm6 = vcmp.ge.s32.totalorder %v289_v36, 1  ;;  %v302_v36 = vand.u32 15, %v270_v49  ;;  %v5386_v49 = vld [vmem:[%s7793_s1 + $0xa8] sm:$0xff]  }
  0x7a   : > { %vm426_vm7 = vcmp.le.s32.totalorder %v298_v48, 14  ;;  %v1738_v59 = vpack.c.bf16 %v1708_v38, %v6443_v34  ;;  %v1739_v19 = vpack.c.bf16 %v1710_v23, %v8053_v39  ;;  %v6452_v62 = vsel %vm385_vm6, 1.0, %v7989_v24  ;;  %v8054_v48 = vld [vmem:[#allocation23_spill] sm:$0xff] }
  0x7b   : > { %v300_v40 = vand.u32 15, %v268_v53  ;;  %v2091_v38 = vmul.f32 %v6452_v62, %v8054_v48  ;;  %v272_v53 = vadd.s32 120, %v5560_v3  ;;  %vm430_vm9 = vcmp.le.s32.totalorder %v302_v36, 14  ;;  %v8056_v36 = vld [vmem:[#allocation28_spill] sm:$0xff]  ;;  %v5402_v48 = vld [vmem:[%s5568_s15 + $0x88] sm:$0xff] }
  0x7d   : > { %vm428_vm8 = vcmp.le.s32.totalorder %v300_v40, 14  ;;  %v304_v40 = vand.u32 15, %v272_v53 }
  0x7e   : > { %5025 = vmatmul.mubr.msk.bf16.gmra.mxu0 %vm715_vm2, %v6286_v42 }
  0x7f   : > { %4993 = vmatmul.mubr.msk.bf16.gmra.mxu1 %vm715_vm2, %v8051_v32  ;;  %5028 = vmatprep.mubr.msk.bf16.mxu0 %vm715_vm2, %v6325_v16  ;;  %v2123_v32 = vpack.c.bf16 %v8055_v41, %v2091_v38  ;;  %v8057_v16 = vld [vmem:[#allocation24_spill] sm:$0xff]  ;;  %vm432_vm10 = vcmp.le.s32.totalorder %v304_v40, 14  ;;  %v8062_v41 = vld [vmem:[#allocation42_spill] sm:$0xff] }
  0x80   : > { %5044 = vmatprep.mubr.msk.bf16.mxu1 %vm715_vm2, %v1737_v17  ;;  %v6455_v17 = vsel %vm426_vm7, 1.0, %v7989_v24  ;;  %v2093_v42 = vmul.f32 %v8057_v16, %v8056_v36  ;;  %v276_v16 = vadd.s32 152, %v5560_v3 }
  0x81   : > { %v1714_v23 = vmul.f32 %v6455_v17, %v6161_v25 }
  0x82   : > { %v308_v5 = vand.u32 15, %v276_v16  ;;  %v8061_v16 = vpack.c.bf16 %v5828_v27, %v6201_v31  ;;  %v282_v31 = vadd.s32 200, %v5560_v3 }
  0x84   : > { %vm436_vm12 = vcmp.le.s32.totalorder %v308_v5, 14 }
  0x86   : > { %5029 = vmatmul.mubr.msk.bf16.gmra.mxu0 %vm715_vm2, %v6333_v60  ;;  %v5388_v60 = vld [vmem:[%s7793_s1 + $0xa0] sm:$0xff]  }
  0x87   : > { %5045 = vmatmul.mubr.msk.bf16.vlgmr.msra.gmra.mxu1 %vm715_vm2, %v1738_v59  ;;  %5032 = vmatprep.mubr.msk.bf16.mxu0 %vm715_vm2, %v8043_v0  ;;  %v274_v59 = vadd.s32 136, %v5560_v3  ;;  %v6479_v0 = vsel %vm428_vm8, 1.0, %v7989_v24 }
  0x88   : > { %5048 = vmatprep.mubr.msk.bf16.mxu1 %vm715_vm2, %v1739_v19  ;;  %5117 = vmatpush3.bf16.msra.mxu1 %v6150_v29  ;;  %v1741_v19 = vpack.c.bf16 %v1714_v23, %v6154_v43  ;;  %v6482_v29 = vsel %vm430_vm9, 1.0, %v7989_v24  ;;  %v8058_v23 = vpack.c.bf16 %v6142_v57, %v6124_v44  ;;  %v6505_v57 = vld [vmem:[%s7793_s1 + $0xf8] sm:$0xff]  }
  0x89   : > { %5118 = vmatprep.subr.bf16.mxu1 %v5384_v63  ;;  %v306_v38 = vand.u32 15, %v274_v59  ;;  %v1718_v53 = vmul.f32 %v6482_v29, %v6197_v52  ;;  %v8059_v59 = vld [vmem:[#allocation30_spill] sm:$0xff] }
  0x8b   : > { %vm434_vm11 = vcmp.le.s32.totalorder %v306_v38, 14  ;;  %v8060_v38 = vld [vmem:[#allocation41_spill] sm:$0xff] }
  0x8c   : > { %5119 = vmatpush3.bf16.msra.mxu1 %v5384_v63  ;;  %v1716_v63 = vmul.f32 %v6479_v0, %v6183_v4  ;;  %v6515_v40 = vsel %vm434_vm11, 1.0, %v7989_v24 }
  0x8d   : > { %5120 = vmatprep.subr.bf16.mxu1 %v5386_v49 }
  0x8e   : > { %5033 = vmatmul.mubr.msk.bf16.gmra.mxu0 %vm715_vm2, %v6369_v61  ;;  %v1743_v61 = vpack.c.bf16 %v1718_v53, %v6190_v51 }
  0x8f   : > { %5049 = vmatmul.mubr.msk.bf16.gmra.mxu1 %vm715_vm2, %v8058_v23  ;;  %5084 = vmatprep.mubr.msk.bf16.mxu0 %vm715_vm2, %v2123_v32  ;;  %v2124_v32 = vpack.c.bf16 %v8059_v59, %v2093_v42  ;;  %v278_v23 = vadd.s32 168, %v5560_v3  ;;  %v5385_v42 = vld [vmem:[%s7793_s1 + $0xd0] sm:$0xff]  }
  0x90   : > { %5052 = vmatprep.mubr.msk.bf16.mxu1 %vm715_vm2, %v1741_v19  ;;  %5121 = vmatpush3.bf16.msra.mxu1 %v5386_v49  ;;  %v1742_v19 = vpack.c.bf16 %v1716_v63, %v6174_v9  ;;  %v6512_v49 = vsel %vm432_vm10, 1.0, %v7989_v24  ;;  %v2097_v63 = vmul.f32 %v8045_v37, %v8060_v38  ;;  %v1561_v37 = vrot.slane %v5402_v48, 1 }
  0x91   : > { %5122 = vmatprep.subr.bf16.mxu1 %v5388_v60  ;;  %v310_v53 = vand.u32 15, %v278_v23  ;;  %v5387_v23 = vld [vmem:[%s7793_s1 + $0xc8] sm:$0xff]  }
  0x92   : > { %v2126_v47 = vpack.c.bf16 %v8062_v41, %v2097_v63  ;;  %v6549_v5 = vsel %vm1576_vm0, %v1561_v37, %v8063_v56  ;;  %v8064_v63 = vrot.slane %v5618_v30, 1  ;;  %v314_v56 = vand.u32 15, %v282_v31  ;;  %v5404_v31 = vld [vmem:[%s5568_s15 + $0xa8] sm:$0xff] }
  0x93   : > { %vm438_vm13 = vcmp.le.s32.totalorder %v310_v53, 14  ;;  %v8065_v30 = vpack.c.bf16 %v5957_v13, %v6234_v58  ;;  %v1566_v58 = vrot.slane %v8027_v55, 1 }
  0x94   : > { %5123 = vmatpush3.bf16.msra.mxu1 %v5388_v60  ;;  %v1720_v60 = vmul.f32 %v6512_v49, %v6216_v11  ;;  %vm442_vm15 = vcmp.le.s32.totalorder %v314_v56, 14  ;;  %v8069_v56 = vld [vmem:[#allocation62_spill] sm:$0xff] }
  0x95   : > { %5196 = vmatprep.subr.bf16.mxu1 %v6505_v57  ;;  %v8070_v10 = vpack.c.bf16 %v5991_v7, %v8069_v56  ;;  %v8073_v56 = vld [vmem:[#allocation68_spill] sm:$0xff] }
  0x96   : > { %5085 = vmatmul.mubr.msk.bf16.vlgmr.msra.gmra.mxu0 %vm715_vm2, %v2124_v32  ;;  %v1722_v32 = vmul.f32 %v6515_v40, %v6243_v26 }
  0x97   : > { %5053 = vmatmul.mubr.msk.bf16.gmra.mxu1 %vm715_vm2, %v1742_v19  ;;  %5157 = vmatpush3.bf16.msra.mxu0 %v6268_v50  ;;  %v5403_v50 = vld [vmem:[%s5568_s15 + $0xa0] sm:$0xff] }
  0x98   : > { %5056 = vmatprep.mubr.msk.bf16.mxu1 %vm715_vm2, %v1743_v61  ;;  %5088 = vmatprep.mubr.msk.bf16.mxu0 %vm715_vm2, %v8061_v16  ;;  %v1564_v19 = vrot.slane %v5403_v50, 1  ;;  %v280_v61 = vadd.s32 184, %v5560_v3  ;;  %v1744_v16 = vpack.c.bf16 %v1720_v60, %v6220_v1  ;;  %v1745_v48 = vpack.c.bf16 %v1722_v32, %v6247_v14 }
  0x99   : > { %5158 = vmatprep.subr.bf16.mxu0 %v5385_v42  ;;  %v6552_v50 = vsel %vm436_vm12, 1.0, %v7989_v24 }
  0x9a   : > { %v6558_v53 = vsel %vm1576_vm0, %v8064_v63, %v1564_v19  ;;  %v312_v60 = vand.u32 15, %v280_v61  ;;  %v1724_v32 = vmul.f32 %v6552_v50, %v6549_v5  ;;  %v8066_v61 = vrot.slane %v5985_v15, 1  ;;  %v6589_v15 = vld [vmem:[%s7793_s1 + $0x118] sm:$0xff]  }
  0x9b   : > { %5159 = vmatpush3.bf16.msra.mxu0 %v5385_v42  ;;  %v6561_v42 = vsel %vm438_vm13, 1.0, %v7989_v24 }
  0x9c   : > { %5160 = vmatprep.subr.bf16.mxu0 %v5387_v23  ;;  %v6579_v63 = vsel %vm1576_vm0, %v8066_v61, %v1561_v37  ;;  %vm440_vm14 = vcmp.le.s32.totalorder %v312_v60, 14  ;;  %v286_v37 = vadd.s32 232, %v5560_v3  ;;  %v6602_v60 = vsel %vm442_vm15, 1.0, %v7989_v24 }
  0x9d   : > { %8068 = vst [vmem:[#allocation28_spill] sm:$0xff] %v6602_v60 }
  0x9e   : > { %5089 = vmatmul.mubr.msk.bf16.gmra.mxu0 %vm715_vm2, %v2126_v47  ;;  %v1726_v47 = vmul.f32 %v6561_v42, %v6558_v53 }
  0x9f   : > { %5057 = vmatmul.mubr.msk.bf16.gmra.mxu1 %vm715_vm2, %v1744_v16  ;;  %5092 = vmatprep.mubr.msk.bf16.mxu0 %vm715_vm2, %v8065_v30  ;;  %v1565_v16 = vrot.slane %v5404_v31, 1  ;;  %v284_v30 = vadd.s32 216, %v5560_v3 }
  0xa0   : > { %5060 = vmatprep.mubr.msk.bf16.mxu1 %vm715_vm2, %v1745_v48  ;;  %5161 = vmatpush3.bf16.msra.mxu0 %v5387_v23  ;;  %v1746_v48 = vpack.c.bf16 %v1724_v32, %v6579_v63  ;;  %v1747_v61 = vpack.c.bf16 %v1726_v47, %v6278_v21  ;;  %v6599_v23 = vsel %vm440_vm14, 1.0, %v7989_v24  ;;  %v318_v32 = vand.u32 15, %v286_v37  ;;  %v8071_v47 = vld [vmem:[#allocation64_spill] sm:$0xff] }
  0xa1   : > { %5162 = vmatprep.subr.bf16.mxu0 %v5389_v22  ;;  %v6596_v55 = vsel %vm1576_vm0, %v1565_v16, %v1566_v58  ;;  %8067 = vst [vmem:[#allocation53_spill] sm:$0xff] %v6599_v23  ;;  %v316_v31 = vand.u32 15, %v284_v30  ;;  %v8072_v21 = vpack.c.bf16 %v6010_v6, %v8071_v47  ;;  %v6619_v30 = vsel %vm1576_vm0, %v1564_v19, %v1565_v16 }
  0xa2   : > { %v8074_v37 = vrot.slane %v5712_v2, 1  ;;  %vm446_vm3 = vcmp.le.s32.totalorder %v318_v32, 14  ;;  %v258_v47 = vadd.s32 8, %v5560_v3  ;;  %v8080_v32 = vld [vmem:[#allocation25_spill] sm:$0xff] }
  0xa3   : > { %vm444_vm1 = vcmp.le.s32.totalorder %v316_v31, 14 }
  0xa4   : > { %5163 = vmatpush3.bf16.msra.mxu0 %v5389_v22  ;;  %v1728_v22 = vmul.f32 %v6599_v23, %v6596_v55  ;;  %v6634_v16 = vsel %vm444_vm1, 1.0, %v7989_v24  ;;  %v290_v31 = vand.u32 15, %v258_v47  ;;  %v8081_v23 = vld [vmem:[#allocation17_spill] sm:$0xff] }
  0xa5   : > { %5236 = vmatprep.subr.bf16.mxu0 %v6589_v15  ;;  %8076 = vst [vmem:[#allocation30_spill] sm:$0xff] %v6634_v16 }
  0xa6   : > { %5093 = vmatmul.mubr.msk.bf16.gmra.mxu0 %vm715_vm2, %v8070_v10  ;;  %v1730_v10 = vmul.f32 %v6602_v60, %v8073_v56  ;;  %v6637_v60 = vsel %vm446_vm3, 1.0, %v7989_v24  ;;  %v2111_v56 = vmul.f32 %v8081_v23, %v8080_v32  ;;  %vm418_vm5 = vcmp.le.s32.totalorder %v290_v31, 14  ;;  %v8086_v32 = vld [vmem:[#allocation7_spill] sm:$0xff] }
  0xa7   : > { %5061 = vmatmul.mubr.msk.bf16.gmra.mxu1 %vm715_vm2, %v1746_v48  ;;  %5096 = vmatprep.mubr.msk.bf16.mxu0 %vm715_vm2, %v8072_v21  ;;  %v6627_v48 = vsel %vm1576_vm0, %v1566_v58, %v8074_v37  ;;  %v288_v21 = vadd.s32 248, %v5560_v3  ;;  %8077 = vst [vmem:[#allocation41_spill] sm:$0xff] %v6637_v60  ;;  %v8078_v58 = vld [vmem:[#allocation66_spill] sm:$0xff]  ;;  %v8093_v31 = vld [vmem:[#allocation15_spill] sm:$0xff] }
  0xa8   : > { %5064 = vmatprep.mubr.msk.bf16.mxu1 %vm715_vm2, %v1747_v61  ;;  %8075 = vst [vmem:[#allocation24_spill] sm:$0xff] %v6627_v48  ;;  %v1748_v61 = vpack.c.bf16 %v1728_v22, %v6619_v30  ;;  %v1749_v19 = vpack.c.bf16 %v1730_v10, %v6627_v48  ;;  %v8079_v37 = vpack.c.bf16 %v6025_v20, %v8078_v58  ;;  %v8082_v22 = vld [vmem:[#allocation67_spill] sm:$0xff]  ;;  %v8084_v58 = vld [vmem:[#allocation26_spill] sm:$0xff] }
  0xa9   : > { %v320_v2 = vand.u32 15, %v288_v21  ;;  %v8083_v10 = vpack.c.bf16 %v6052_v28, %v8082_v22  ;;  %v1732_v48 = vmul.f32 %v6634_v16, %v6337_v33  ;;  %v1734_v21 = vmul.f32 %v6637_v60, %v6348_v12  ;;  %v8088_v28 = vld [vmem:[#allocation6_spill] sm:$0xff] }
  0xaa   : > { %v8087_v22 = vrot.slane %v8086_v32, 1 }
  0xab   : > { %vm448_vm4 = vcmp.le.s32.totalorder %v320_v2, 14  ;;  %v1750_v47 = vpack.c.bf16 %v1732_v48, %v6329_v35  ;;  %v6670_v2 = vsel %vm418_vm5, 1.0, %v7989_v24  ;;  %v8094_v48 = vld [vmem:[#allocation18_spill] sm:$0xff] }
  0xac   : > { %8092 = vst [vmem:[#allocation64_spill] sm:$0xff] %v6670_v2  ;;  %v8095_v60 = vpack.c.bf16 %v8093_v31, %v8094_v48  ;;  %v2478_v48 = vmul.f32 %v6670_v2, %v6413_v46  ;;  %v5392_v2 = vld [vmem:[%s7793_s1 + $0xf0] sm:$0xff]  }
  0xae   : > { %5097 = vmatmul.mubr.msk.bf16.gmra.mxu0 %vm715_vm2, %v8079_v37  ;;  %v2133_v37 = vpack.c.bf16 %v8084_v58, %v2111_v56  ;;  %v8096_v56 = vld [vmem:[#allocation29_spill] sm:$0xff] }
  0xaf   : > { %5065 = vmatmul.mubr.msk.bf16.gmra.mxu1 %vm715_vm2, %v1748_v61  ;;  %5100 = vmatprep.mubr.msk.bf16.mxu0 %vm715_vm2, %v8083_v10  ;;  %v8085_v61 = vld [vmem:[#allocation39_spill] sm:$0xff]  ;;  %v8089_v10 = vrot.slane %v8088_v28, 1  ;;  %v8101_v58 = vld [vmem:[#allocation13_spill] sm:$0xff] }
  0xb0   : > { %5068 = vmatprep.mubr.msk.bf16.mxu1 %vm715_vm2, %v1749_v19  ;;  %v1751_v23 = vpack.c.bf16 %v1734_v21, %v8085_v61  ;;  %v6667_v19 = vsel %vm448_vm4, 1.0, %v7989_v24  ;;  %v8097_v21 = vld [vmem:[#allocation27_spill] sm:$0xff]  ;;  %v8100_v61 = vld [vmem:[#allocation32_spill] sm:$0xff] }
  0xb1   : > { %v6664_v16 = vsel %vm1576_vm0, %v8089_v10, %v8087_v22  ;;  %8091 = vst [vmem:[#allocation62_spill] sm:$0xff] %v6667_v19  ;;  %v2113_v32 = vmul.f32 %v8097_v21, %v8096_v56  ;;  %v8098_v22 = vld [vmem:[#allocation37_spill] sm:$0xff]  ;;  %v8102_v21 = vld [vmem:[#allocation38_spill] sm:$0xff] }
  0xb2   : > { %8090 = vst [vmem:[#allocation42_spill] sm:$0xff] %v6664_v16  ;;  %v1736_v28 = vmul.f32 %v6667_v19, %v6664_v16  ;;  %v8099_v10 = vld [vmem:[#allocation33_spill] sm:$0xff]  ;;  %v8104_v19 = vld [vmem:[#allocation40_spill] sm:$0xff] }
  0xb3   : > { %v2115_v3 = vmul.f32 %v8099_v10, %v8098_v22  ;;  %v2480_v10 = vmul.f32 %v6116_v54, %v6099_v8  ;;  %v8109_v54 = vld [vmem:[#allocation57_spill] sm:$0xff] }
  0xb4   : > { %v1752_v12 = vpack.c.bf16 %v1736_v28, %v8101_v58 }
  0xb5   : > { %v2135_v31 = vpack.c.bf16 %v8102_v21, %v2115_v3  ;;  %v8107_v3 = vld [vmem:[#allocation43_spill] sm:$0xff] }
  0xb6   : > { %5101 = vmatmul.mubr.msk.bf16.gmra.mxu0 %vm715_vm2, %v8095_v60  ;;  %v2134_v60 = vpack.c.bf16 %v8100_v61, %v2113_v32  ;;  %v8106_v32 = vld [vmem:[#allocation19_spill] sm:$0xff] }
  0xb7   : > { %5069 = vmatmul.mubr.msk.bf16.gmra.mxu1 %vm715_vm2, %v1750_v47  ;;  %5104 = vmatprep.mubr.msk.bf16.mxu0 %vm715_vm2, %v2133_v37  ;;  %v2509_v47 = vpack.c.bf16 %v2478_v48, %v6443_v34  ;;  %v8103_v37 = vld [vmem:[#allocation44_spill] sm:$0xff]  ;;  %v2510_v48 = vpack.c.bf16 %v2480_v10, %v8053_v39 }
  0xb8   : > { %5072 = vmatprep.mubr.msk.bf16.mxu1 %vm715_vm2, %v1751_v23  ;;  %v2117_v16 = vmul.f32 %v8104_v19, %v8103_v37  ;;  %v8105_v23 = vld [vmem:[#allocation46_spill] sm:$0xff] }
  0xb9   : > { %v2119_v46 = vmul.f32 %v8106_v32, %v8105_v23 }
  0xba   : > { %v2136_v28 = vpack.c.bf16 %v8107_v3, %v2117_v16  ;;  %v2895_v16 = vmul.f32 %v6452_v62, %v8056_v36 }
  0xbc   : > { %v2927_v36 = vpack.c.bf16 %v8059_v59, %v2895_v16  ;;  %v2490_v59 = vmul.f32 %v6482_v29, %v6216_v11 }
  0xbe   : > { %5105 = vmatmul.mubr.msk.bf16.gmra.mxu0 %vm715_vm2, %v2134_v60  ;;  %v8108_v60 = vld [vmem:[#allocation45_spill] sm:$0xff] }
  0xbf   : > { %5073 = vmatmul.mubr.msk.bf16.gmra.mxu1 %vm715_vm2, %v1752_v12  ;;  %5108 = vmatprep.mubr.msk.bf16.mxu0 %vm715_vm2, %v2135_v31  ;;  %v2137_v34 = vpack.c.bf16 %v8108_v60, %v2119_v46  ;;  %v2484_v12 = vmul.f32 %v8109_v54, %v6161_v25  ;;  %v8110_v31 = vld [vmem:[#allocation73_spill] sm:$0xff]  ;;  %v2486_v46 = vmul.f32 %v6455_v17, %v6183_v4 }
  0xc0   : > { %5124 = vmatprep.mubr.msk.bf16.mxu1 %vm715_vm2, %v2509_v47  ;;  %v8111_v10 = vpack.c.bf16 %v8110_v31, %v6124_v44  ;;  %v8112_v47 = vld [vmem:[#allocation12_spill] sm:$0xff] }
  0xc1   : > { %v2512_v62 = vpack.c.bf16 %v2484_v12, %v6154_v43  ;;  %v2513_v31 = vpack.c.bf16 %v2486_v46, %v6174_v9  ;;  %v2515_v46 = vpack.c.bf16 %v2490_v59, %v6220_v1  ;;  %v2496_v59 = vmul.f32 %v6552_v50, %v6558_v53 }
  0xc6   : > { %5109 = vmatmul.mubr.msk.bf16.gmra.mxu0 %vm715_vm2, %v2136_v28  ;;  %v8113_v28 = vld [vmem:[#allocation11_spill] sm:$0xff] }
  0xc7   : > { %5125 = vmatmul.mubr.msk.bf16.vlgmr.msra.gmra.mxu1 %vm715_vm2, %v2510_v48  ;;  %5112 = vmatprep.mubr.msk.bf16.mxu0 %vm715_vm2, %v2137_v34  ;;  %v5394_v34 = vld [vmem:[%s7793_s1 + $0xe8] sm:$0xff]   ;;  %v2138_v48 = vpack.c.bf16 %v8113_v28, %v8112_v47 }
  0xc8   : > { %5128 = vmatprep.mubr.msk.bf16.mxu1 %vm715_vm2, %v8111_v10  ;;  %5197 = vmatpush3.bf16.msra.mxu1 %v6505_v57  ;;  %v5396_v57 = vld [vmem:[%s7793_s1 + $0xe0] sm:$0xff]   ;;  %v2488_v10 = vmul.f32 %v6479_v0, %v6197_v52 }
  0xc9   : > { %5198 = vmatprep.subr.bf16.mxu1 %v5392_v2 }
  0xca   : > { %v2514_v16 = vpack.c.bf16 %v2488_v10, %v6190_v51  ;;  %v8118_v10 = vpack.c.bf16 %v5991_v7, %v6403_v45  ;;  %v8122_v7 = vld [vmem:[#allocation74_spill] sm:$0xff] }
  0xcc   : > { %5199 = vmatpush3.bf16.msra.mxu1 %v5392_v2  ;;  %v8114_v2 = vld [vmem:[#allocation31_spill] sm:$0xff] }
  0xcd   : > { %5200 = vmatprep.subr.bf16.mxu1 %v5394_v34  ;;  %v2899_v12 = vmul.f32 %v8114_v2, %v8060_v38  ;;  %v2492_v38 = vmul.f32 %v6512_v49, %v6243_v26  ;;  %v2498_v2 = vmul.f32 %v6561_v42, %v6596_v55 }
  0xce   : > { %5113 = vmatmul.mubr.msk.bf16.gmra.mxu0 %vm715_vm2, %v2138_v48  ;;  %v5393_v48 = vld [vmem:[%s7793_s1 + $0x110] sm:$0xff]  }
  0xcf   : > { %5129 = vmatmul.mubr.msk.bf16.gmra.mxu1 %vm715_vm2, %v2512_v62  ;;  %5164 = vmatprep.mubr.msk.bf16.mxu0 %vm715_vm2, %v2927_v36  ;;  %v2929_v47 = vpack.c.bf16 %v8062_v41, %v2899_v12  ;;  %v8115_v62 = vld [vmem:[#allocation34_spill] sm:$0xff]  ;;  %v2494_v41 = vmul.f32 %v6515_v40, %v6549_v5  ;;  %v2519_v12 = vpack.c.bf16 %v2498_v2, %v6619_v30  ;;  %v8132_v2 = vld [vmem:[#allocation25_spill] sm:$0xff] }
  0xd0   : > { %5132 = vmatprep.mubr.msk.bf16.mxu1 %vm715_vm2, %v2513_v31  ;;  %5201 = vmatpush3.bf16.msra.mxu1 %v5394_v34  ;;  %v8116_v36 = vpack.c.bf16 %v5828_v27, %v8115_v62  ;;  %v5395_v27 = vld [vmem:[%s7793_s1 + $0x108] sm:$0xff]   ;;  %v2516_v34 = vpack.c.bf16 %v2492_v38, %v6247_v14  ;;  %v5397_v31 = vld [vmem:[%s7793_s1 + $0x100] sm:$0xff]  }
  0xd1   : > { %5202 = vmatprep.subr.bf16.mxu1 %v5396_v57 }
  0xd4   : > { %5203 = vmatpush3.bf16.msra.mxu1 %v5396_v57  ;;  %v8117_v57 = vpack.c.bf16 %v5957_v13, %v6396_v18  ;;  %v8119_v13 = vld [vmem:[#allocation63_spill] sm:$0xff] }
  0xd5   : > { %5276 = vmatprep.subr.mxu1 %v7989_v24  ;;  %v2518_v18 = vpack.c.bf16 %v2496_v59, %v8119_v13  ;;  %v8139_v24 = vld [vmem:[#allocation70_spill] sm:$0xff] }
  0xd6   : > { %5165 = vmatmul.mubr.msk.bf16.vlgmr.msra.gmra.mxu0 %vm715_vm2, %v8116_v36  ;;  %v8126_v36 = vld [vmem:[#allocation28_spill] sm:$0xff] }
  0xd7   : > { %5133 = vmatmul.mubr.msk.bf16.gmra.mxu1 %vm715_vm2, %v2514_v16  ;;  %5237 = vmatpush3.bf16.msra.mxu0 %v6589_v15  ;;  %v2517_v15 = vpack.c.bf16 %v2494_v41, %v6579_v63  ;;  %v8120_v16 = vld [vmem:[#allocation14_spill] sm:$0xff]  ;;  %v2502_v38 = vmul.f32 %v8126_v36, %v6337_v33 }
  0xd8   : > { %5136 = vmatprep.mubr.msk.bf16.mxu1 %vm715_vm2, %v2515_v46  ;;  %5168 = vmatprep.mubr.msk.bf16.mxu0 %vm715_vm2, %v2929_v47  ;;  %v8121_v45 = vpack.c.bf16 %v6010_v6, %v8120_v16  ;;  %v8123_v46 = vpack.c.bf16 %v6025_v20, %v8122_v7  ;;  %v8124_v47 = vld [vmem:[#allocation68_spill] sm:$0xff]  ;;  %v8134_v16 = vld [vmem:[#allocation17_spill] sm:$0xff] }
  0xd9   : > { %5238 = vmatprep.subr.bf16.mxu0 %v5393_v48  ;;  %v8127_v6 = vld [vmem:[#allocation24_spill] sm:$0xff] }
  0xdb   : > { %5239 = vmatpush3.bf16.msra.mxu0 %v5393_v48  ;;  %v8125_v48 = vld [vmem:[#allocation53_spill] sm:$0xff] }
  0xdc   : > { %5240 = vmatprep.subr.bf16.mxu0 %v5395_v27  ;;  %v2500_v62 = vmul.f32 %v8125_v48, %v8124_v47 }
  0xde   : > { %5169 = vmatmul.mubr.msk.bf16.gmra.mxu0 %vm715_vm2, %v8117_v57  ;;  %v8129_v57 = vld [vmem:[#allocation50_spill] sm:$0xff] }
  0xdf   : > { %5137 = vmatmul.mubr.msk.bf16.gmra.mxu1 %vm715_vm2, %v2516_v34  ;;  %5172 = vmatprep.mubr.msk.bf16.mxu0 %vm715_vm2, %v8118_v10  ;;  %v8130_v10 = vld [vmem:[#allocation75_spill] sm:$0xff] }
  0xe0   : > { %5140 = vmatprep.mubr.msk.bf16.mxu1 %vm715_vm2, %v2517_v15  ;;  %5241 = vmatpush3.bf16.msra.mxu0 %v5395_v27  ;;  %v2520_v27 = vpack.c.bf16 %v2500_v62, %v8127_v6  ;;  %v2521_v15 = vpack.c.bf16 %v2502_v38, %v6329_v35  ;;  %v8131_v59 = vpack.c.bf16 %v8129_v57, %v8130_v10  ;;  %v8137_v62 = vld [vmem:[#allocation20_spill] sm:$0xff]  ;;  %v8145_v35 = vld [vmem:[#allocation39_spill] sm:$0xff] }
  0xe1   : > { %5242 = vmatprep.subr.bf16.mxu0 %v5397_v31 }
  0xe4   : > { %5243 = vmatpush3.bf16.msra.mxu0 %v5397_v31 }
  0xe6   : > { %5173 = vmatmul.mubr.msk.bf16.gmra.mxu0 %vm715_vm2, %v8121_v45  ;;  %v2915_v45 = vmul.f32 %v8134_v16, %v8096_v56 }
  0xe7   : > { %5141 = vmatmul.mubr.msk.bf16.gmra.mxu1 %vm715_vm2, %v2518_v18  ;;  %5176 = vmatprep.mubr.msk.bf16.mxu0 %vm715_vm2, %v8123_v46  ;;  %v8133_v18 = vld [vmem:[#allocation16_spill] sm:$0xff]  ;;  %v8136_v46 = vld [vmem:[#allocation15_spill] sm:$0xff] }
  0xe8   : > { %5144 = vmatprep.mubr.msk.bf16.mxu1 %vm715_vm2, %v2519_v12  ;;  %v2913_v12 = vmul.f32 %v8133_v18, %v8132_v2  ;;  %v8138_v38 = vpack.c.bf16 %v8136_v46, %v8137_v62  ;;  %v8142_v2 = vld [vmem:[#allocation41_spill] sm:$0xff]  ;;  %v2937_v62 = vpack.c.bf16 %v8100_v61, %v2915_v45 }
  0xe9   : > { %v8149_v61 = vld [vmem:[#allocation33_spill] sm:$0xff] }
  0xea   : > { %v6799_v41 = vpop.f32.mrf.mxu0  ;;  %v2919_v45 = vmul.f32 %v8149_v61, %v8103_v37  ;;  %v2921_v37 = vmul.f32 %v8104_v19, %v8105_v23 }
  0xec   : > { %v6802_v34 = vpop.f32.mrf.mxu0  ;;  %v6805_v31 = vpop.f32.mrf.mxu1 }
  0xed   : > { %8128 = vst [vmem:[#allocation66_spill] sm:$0xff] %v6805_v31  ;;  %v8140_v31 = vld [vmem:[#allocation30_spill] sm:$0xff] }
  0xee   : > { %v6807_v20 = vpop.f32.mrf.mxu0  ;;  %5177 = vmatmul.mubr.msk.bf16.gmra.mxu0 %vm715_vm2, %v8131_v59  ;;  %v6818_v7 = vpop.f32.mrf.mxu1  ;;  %v2504_v57 = vmul.f32 %v8140_v31, %v8139_v24  ;;  %v8141_v59 = vld [vmem:[#allocation42_spill] sm:$0xff] }
  0xef   : > { %5145 = vmatmul.mubr.msk.bf16.gmra.mxu1 %vm715_vm2, %v2520_v27  ;;  %8135 = vst [vmem:[#allocation67_spill] sm:$0xff] %v6818_v7  ;;  %5180 = vmatprep.mubr.msk.bf16.mxu0 %vm715_vm2, %v8138_v38  ;;  %v2506_v18 = vmul.f32 %v8142_v2, %v8141_v59  ;;  %v8144_v27 = vld [vmem:[#allocation26_spill] sm:$0xff] }
  0xf0   : > { %v6826_v10 = vpop.f32.mrf.mxu0  ;;  %5148 = vmatprep.mubr.msk.bf16.mxu1 %vm715_vm2, %v2521_v15  ;;  %v6831_v56 = vpop.f32.mrf.mxu1  ;;  %v2936_v16 = vpack.c.bf16 %v8144_v27, %v2913_v12  ;;  %v2522_v46 = vpack.c.bf16 %v2504_v57, %v8145_v35  ;;  %v8146_v15 = vld [vmem:[#allocation27_spill] sm:$0xff]  ;;  %v8147_v12 = vld [vmem:[#allocation8_spill] sm:$0xff]  ;;  %v8148_v57 = vld [vmem:[#allocation62_spill] sm:$0xff] }
  0xf1   : > { %8143 = vst [vmem:[#allocation7_spill] sm:$0xff] %v6831_v56  ;;  %v2523_v31 = vpack.c.bf16 %v2506_v18, %v8101_v58  ;;  %v2917_v2 = vmul.f32 %v8146_v15, %v8098_v22  ;;  %v2508_v27 = vmul.f32 %v8148_v57, %v8147_v12  ;;  %v8152_v56 = vld [vmem:[#allocation52_spill] sm:$0xff] }
  0xf2   : > { %v6834_v7 = vpop.f32.mrf.mxu1 }
  0xf3   : > { %v2938_v22 = vpack.c.bf16 %v8102_v21, %v2917_v2 }
  0xf4   : > { %v4930_v38 = vpop.f32.mrf.mxu0 }
  0xf6   : > { %5181 = vmatmul.mubr.msk.bf16.gmra.mxu0 %vm715_vm2, %v2936_v16  ;;  %v6840_v36 = vpop.f32.mrf.mxu0 }
  0xf7   : > { %v6844_v59 = vpop.f32.mrf.mxu1  ;;  %5149 = vmatmul.mubr.msk.bf16.gmra.mxu1 %vm715_vm2, %v2522_v46  ;;  %5184 = vmatprep.mubr.msk.bf16.mxu0 %vm715_vm2, %v2937_v62  ;;  %v2524_v46 = vpack.c.bf16 %v2508_v27, %v8152_v56  ;;  %v2939_v62 = vpack.c.bf16 %v8107_v3, %v2919_v45  ;;  %v8156_v3 = vld [vmem:[#allocation47_spill] sm:$0xff]  ;;  %v2940_v45 = vpack.c.bf16 %v8108_v60, %v2921_v37  ;;  %v8163_v60 = vld [vmem:[#allocation64_spill] sm:$0xff] }
  0xf8   : > { %v4931_v18 = vpop.f32.mrf.mxu0  ;;  %5152 = vmatprep.mubr.msk.bf16.mxu1 %vm715_vm2, %v2523_v31  ;;  %v8154_v31 = vld [vmem:[#allocation10_spill] sm:$0xff] }
  0xf9   : > { %v6853_v16 = vpop.f32.mrf.mxu1  ;;  %v2923_v61 = vmul.f32 %v8106_v32, %v8154_v31 }
  0xfa   : > { %8150 = vst [vmem:[#allocation6_spill] sm:$0xff] %v6853_v16  ;;  %v817_v58 = vpop.f32.mrf.mxu0 }
  0xfb   : > { %v6856_v15 = vpop.f32.mrf.mxu1  ;;  %v2941_v23 = vpack.c.bf16 %v8113_v28, %v2923_v61  ;;  %v3700_v28 = vmul.f32 %v8163_v60, %v6099_v8 }
  0xfc   : > { %8151 = vst [vmem:[#allocation18_spill] sm:$0xff] %v6856_v15 }
  0xfd   : > { %v6860_v35 = vpop.f32.mrf.mxu1 }
  0xfe   : > { %8153 = vst [vmem:[#allocation29_spill] sm:$0xff] %v6860_v35  ;;  %v6862_v57 = vpop.f32.mrf.mxu0  ;;  %5185 = vmatmul.mubr.msk.bf16.gmra.mxu0 %vm715_vm2, %v2938_v22 }
  0xff   : > { %v6869_v12 = vpop.f32.mrf.mxu1  ;;  %5153 = vmatmul.mubr.msk.bf16.gmra.mxu1 %vm715_vm2, %v2524_v46  ;;  %5188 = vmatprep.mubr.msk.bf16.mxu0 %vm715_vm2, %v2939_v62  ;;  %v8160_v46 = vld [vmem:[#allocation22_spill] sm:$0xff] }
 0x100   : > { %8155 = vst [vmem:[#allocation37_spill] sm:$0xff] %v6869_v12  ;;  %v830_v21 = vpop.f32.mrf.mxu0  ;;  %5204 = vmatprep.mubr.msk.bf16.mxu1 %vm715_vm2, %v8156_v3  ;;  %v2926_v62 = vmul.f32 0.0, %v8160_v46  ;;  %v8161_v3 = vld [vmem:[#allocation23_spill] sm:$0xff]  ;;  %v8162_v12 = vld [vmem:[#allocation48_spill] sm:$0xff]  ;;  %v8164_v46 = vld [vmem:[#allocation54_spill] sm:$0xff] }
 0x101   : > { %v6875_v2 = vpop.f32.mrf.mxu1  ;;  %v2925_v56 = vmul.f32 0.0, %v8161_v3 }
 0x102   : > { %8157 = vst [vmem:[#allocation32_spill] sm:$0xff] %v6875_v2  ;;  %v6877_v27 = vpop.f32.mrf.mxu0 }
 0x103   : > { %v6880_v19 = vpop.f32.mrf.mxu1 }
 0x104   : > { %8158 = vst [vmem:[#allocation38_spill] sm:$0xff] %v6880_v19  ;;  %v6883_v32 = vpop.f32.mrf.mxu0  ;;  %v2942_v19 = vpack.c.bf16 %v2926_v62, %v2925_v56 }
 0x105   : > { %v6885_v22 = vpop.f32.mrf.mxu1 }
 0x106   : > { %8159 = vst [vmem:[#allocation44_spill] sm:$0xff] %v6885_v22  ;;  %v6888_v31 = vpop.f32.mrf.mxu0  ;;  %5189 = vmatmul.mubr.msk.bf16.gmra.mxu0 %vm715_vm2, %v2940_v45 }
 0x107   : > { %v4966_v2 = vpop.f32.mrf.mxu1  ;;  %5205 = vmatmul.mubr.msk.bf16.vlgmr.msra.gmra.mxu1 %vm715_vm2, %v8162_v12  ;;  %5192 = vmatprep.mubr.msk.bf16.mxu0 %vm715_vm2, %v2941_v23  ;;  %v3731_v12 = vpack.c.bf16 %v3700_v28, %v8053_v39 }
 0x108   : > { %v1040_v37 = vadd.f32 %v4966_v2, %v6799_v41  ;;  %v6898_v61 = vpop.f32.mrf.mxu0  ;;  %5208 = vmatprep.mubr.msk.bf16.mxu1 %vm715_vm2, %v8164_v46  ;;  %v8165_v46 = vld [vmem:[#allocation55_spill] sm:$0xff] }
 0x109   : > { %v1031_v22 = vpop.f32.mrf.mxu1 }
 0x10a   : > { %v1032_v45 = vadd.f32 %v1031_v22, %v6802_v34  ;;  %v6903_v3 = vpop.f32.mrf.mxu0  ;;  %v8166_v34 = vld [vmem:[#allocation71_spill] sm:$0xff] }
 0x10b   : > { %v4967_v35 = vpop.f32.mrf.mxu1  ;;  %v3704_v39 = vmul.f32 %v8166_v34, %v6161_v25  ;;  %v3706_v34 = vmul.f32 %v8109_v54, %v6183_v4 }
 0x10c   : > { %v1043_v23 = vadd.f32 %v4967_v35, %v6807_v20  ;;  %v6907_v15 = vpop.f32.mrf.mxu0  ;;  %v8167_v20 = vld [vmem:[#allocation58_spill] sm:$0xff] }
 0x10d   : > { %v1034_v8 = vpop.f32.mrf.mxu1  ;;  %v3733_v28 = vpack.c.bf16 %v3704_v39, %v6154_v43  ;;  %v3708_v43 = vmul.f32 %v6455_v17, %v6197_v52 }
 0x10e   : > { %v1035_v41 = vadd.f32 %v1034_v8, %v6826_v10  ;;  %v6910_v2 = vpop.f32.mrf.mxu0  ;;  %5193 = vmatmul.mubr.msk.bf16.gmra.mxu0 %vm715_vm2, %v2942_v19 }
 0x10f   : > { %v4970_v60 = vpop.f32.mrf.mxu1  ;;  %5209 = vmatmul.mubr.msk.bf16.gmra.mxu1 %vm715_vm2, %v8165_v46  ;;  %5244 = vmatprep.mubr.msk.bf16.mxu0 %vm715_vm2, %v3731_v12 }
 0x110   : > { %v1056_v56 = vadd.f32 %v4970_v60, %v4930_v38  ;;  %v6918_v35 = vpop.f32.mrf.mxu0  ;;  %5212 = vmatprep.mubr.msk.bf16.mxu1 %vm715_vm2, %v8167_v20  ;;  %v8168_v38 = vld [vmem:[#allocation56_spill] sm:$0xff] }
 0x111   : > { %v1047_v10 = vpop.f32.mrf.mxu1  ;;  %v8169_v60 = vpack.c.bf16 %v8168_v38, %v6124_v44  ;;  %v8171_v44 = vld [vmem:[#allocation60_spill] sm:$0xff] }
 0x112   : > { %v1048_v22 = vadd.f32 %v1047_v10, %v6840_v36  ;;  %v6923_v62 = vpop.f32.mrf.mxu0  ;;  %v8170_v10 = vld [vmem:[#allocation59_spill] sm:$0xff] }
 0x113   : > { %v4971_v19 = vpop.f32.mrf.mxu1 }
 0x114   : > { %v1059_v8 = vadd.f32 %v4971_v19, %v4931_v18  ;;  %v6926_v46 = vpop.f32.mrf.mxu0 }
 0x115   : > { %v1050_v12 = vpop.f32.mrf.mxu1 }
 0x116   : > { %v1051_v16 = vadd.f32 %v1050_v12, %v817_v58  ;;  %v5006_v25 = vpop.f32.mrf.mxu0  ;;  %5245 = vmatmul.mubr.msk.bf16.vlgmr.msra.gmra.mxu0 %vm715_vm2, %v8169_v60 }
 0x117   : > { %v4974_v36 = vpop.f32.mrf.mxu1  ;;  %v6934_v20 = vadd.f32 %v5006_v25, %v1040_v37  ;;  %5213 = vmatmul.mubr.msk.bf16.gmra.mxu1 %vm715_vm2, %v8170_v10  ;;  %5248 = vmatprep.mubr.msk.bf16.mxu0 %vm715_vm2, %v3733_v28  ;;  %v3734_v37 = vpack.c.bf16 %v3706_v34, %v6174_v9  ;;  %v3735_v28 = vpack.c.bf16 %v3708_v43, %v6190_v51 }
 0x118   : > { %v1072_v58 = vadd.f32 %v4974_v36, %v6862_v57  ;;  %v1385_v18 = vpop.f32.mrf.mxu0  ;;  %5216 = vmatprep.mubr.msk.bf16.mxu1 %vm715_vm2, %v8171_v44  ;;  %v3712_v51 = vmul.f32 %v6482_v29, %v6243_v26 }
 0x119   : > { %v1063_v39 = vpop.f32.mrf.mxu1  ;;  %v6944_v19 = vadd.f32 %v1385_v18, %v1032_v45 }
 0x11a   : > { %v1064_v4 = vadd.f32 %v1063_v39, %v830_v21  ;;  %v5007_v54 = vpop.f32.mrf.mxu0  ;;  %v3710_v21 = vmul.f32 %v6479_v0, %v6216_v11  ;;  %v3737_v44 = vpack.c.bf16 %v3712_v51, %v6247_v14  ;;  %v3716_v14 = vmul.f32 %v6515_v40, %v6558_v53 }
 0x11b   : > { %v4975_v12 = vpop.f32.mrf.mxu1  ;;  %v6947_v25 = vadd.f32 %v5007_v54, %v1043_v23  ;;  %v8172_v23 = vld [vmem:[#allocation61_spill] sm:$0xff] }
 0x11c   : > { %v1075_v52 = vadd.f32 %v4975_v12, %v6877_v27  ;;  %v1388_v17 = vpop.f32.mrf.mxu0 }
 0x11d   : > { %v1066_v57 = vpop.f32.mrf.mxu1  ;;  %v6951_v38 = vadd.f32 %v1388_v17, %v1035_v41  ;;  %v8173_v41 = vld [vmem:[#allocation49_spill] sm:$0xff] }
 0x11e   : > { %v1067_v60 = vadd.f32 %v1066_v57, %v6883_v32  ;;  %v5010_v36 = vpop.f32.mrf.mxu0  ;;  %5249 = vmatmul.mubr.msk.bf16.gmra.mxu0 %vm715_vm2, %v3734_v37  ;;  %v3739_v57 = vpack.c.bf16 %v3716_v14, %v8119_v13  ;;  %v3720_v13 = vmul.f32 %v6561_v42, %v8124_v47 }
 0x11f   : > { %v4978_v9 = vpop.f32.mrf.mxu1  ;;  %v6957_v45 = vadd.f32 %v5010_v36, %v1056_v56  ;;  %5217 = vmatmul.mubr.msk.bf16.gmra.mxu1 %vm715_vm2, %v8172_v23  ;;  %5252 = vmatprep.mubr.msk.bf16.mxu0 %vm715_vm2, %v3735_v28  ;;  %v3736_v56 = vpack.c.bf16 %v3710_v21, %v6220_v1 }
 0x120   : > { %v1088_v27 = vadd.f32 %v4978_v9, %v6888_v31  ;;  %v1401_v32 = vpop.f32.mrf.mxu0  ;;  %5220 = vmatprep.mubr.msk.bf16.mxu1 %vm715_vm2, %v8173_v41  ;;  %v3741_v41 = vpack.c.bf16 %v3720_v13, %v8127_v6  ;;  %v8178_v6 = vld [vmem:[#allocation72_spill] sm:$0xff]  ;;  %v8186_v13 = vld [vmem:[#allocation29_spill] sm:$0xff] }
 0x121   : > { %v1079_v34 = vpop.f32.mrf.mxu1  ;;  %v6967_v10 = vadd.f32 %v1401_v32, %v1048_v22 }
 0x122   : > { %v1080_v11 = vadd.f32 %v1079_v34, %v6898_v61  ;;  %v5011_v0 = vpop.f32.mrf.mxu0  ;;  %v3714_v61 = vmul.f32 %v6512_v49, %v6549_v5 }
 0x123   : > { %v4979_v43 = vpop.f32.mrf.mxu1  ;;  %v6971_v18 = vadd.f32 %v5011_v0, %v1059_v8  ;;  %v8174_v8 = vld [vmem:[#allocation65_spill] sm:$0xff] }
 0x124   : > { %v1091_v26 = vadd.f32 %v4979_v43, %v6903_v3  ;;  %v1404_v29 = vpop.f32.mrf.mxu0  ;;  %v8175_v3 = vld [vmem:[#allocation35_spill] sm:$0xff]  ;;  %v3738_v5 = vpack.c.bf16 %v3714_v61, %v6579_v63 }
 0x125   : > { %v1082_v31 = vpop.f32.mrf.mxu1  ;;  %v6975_v39 = vadd.f32 %v1404_v29, %v1051_v16 }
 0x126   : > { %v1083_v54 = vadd.f32 %v1082_v31, %v6907_v15  ;;  %v5014_v22 = vpop.f32.mrf.mxu0  ;;  %5253 = vmatmul.mubr.msk.bf16.gmra.mxu0 %vm715_vm2, %v3736_v56  ;;  %v5406_v31 = vld [vmem:[%s5568_s15 + $0x8] sm:$0xff] }
 0x127   : > { %v4982_v1 = vpop.f32.mrf.mxu1  ;;  %v6981_v37 = vadd.f32 %v5014_v22, %v1072_v58  ;;  %5221 = vmatmul.mubr.msk.bf16.gmra.mxu1 %vm715_vm2, %v8174_v8  ;;  %5256 = vmatprep.mubr.msk.bf16.mxu0 %vm715_vm2, %v3737_v44  ;;  %v8180_v8 = vld [vmem:[#allocation9_spill] sm:$0xff] }
 0x128   : > { %v1104_v16 = vadd.f32 %v4982_v1, %v6910_v2  ;;  %v1417_v15 = vpop.f32.mrf.mxu0  ;;  %5224 = vmatprep.mubr.msk.bf16.mxu1 %vm715_vm2, %v8175_v3 }
 0x129   : > { %v1095_v12 = vpop.f32.mrf.mxu1  ;;  %v6991_v28 = vadd.f32 %v1417_v15, %v1064_v4  ;;  %v3718_v4 = vmul.f32 %v6552_v50, %v6596_v55  ;;  %v8182_v15 = vld [vmem:[#allocation21_spill] sm:$0xff] }
 0x12a   : > { %v5015_v49 = vpop.f32.mrf.mxu0  ;;  %v1096_v44 = vadd.f32 %v1095_v12, %v6918_v35  ;;  %v8181_v35 = vld [vmem:[#allocation6_spill] sm:$0xff] }
 0x12b   : > { %v4983_v58 = vpop.f32.mrf.mxu1  ;;  %v6994_v17 = vadd.f32 %v5015_v49, %v1075_v52  ;;  %v8176_v52 = vld [vmem:[#allocation69_spill] sm:$0xff]  ;;  %v3740_v55 = vpack.c.bf16 %v3718_v4, %v6619_v30  ;;  %v3722_v30 = vmul.f32 %v8125_v48, %v6337_v33 }
 0x12c   : > { %v1107_v36 = vadd.f32 %v4983_v58, %v6923_v62  ;;  %v1420_v40 = vpop.f32.mrf.mxu0  ;;  %v8183_v58 = vld [vmem:[#allocation39_spill] sm:$0xff] }
 0x12d   : > { %v1098_v53 = vpop.f32.mrf.mxu1  ;;  %v6998_v2 = vadd.f32 %v1420_v40, %v1067_v60  ;;  %v3742_v3 = vpack.c.bf16 %v3722_v30, %v8182_v15 }
 0x12e   : > { %v1099_v21 = vadd.f32 %v1098_v53, %v6926_v46  ;;  %v5018_v9 = vpop.f32.mrf.mxu0  ;;  %5257 = vmatmul.mubr.msk.bf16.gmra.mxu0 %vm715_vm2, %v3738_v5  ;;  %v8177_v46 = vld [vmem:[#allocation51_spill] sm:$0xff]  ;;  %v8185_v53 = vld [vmem:[#allocation66_spill] sm:$0xff] }
 0x12f   : > { %v4986_v63 = vpop.f32.mrf.mxu1  ;;  %v7004_v23 = vadd.f32 %v5018_v9, %v1088_v27  ;;  %5225 = vmatmul.mubr.msk.bf16.gmra.mxu1 %vm715_vm2, %v8176_v52  ;;  %5260 = vmatprep.mubr.msk.bf16.mxu0 %vm715_vm2, %v3739_v57  ;;  %v8184_v57 = vld [vmem:[#allocation18_spill] sm:$0xff] }
 0x130   : > { %v1433_v62 = vpop.f32.mrf.mxu0  ;;  %5228 = vmatprep.mubr.msk.bf16.mxu1 %vm715_vm2, %v8177_v46  ;;  %v1120_v9 = vadd.f32 %v4986_v63, %v8185_v53  ;;  %v8190_v63 = vld [vmem:[#allocation8_spill] sm:$0xff] }
 0x131   : > { %v1111_v60 = vpop.f32.mrf.mxu1  ;;  %v7013_v51 = vadd.f32 %v1433_v62, %v1080_v11  ;;  %v5405_v11 = vld [vmem:[%s5568_s15] sm:$0xff]  ;;  %v8199_v53 = vld [vmem:[#allocation76_spill] sm:$0xff] }
 0x132   : > { %v5019_v50 = vpop.f32.mrf.mxu0  ;;  %v3311_v43 = vmul.f32 0.0, %v5405_v11 }
 0x133   : > { %v4987_v27 = vpop.f32.mrf.mxu1  ;;  %v7016_v32 = vadd.f32 %v5019_v50, %v1091_v26  ;;  %v8187_v50 = vld [vmem:[#allocation42_spill] sm:$0xff] }
 0x134   : > { %v1436_v34 = vpop.f32.mrf.mxu0 }
 0x135   : > { %v1114_v0 = vpop.f32.mrf.mxu1  ;;  %v7019_v42 = vadd.f32 %v1436_v34, %v1083_v54  ;;  %v8179_v54 = vld [vmem:[#allocation28_spill] sm:$0xff] }
 0x136   : > { %v1115_v47 = vadd.f32 %v1114_v0, %v6834_v7  ;;  %v5022_v56 = vpop.f32.mrf.mxu0  ;;  %5261 = vmatmul.mubr.msk.bf16.gmra.mxu0 %vm715_vm2, %v3740_v55  ;;  %v3312_v7 = vmul.f32 0.0, %v5406_v31  ;;  %v3724_v22 = vmul.f32 %v8179_v54, %v8139_v24  ;;  %v8188_v55 = vld [vmem:[#allocation30_spill] sm:$0xff]  ;;  %v8194_v54 = vld [vmem:[#allocation32_spill] sm:$0xff] }
 0x137   : > { %v4990_v26 = vpop.f32.mrf.mxu1  ;;  %v7027_v29 = vadd.f32 %v5022_v56, %v1104_v16  ;;  %5229 = vmatmul.mubr.msk.bf16.gmra.mxu1 %vm715_vm2, %v8178_v6  ;;  %5264 = vmatprep.mubr.msk.bf16.mxu0 %vm715_vm2, %v3741_v41  ;;  %v8189_v41 = vld [vmem:[#allocation67_spill] sm:$0xff] }
 0x138   : > { %v1136_v61 = vadd.f32 %v4990_v26, %v6844_v59  ;;  %v1449_v1 = vpop.f32.mrf.mxu0  ;;  %5232 = vmatprep.mubr.msk.bf16.mxu1 %vm715_vm2, %v8180_v8  ;;  %v3328_v5 = vpack.c.bf16 %v3312_v7, %v3311_v43  ;;  %v3743_v24 = vpack.c.bf16 %v3724_v22, %v8183_v58  ;;  %v1112_v34 = vadd.f32 %v1111_v60, %v8189_v41  ;;  %v8192_v43 = vld [vmem:[#allocation37_spill] sm:$0xff]  ;;  %v8193_v26 = vld [vmem:[#allocation7_spill] sm:$0xff] }
 0x139   : > { %v1127_v33 = vpop.f32.mrf.mxu1  ;;  %v7038_v48 = vadd.f32 %v1449_v1, %v1096_v44  ;;  %v1123_v6 = vadd.f32 %v4987_v27, %v8193_v26  ;;  %v8195_v1 = vld [vmem:[#allocation13_spill] sm:$0xff]  ;;  %v8198_v27 = vld [vmem:[#allocation44_spill] sm:$0xff] }
 0x13a   : > { %v1128_v14 = vadd.f32 %v1127_v33, %v8181_v35  ;;  %v5023_v16 = vpop.f32.mrf.mxu0 }
 0x13b   : > { %v4991_v12 = vpop.f32.mrf.mxu1  ;;  %v7042_v49 = vadd.f32 %v5023_v16, %v1107_v36  ;;  %v3726_v36 = vmul.f32 %v8188_v55, %v8187_v50  ;;  %v8196_v16 = vld [vmem:[#allocation52_spill] sm:$0xff] }
 0x13c   : > { %v1139_v59 = vadd.f32 %v4991_v12, %v8184_v57  ;;  %v1452_v40 = vpop.f32.mrf.mxu0 }
 0x13d   : > { %v1130_v4 = vpop.f32.mrf.mxu1  ;;  %v7047_v52 = vadd.f32 %v1452_v40, %v1099_v21  ;;  %v8191_v21 = vld [vmem:[#allocation41_spill] sm:$0xff]  ;;  %v3744_v8 = vpack.c.bf16 %v3726_v36, %v8195_v1 }
 0x13e   : > { %v1131_v62 = vadd.f32 %v1130_v4, %v8186_v13  ;;  %v5026_v46 = vpop.f32.mrf.mxu0  ;;  %5265 = vmatmul.mubr.msk.bf16.gmra.mxu0 %vm715_vm2, %v3742_v3  ;;  %v3728_v11 = vmul.f32 %v8191_v21, %v8190_v63  ;;  %v8197_v3 = vld [vmem:[#allocation38_spill] sm:$0xff]  ;;  %v8200_v4 = vld [vmem:[#allocation36_spill] sm:$0xff] }
 0x13f   : > { %v4994_v0 = vpop.f32.mrf.mxu1  ;;  %v7054_v56 = vadd.f32 %v5026_v46, %v1120_v9  ;;  %5233 = vmatmul.mubr.msk.bf16.gmra.mxu1 %vm715_vm2, %v3328_v5  ;;  %5268 = vmatprep.mubr.msk.bf16.mxu0 %vm715_vm2, %v3743_v24  ;;  %v3729_v9 = vmul.f32 0.0, %v8199_v53  ;;  %v3730_v13 = vmul.f32 0.0, %v8200_v4 }
 0x140   : > { %v1152_v30 = vadd.f32 %v4994_v0, %v8192_v43  ;;  %v1465_v44 = vpop.f32.mrf.mxu0  ;;  %v3745_v15 = vpack.c.bf16 %v3728_v11, %v8196_v16 }
 0x141   : > { %v1143_v31 = vpop.f32.mrf.mxu1  ;;  %v7062_v7 = vadd.f32 %v1465_v44, %v1112_v34  ;;  %v3746_v63 = vpack.c.bf16 %v3730_v13, %v3729_v9 }
 0x142   : > { %v1144_v60 = vadd.f32 %v1143_v31, %v8194_v54  ;;  %v5027_v22 = vpop.f32.mrf.mxu0 }
 0x143   : > { %v4995_v33 = vpop.f32.mrf.mxu1  ;;  %v7066_v35 = vadd.f32 %v5027_v22, %v1123_v6 }
 0x144   : > { %v1155_v12 = vadd.f32 %v4995_v33, %v8197_v3  ;;  %v1468_v5 = vpop.f32.mrf.mxu0 }
 0x145   : > { %v1146_v58 = vpop.f32.mrf.mxu1  ;;  %v7070_v24 = vadd.f32 %v1468_v5, %v1115_v47 }
 0x146   : > { %v1147_v57 = vadd.f32 %v1146_v58, %v8198_v27  ;;  %v5030_v40 = vpop.f32.mrf.mxu0  ;;  %5269 = vmatmul.mubr.msk.bf16.gmra.mxu0 %vm715_vm2, %v3744_v8 }
 0x147   : > { %v7076_v46 = vadd.f32 %v5030_v40, %v1136_v61  ;;  %v5046_v50 = vpop.f32.mrf.mxu1  ;;  %5272 = vmatprep.mubr.msk.bf16.mxu0 %vm715_vm2, %v3745_v15 }
 0x148   : > { %v1997_v55 = vadd.f32 %v5046_v50, %v6934_v20  ;;  %v1481_v36 = vpop.f32.mrf.mxu0 }
 0x149   : > { %v7080_v41 = vadd.f32 %v1481_v36, %v1128_v14  ;;  %v1868_v47 = vpop.f32.mrf.mxu1 }
 0x14a   : > { %v1995_v34 = vadd.f32 %v1868_v47, %v6944_v19  ;;  %v5031_v0 = vpop.f32.mrf.mxu0 }
 0x14b   : > { %v7083_v21 = vadd.f32 %v5031_v0, %v1139_v59  ;;  %v5047_v11 = vpop.f32.mrf.mxu1 }
 0x14c   : > { %v1998_v43 = vadd.f32 %v5047_v11, %v6947_v25  ;;  %v1484_v61 = vpop.f32.mrf.mxu0 }
 0x14d   : > { %v7086_v44 = vadd.f32 %v1484_v61, %v1131_v62  ;;  %v1871_v26 = vpop.f32.mrf.mxu1 }
 0x14e   : > { %v1996_v6 = vadd.f32 %v1871_v26, %v6951_v38  ;;  %v5034_v20 = vpop.f32.mrf.mxu0  ;;  %5273 = vmatmul.mubr.msk.bf16.gmra.mxu0 %vm715_vm2, %v3746_v63  ;;  %vm5470_vm2 = vmmov 0  }
 0x14f   : > { %v7090_v14 = vadd.f32 %v5034_v20, %v1152_v30  ;;  %v5050_v31 = vpop.f32.mrf.mxu1 }
 0x150   : > { %v2001_v19 = vadd.f32 %v5050_v31, %v6957_v45  ;;  %v1497_v54 = vpop.f32.mrf.mxu0 }
 0x151   : > { %v7093_v59 = vadd.f32 %v1497_v54, %v1144_v60  ;;  %v1884_v22 = vpop.f32.mrf.mxu1 }
 0x152   : > { %v1999_v25 = vadd.f32 %v1884_v22, %v6967_v10  ;;  %v5035_v1 = vpop.f32.mrf.mxu0 }
 0x153   : > { %v7096_v62 = vadd.f32 %v5035_v1, %v1155_v12  ;;  %v5051_v8 = vpop.f32.mrf.mxu1 }
 0x154   : > { %v2002_v38 = vadd.f32 %v5051_v8, %v6971_v18  ;;  %v1500_v33 = vpop.f32.mrf.mxu0 }
 0x155   : > { %v7099_v16 = vadd.f32 %v1500_v33, %v1147_v57  ;;  %v1887_v30 = vpop.f32.mrf.mxu1 }
 0x156   : > { %v2000_v15 = vadd.f32 %v1887_v30, %v6975_v39  ;;  %v5086_v3 = vpop.f32.mrf.mxu0 }
 0x157   : > { %v5054_v45 = vpop.f32.mrf.mxu1  ;;  %v7102_v5 = vadd.f32 %v5086_v3, %v1997_v55 }
 0x158   : > { %v2005_v60 = vadd.f32 %v5054_v45, %v6981_v37  ;;  %v2254_v58 = vpop.f32.mrf.mxu0 }
 0x159   : > { %v1900_v10 = vpop.f32.mrf.mxu1  ;;  %v7105_v27 = vadd.f32 %v2254_v58, %v1995_v34 }
 0x15a   : > { %v2003_v12 = vadd.f32 %v1900_v10, %v6991_v28  ;;  %v5087_v40 = vpop.f32.mrf.mxu0 }
 0x15b   : > { %v5055_v18 = vpop.f32.mrf.mxu1  ;;  %v7108_v53 = vadd.f32 %v5087_v40, %v1998_v43 }
 0x15c   : > { %v2006_v57 = vadd.f32 %v5055_v18, %v6994_v17  ;;  %v2257_v9 = vpop.f32.mrf.mxu0 }
 0x15d   : > { %v1903_v39 = vpop.f32.mrf.mxu1  ;;  %v7111_v4 = vadd.f32 %v2257_v9, %v1996_v6 }
 0x15e   : > { %v2004_v13 = vadd.f32 %v1903_v39, %v6998_v2  ;;  %v5090_v50 = vpop.f32.mrf.mxu0 }
 0x15f   : > { %v5058_v37 = vpop.f32.mrf.mxu1  ;;  %v7114_v55 = vadd.f32 %v5090_v50, %v2001_v19 }
 0x160   : > { %v2009_v36 = vadd.f32 %v5058_v37, %v7004_v23  ;;  %v2270_v47 = vpop.f32.mrf.mxu0 }
 0x161   : > { %v1916_v28 = vpop.f32.mrf.mxu1  ;;  %v7117_v34 = vadd.f32 %v2270_v47, %v1999_v25 }
 0x162   : > { %v2007_v0 = vadd.f32 %v1916_v28, %v7013_v51  ;;  %v5091_v63 = vpop.f32.mrf.mxu0 }
 0x163   : > { %v5059_v17 = vpop.f32.mrf.mxu1  ;;  %v7120_v11 = vadd.f32 %v5091_v63, %v2002_v38 }
 0x164   : > { %v2010_v43 = vadd.f32 %v5059_v17, %v7016_v32  ;;  %v2273_v61 = vpop.f32.mrf.mxu0 }
 0x165   : > { %v1919_v2 = vpop.f32.mrf.mxu1  ;;  %v7123_v26 = vadd.f32 %v2273_v61, %v2000_v15 }
 0x166   : > { %v2008_v6 = vadd.f32 %v1919_v2, %v7019_v42  ;;  %v5094_v20 = vpop.f32.mrf.mxu0 }
 0x167   : > { %v5062_v23 = vpop.f32.mrf.mxu1  ;;  %v7126_v31 = vadd.f32 %v5094_v20, %v2005_v60  ;;  %v4144_v20 = vld [vmem:[%s7795_s3 + $0x70] sm:$0xff] }
 0x168   : > { %v2013_v19 = vadd.f32 %v5062_v23, %v7027_v29  ;;  %v2286_v54 = vpop.f32.mrf.mxu0 }
 0x169   : > { %v1932_v51 = vpop.f32.mrf.mxu1  ;;  %v7129_v22 = vadd.f32 %v2286_v54, %v2003_v12 }
 0x16a   : > { %v2011_v25 = vadd.f32 %v1932_v51, %v7038_v48  ;;  %v5095_v1 = vpop.f32.mrf.mxu0 }
 0x16b   : > { %v5063_v32 = vpop.f32.mrf.mxu1  ;;  %v7132_v8 = vadd.f32 %v5095_v1, %v2006_v57 }
 0x16c   : > { %v2014_v38 = vadd.f32 %v5063_v32, %v7042_v49  ;;  %v2289_v33 = vpop.f32.mrf.mxu0  ;;  %v4143_v32 = vld [vmem:[%s7795_s3 + $0x68] sm:$0xff] }
 0x16d   : > { %v1935_v42 = vpop.f32.mrf.mxu1  ;;  %v7135_v30 = vadd.f32 %v2289_v33, %v2004_v13 }
 0x16e   : > { %v2012_v15 = vadd.f32 %v1935_v42, %v7047_v52  ;;  %v5098_v3 = vpop.f32.mrf.mxu0 }
 0x16f   : > { %v5066_v29 = vpop.f32.mrf.mxu1  ;;  %v7138_v45 = vadd.f32 %v5098_v3, %v2009_v36 }
 0x170   : > { %v2017_v60 = vadd.f32 %v5066_v29, %v7054_v56  ;;  %v2302_v58 = vpop.f32.mrf.mxu0 }
 0x171   : > { %v1948_v48 = vpop.f32.mrf.mxu1  ;;  %v7141_v10 = vadd.f32 %v2302_v58, %v2007_v0 }
 0x172   : > { %v2015_v12 = vadd.f32 %v1948_v48, %v7062_v7  ;;  %v5099_v40 = vpop.f32.mrf.mxu0 }
 0x173   : > { %v5067_v49 = vpop.f32.mrf.mxu1  ;;  %v7144_v18 = vadd.f32 %v5099_v40, %v2010_v43  ;;  %v8201_v43 = vmov 0.0  }
 0x174   : > { %v2018_v57 = vadd.f32 %v5067_v49, %v7066_v35  ;;  %v2305_v9 = vpop.f32.mrf.mxu0  ;;  %v4145_v35 = vld [vmem:[%s7795_s3 + $0x78] sm:$0xff]  ;;  %5308 = vmatprep.mubr.msk.f32.mxu1 %vm5470_vm2, %v8201_v43 }
 0x175   : > { %v1951_v52 = vpop.f32.mrf.mxu1  ;;  %v7147_v39 = vadd.f32 %v2305_v9, %v2008_v6  ;;  %5277 = vmatpush3.msra.mxu1 %v4145_v35  ;;  %v4141_v9 = vld [vmem:[%s7795_s3 + $0x58] sm:$0xff] }
 0x176   : > { %v2016_v13 = vadd.f32 %v1951_v52, %v7070_v24  ;;  %v5102_v50 = vpop.f32.mrf.mxu0  ;;  %5278 = vmatprep.subr.mxu1 %v8201_v43 }
 0x177   : > { %v5070_v56 = vpop.f32.mrf.mxu1  ;;  %v7150_v37 = vadd.f32 %v5102_v50, %v2013_v19  ;;  %5279 = vmatpush3.msra.mxu1 %v4144_v20 }
 0x178   : > { %v2021_v36 = vadd.f32 %v5070_v56, %v7076_v46  ;;  %v2318_v47 = vpop.f32.mrf.mxu0  ;;  %5280 = vmatprep.subr.mxu1 %v8201_v43 }
 0x179   : > { %v1964_v7 = vpop.f32.mrf.mxu1  ;;  %v7153_v28 = vadd.f32 %v2318_v47, %v2011_v25  ;;  %5281 = vmatpush3.msra.mxu1 %v4143_v32 }
 0x17a   : > { %v2019_v0 = vadd.f32 %v1964_v7, %v7080_v41  ;;  %v5103_v63 = vpop.f32.mrf.mxu0  ;;  %5282 = vmatprep.subr.mxu1 %v8201_v43  ;;  %v4140_v7 = vld [vmem:[%s7795_s3 + $0x50] sm:$0xff] }
 0x17b   : > { %v5071_v17 = vpop.f32.mrf.mxu1  ;;  %v7159_v24 = vadd.f32 %v5103_v63, %v2014_v38 }
 0x17c   : > { %v2022_v61 = vadd.f32 %v5071_v17, %v7083_v21  ;;  %v2321_v46 = vpop.f32.mrf.mxu0 }
 0x17d   : > { %v1967_v2 = vpop.f32.mrf.mxu1  ;;  %v7163_v6 = vadd.f32 %v2321_v46, %v2012_v15  ;;  %v4139_v46 = vld [vmem:[%s7795_s3 + $0x48] sm:$0xff] }
 0x17e   : > { %v2020_v23 = vadd.f32 %v1967_v2, %v7086_v44  ;;  %v5106_v41 = vpop.f32.mrf.mxu0 }
 0x17f   : > { %v5074_v19 = vpop.f32.mrf.mxu1  ;;  %v7169_v54 = vadd.f32 %v5106_v41, %v2017_v60  ;;  %v4142_v60 = vld [vmem:[%s7795_s3 + $0x60] sm:$0xff] }
 0x180   : > { %v2025_v51 = vadd.f32 %v5074_v19, %v7090_v14  ;;  %v2334_v21 = vpop.f32.mrf.mxu0  ;;  %5283 = vmatpush3.msra.mxu1 %v4142_v60 }
 0x181   : > { %v1980_v25 = vpop.f32.mrf.mxu1  ;;  %v7173_v1 = vadd.f32 %v2334_v21, %v2015_v12  ;;  %5284 = vmatprep.subr.mxu1 %v8201_v43  ;;  %v4138_v21 = vld [vmem:[%s7795_s3 + $0x40] sm:$0xff] }
 0x182   : > { %v2023_v38 = vadd.f32 %v1980_v25, %v7093_v59  ;;  %v5107_v44 = vpop.f32.mrf.mxu0  ;;  %5285 = vmatpush3.msra.mxu1 %v4141_v9 }
 0x183   : > { %v5075_v33 = vpop.f32.mrf.mxu1  ;;  %v7179_v42 = vadd.f32 %v5107_v44, %v2018_v57  ;;  %5286 = vmatprep.subr.mxu1 %v8201_v43 }
 0x184   : > { %v2026_v15 = vadd.f32 %v5075_v33, %v7096_v62  ;;  %v2337_v14 = vpop.f32.mrf.mxu0  ;;  %5287 = vmatpush3.msra.mxu1 %v4140_v7 }
 0x185   : > { %v1983_v3 = vpop.f32.mrf.mxu1  ;;  %v7183_v29 = vadd.f32 %v2337_v14, %v2016_v13  ;;  %5288 = vmatprep.subr.mxu1 %v8201_v43  ;;  %v4137_v14 = vld [vmem:[%s7795_s3 + $0x38] sm:$0xff] }
 0x186   : > { %v2024_v58 = vadd.f32 %v1983_v3, %v7099_v16  ;;  %v5110_v59 = vpop.f32.mrf.mxu0  ;;  %5289 = vmatpush3.msra.mxu1 %v4139_v46 }
 0x187   : > { %8202 = vst [vmem:[#allocation40_spill] sm:$0xff] %v7183_v29  ;;  %v7189_v48 = vadd.f32 %v5110_v59, %v2021_v36  ;;  %v5126_v12 = vpop.f32.mrf.mxu1  ;;  %5290 = vmatprep.subr.mxu1 %v8201_v43 }
 0x188   : > { %v2769_v40 = vadd.f32 %v5126_v12, %v7102_v5  ;;  %v2350_v62 = vpop.f32.mrf.mxu0  ;;  %5291 = vmatpush3.msra.mxu1 %v4138_v21 }
 0x189   : > { %v7193_v49 = vadd.f32 %v2350_v62, %v2019_v0  ;;  %v2640_v57 = vpop.f32.mrf.mxu1  ;;  %5292 = vmatprep.subr.mxu1 %v8201_v43 }
 0x18a   : > { %v2767_v52 = vadd.f32 %v2640_v57, %v7105_v27  ;;  %v5111_v16 = vpop.f32.mrf.mxu0  ;;  %5293 = vmatpush3.msra.mxu1 %v4137_v14  ;;  %v4131_v14 = vld [vmem:[%s7795_s3 + $0x8] sm:$0xff] }
 0x18b   : > { %8203 = vst [vmem:[#allocation46_spill] sm:$0xff] %v7193_v49  ;;  %v7199_v13 = vadd.f32 %v5111_v16, %v2022_v61  ;;  %v5127_v50 = vpop.f32.mrf.mxu1  ;;  %5294 = vmatprep.subr.mxu1 %v8201_v43 }
 0x18c   : > { %v2770_v56 = vadd.f32 %v5127_v50, %v7108_v53  ;;  %v2353_v5 = vpop.f32.mrf.mxu0 }
 0x18d   : > { %v7203_v36 = vadd.f32 %v2353_v5, %v2020_v23  ;;  %v7205_v47 = vpop.f32.mrf.mxu1 }
 0x18e   : > { %v5114_v35 = vpop.f32.mrf.mxu0 }
 0x18f   : > { %8204 = vst [vmem:[#allocation19_spill] sm:$0xff] %v7203_v36  ;;  %v7210_v27 = vadd.f32 %v5114_v35, %v2025_v51  ;;  %v5130_v0 = vpop.f32.mrf.mxu1 }
 0x190   : > { %v2773_v63 = vadd.f32 %v5130_v0, %v7114_v55  ;;  %v2366_v17 = vpop.f32.mrf.mxu0 }
 0x191   : > { %v7214_v53 = vadd.f32 %v2366_v17, %v2023_v38  ;;  %v7216_v61 = vpop.f32.mrf.mxu1  ;;  %v4134_v17 = vld [vmem:[%s7795_s3 + $0x20] sm:$0xff] }
 0x192   : > { %v5115_v2 = vpop.f32.mrf.mxu0 }
 0x193   : > { %8205 = vst [vmem:[#allocation43_spill] sm:$0xff] %v7214_v53  ;;  %v7221_v20 = vadd.f32 %v5115_v2, %v2026_v15  ;;  %v5131_v23 = vpop.f32.mrf.mxu1 }
 0x194   : > { %v2774_v41 = vadd.f32 %v5131_v23, %v7120_v11  ;;  %v2369_v19 = vpop.f32.mrf.mxu0 }
 0x195   : > { %v7225_v55 = vadd.f32 %v2369_v19, %v2024_v58  ;;  %v7227_v51 = vpop.f32.mrf.mxu1 }
 0x196   : > { %v5166_v25 = vpop.f32.mrf.mxu0 }
 0x197   : > { %8206 = vst [vmem:[#allocation45_spill] sm:$0xff] %v7225_v55  ;;  %v5134_v32 = vpop.f32.mrf.mxu1  ;;  %v7232_v38 = vadd.f32 %v5166_v25, %v2769_v40  ;;  %v4132_v25 = vld [vmem:[%s7795_s3 + $0x10] sm:$0xff] }
 0x198   : > { %v2777_v44 = vadd.f32 %v5134_v32, %v7126_v31  ;;  %v3058_v33 = vpop.f32.mrf.mxu0 }
 0x199   : > { %v7236_v11 = vpop.f32.mrf.mxu1  ;;  %v7238_v15 = vadd.f32 %v3058_v33, %v2767_v52 }
 0x19a   : > { %v5167_v3 = vpop.f32.mrf.mxu0 }
 0x19b   : > { %v5135_v60 = vpop.f32.mrf.mxu1  ;;  %v7243_v58 = vadd.f32 %v5167_v3, %v2770_v56  ;;  %v4136_v56 = vld [vmem:[%s7795_s3 + $0x30] sm:$0xff] }
 0x19c   : > { %v2778_v59 = vadd.f32 %v5135_v60, %v7132_v8  ;;  %v7247_v12 = vpop.f32.mrf.mxu0  ;;  %5295 = vmatpush3.msra.mxu1 %v4136_v56  ;;  %v4130_v60 = vld [vmem:[%s7795_s3] sm:$0xff] }
 0x19d   : > { %v7249_v31 = vpop.f32.mrf.mxu1  ;;  %5296 = vmatprep.subr.mxu1 %v8201_v43 }
 0x19e   : > { %v5170_v40 = vpop.f32.mrf.mxu0 }
 0x19f   : > { %v5138_v62 = vpop.f32.mrf.mxu1  ;;  %v7251_v57 = vadd.f32 %v5170_v40, %v2773_v63 }
 0x1a0   : > { %v2781_v9 = vadd.f32 %v5138_v62, %v7138_v45  ;;  %v7254_v52 = vpop.f32.mrf.mxu0  ;;  %v4135_v45 = vld [vmem:[%s7795_s3 + $0x28] sm:$0xff] }
 0x1a1   : > { %v7256_v16 = vpop.f32.mrf.mxu1  ;;  %5297 = vmatpush3.msra.mxu1 %v4135_v45 }
 0x1a2   : > { %v5171_v50 = vpop.f32.mrf.mxu0  ;;  %5298 = vmatprep.subr.mxu1 %v8201_v43 }
 0x1a3   : > { %v5139_v8 = vpop.f32.mrf.mxu1  ;;  %v7261_v5 = vadd.f32 %v5171_v50, %v2774_v41  ;;  %5299 = vmatpush3.msra.mxu1 %v4134_v17  ;;  %v4133_v41 = vld [vmem:[%s7795_s3 + $0x18] sm:$0xff] }
 0x1a4   : > { %v2782_v7 = vadd.f32 %v5139_v8, %v7144_v18  ;;  %v7264_v35 = vpop.f32.mrf.mxu0  ;;  %5300 = vmatprep.subr.mxu1 %v8201_v43 }
 0x1a5   : > { %v7270_v0 = vpop.f32.mrf.mxu1  ;;  %5301 = vmatpush3.msra.mxu1 %v4133_v41 }
 0x1a6   : > { %v5174_v63 = vpop.f32.mrf.mxu0  ;;  %5302 = vmatprep.subr.mxu1 %v8201_v43 }
 0x1a7   : > { %v5142_v46 = vpop.f32.mrf.mxu1  ;;  %v7276_v18 = vadd.f32 %v5174_v63, %v2777_v44  ;;  %5303 = vmatpush3.msra.mxu1 %v4132_v25 }
 0x1a8   : > { %v2785_v2 = vadd.f32 %v5142_v46, %v7150_v37  ;;  %v7279_v23 = vpop.f32.mrf.mxu0  ;;  %5304 = vmatprep.subr.mxu1 %v8201_v43 }
 0x1a9   : > { %v7285_v19 = vpop.f32.mrf.mxu1  ;;  %5305 = vmatpush3.msra.mxu1 %v4131_v14 }
 0x1aa   : > { %v5175_v21 = vpop.f32.mrf.mxu0  ;;  %5306 = vmatprep.subr.mxu1 %v8201_v43 }
 0x1ab   : > { %v5143_v32 = vpop.f32.mrf.mxu1  ;;  %v7291_v37 = vadd.f32 %v5175_v21, %v2778_v59  ;;  %5307 = vmatpush3.msra.mxu1 %v4130_v60 }
 0x1ac   : > { %v2786_v44 = vadd.f32 %v5143_v32, %v7159_v24  ;;  %v7294_v33 = vpop.f32.mrf.mxu0 }
 0x1ad   : > { %v7300_v3 = vpop.f32.mrf.mxu1 }
 0x1ae   : > { %v5178_v59 = vpop.f32.mrf.mxu0 }
 0x1af   : > { %v5146_v24 = vpop.f32.mrf.mxu1  ;;  %v7307_v40 = vadd.f32 %v5178_v59, %v2781_v9 }
 0x1b0   : > { %v2789_v62 = vadd.f32 %v5146_v24, %v7169_v54  ;;  %v7310_v50 = vpop.f32.mrf.mxu0 }
 0x1b1   : > { %v7312_v56 = vpop.f32.mrf.mxu1 }
 0x1b2   : > { %v5179_v8 = vpop.f32.mrf.mxu0 }
 0x1b3   : > { %v5147_v45 = vpop.f32.mrf.mxu1  ;;  %v7314_v63 = vadd.f32 %v5179_v8, %v2782_v7 }
 0x1b4   : > { %v2790_v17 = vadd.f32 %v5147_v45, %v7179_v42  ;;  %v7317_v46 = vpop.f32.mrf.mxu0 }
 0x1b5   : > { %v7319_v41 = vpop.f32.mrf.mxu1 }
 0x1b6   : > { %8207 = vst [vmem:[#allocation57_spill] sm:$0xff] %v7319_v41  ;;  %v5182_v43 = vpop.f32.mrf.mxu0 }
 0x1b7   : > { %v5150_v9 = vpop.f32.mrf.mxu1  ;;  %v7321_v21 = vadd.f32 %v5182_v43, %v2785_v2 }
 0x1b8   : > { %v2793_v54 = vadd.f32 %v5150_v9, %v7189_v48  ;;  %v7324_v25 = vpop.f32.mrf.mxu0 }
 0x1b9   : > { %v7326_v32 = vpop.f32.mrf.mxu1 }
 0x1ba   : > { %8208 = vst [vmem:[#allocation73_spill] sm:$0xff] %v7326_v32  ;;  %v5183_v14 = vpop.f32.mrf.mxu0 }
 0x1bb   : > { %v5151_v60 = vpop.f32.mrf.mxu1  ;;  %v7328_v7 = vadd.f32 %v5183_v14, %v2786_v44 }
 0x1bc   : > { %v2794_v42 = vadd.f32 %v5151_v60, %v7199_v13  ;;  %v7331_v59 = vpop.f32.mrf.mxu0 }
 0x1bd   : > { %v7333_v24 = vpop.f32.mrf.mxu1 }
 0x1be   : > { %8209 = vst [vmem:[#allocation12_spill] sm:$0xff] %v7333_v24  ;;  %v5186_v8 = vpop.f32.mrf.mxu0 }
 0x1bf   : > { %v5154_v45 = vpop.f32.mrf.mxu1  ;;  %v7335_v2 = vadd.f32 %v5186_v8, %v2789_v62 }
 0x1c0   : > { %v2797_v48 = vadd.f32 %v5154_v45, %v7210_v27  ;;  %v7338_v43 = vpop.f32.mrf.mxu0 }
 0x1c1   : > { %8210 = vst [vmem:[#allocation11_spill] sm:$0xff] %v7335_v2  ;;  %v7340_v9 = vpop.f32.mrf.mxu1 }
 0x1c2   : > { %8211 = vst [vmem:[#allocation31_spill] sm:$0xff] %v7340_v9  ;;  %v5187_v55 = vpop.f32.mrf.mxu0 }
 0x1c3   : > { %v5155_v53 = vpop.f32.mrf.mxu1  ;;  %v7342_v44 = vadd.f32 %v5187_v55, %v2790_v17 }
 0x1c4   : > { %v2798_v13 = vadd.f32 %v5155_v53, %v7221_v20  ;;  %v7345_v14 = vpop.f32.mrf.mxu0 }
 0x1c5   : > { %8212 = vst [vmem:[#allocation34_spill] sm:$0xff] %v7342_v44  ;;  %8213 = vst [vmem:[#allocation63_spill] sm:$0xff] %v7345_v14  ;;  %v7347_v60 = vpop.f32.mrf.mxu1 }
 0x1c6   : > { %8214 = vst [vmem:[#allocation14_spill] sm:$0xff] %v7347_v60  ;;  %v5190_v24 = vpop.f32.mrf.mxu0 }
 0x1c7   : > { %v7349_v36 = vadd.f32 %v5190_v24, %v2793_v54  ;;  %v5206_v62 = vpop.f32.mrf.mxu1 }
 0x1c8   : > { %v7351_v8 = vpop.f32.mrf.mxu0 }
 0x1c9   : > { %8215 = vst [vmem:[#allocation74_spill] sm:$0xff] %v7349_v36  ;;  %8216 = vst [vmem:[#allocation68_spill] sm:$0xff] %v7351_v8  ;;  %v3444_v27 = vpop.f32.mrf.mxu1 }
 0x1ca   : > { %v5191_v45 = vpop.f32.mrf.mxu0 }
 0x1cb   : > { %v7353_v32 = vadd.f32 %v5191_v45, %v2794_v42  ;;  %v5207_v9 = vpop.f32.mrf.mxu1  ;;  %v2768_v45 = vadd.f32 %v7205_v47, %v7111_v4  ;;  %v7376_v4 = vld [vmem:[%s7794_s2] ss:$0 sm:$0xff] }
 0x1cc   : > { %v7355_v49 = vpop.f32.mrf.mxu0 }
 0x1cd   : > { %8217 = vst [vmem:[#allocation53_spill] sm:$0xff] %v7353_v32  ;;  %8218 = vst [vmem:[#allocation24_spill] sm:$0xff] %v7355_v49  ;;  %v3447_v55 = vpop.f32.mrf.mxu1  ;;  %v3571_v32 = vadd.f32 %v3444_v27, %v7238_v15 }
 0x1ce   : > { %v5194_v17 = vpop.f32.mrf.mxu0 }
 0x1cf   : > { %v7357_v53 = vadd.f32 %v5194_v17, %v2797_v48  ;;  %v5210_v20 = vpop.f32.mrf.mxu1  ;;  %v3186_v17 = vadd.f32 %v7247_v12, %v2768_v45 }
 0x1d0   : > { %v7359_v44 = vpop.f32.mrf.mxu0 }
 0x1d1   : > { %8219 = vst [vmem:[#allocation50_spill] sm:$0xff] %v7357_v53  ;;  %8220 = vst [vmem:[#allocation75_spill] sm:$0xff] %v7359_v44  ;;  %v3460_v60 = vpop.f32.mrf.mxu1  ;;  %v3573_v53 = vadd.f32 %v5206_v62, %v7232_v38 }
 0x1d2   : > { %v5195_v54 = vpop.f32.mrf.mxu0 }
 0x1d3   : > { %v7361_v24 = vadd.f32 %v5195_v54, %v2798_v13  ;;  %v5211_v36 = vpop.f32.mrf.mxu1  ;;  %v2771_v54 = vadd.f32 %v7216_v61, %v7117_v34  ;;  %v2772_v34 = vadd.f32 %v7227_v51, %v7123_v26 }
 0x1d4   : > { %v7363_v8 = vpop.f32.mrf.mxu0 }
 0x1d5   : > { %8221 = vst [vmem:[#allocation25_spill] sm:$0xff] %v7361_v24  ;;  %8222 = vst [vmem:[#allocation16_spill] sm:$0xff] %v7363_v8  ;;  %v3463_v2 = vpop.f32.mrf.mxu1  ;;  %v3574_v24 = vadd.f32 %v5207_v9, %v7243_v58  ;;  %v3572_v8 = vadd.f32 %v3447_v55, %v3186_v17  ;;  %v3189_v15 = vadd.f32 %v7254_v52, %v2771_v54 }
 0x1d6   : > { %v5246_v42 = vpop.f32.mrf.mxu0  ;;  %v3190_v52 = vadd.f32 %v7264_v35, %v2772_v34 }
 0x1d7   : > { %v5214_v49 = vpop.f32.mrf.mxu1  ;;  %v3991_v41 = vadd.f32 %v5246_v42, %v3573_v53  ;;  %v3575_v58 = vadd.f32 %v3460_v60, %v3189_v15  ;;  %v2775_v60 = vadd.f32 %v7236_v11, %v7129_v22  ;;  %v3578_v42 = vadd.f32 %v5211_v36, %v7261_v5 }
 0x1d8   : > { %v3862_v48 = vpop.f32.mrf.mxu0  ;;  %v3576_v45 = vadd.f32 %v3463_v2, %v3190_v52  ;;  %v2776_v15 = vadd.f32 %v7249_v31, %v7135_v30 }
 0x1d9   : > { %v3476_v44 = vpop.f32.mrf.mxu1  ;;  %v3989_v14 = vadd.f32 %v3862_v48, %v3571_v32  ;;  %v7385_v9 = vadd.f32 %v7376_v4, %v3991_v41  ;;  %v3193_v54 = vadd.f32 %v7279_v23, %v2775_v60 }
 0x1da   : > { %v5247_v13 = vpop.f32.mrf.mxu0 }
 0x1db   : > { %v5215_v29 = vpop.f32.mrf.mxu1  ;;  %v7380_v38 = vadd.f32 %v7376_v4, %v3989_v14  ;;  %v3992_v12 = vadd.f32 %v5247_v13, %v3574_v24  ;;  %v3577_v14 = vadd.f32 %v5210_v20, %v7251_v57  ;;  %v4062_v35 = vmax.f32 %v7385_v9, 0.0 }
 0x1dc   : > { %v3865_v47 = vpop.f32.mrf.mxu0 }
 0x1dd   : > { %v3479_v32 = vpop.f32.mrf.mxu1  ;;  %v3990_v62 = vadd.f32 %v3865_v47, %v3572_v8  ;;  %v4060_v8 = vmax.f32 %v7380_v38, 0.0  ;;  %v7396_v24 = vadd.f32 %v7376_v4, %v3992_v12  ;;  %v3579_v12 = vadd.f32 %v3476_v44, %v3193_v54 }
 0x1de   : > { %v5250_v61 = vpop.f32.mrf.mxu0 }
 0x1df   : > { %v7388_v27 = vadd.f32 %v7376_v4, %v3990_v62  ;;  %v7390_v55 = vpop.f32.mrf.mxu1  ;;  %v3995_v20 = vadd.f32 %v5250_v61, %v3577_v14  ;;  %v4063_v22 = vmax.f32 %v7396_v24, 0.0  ;;  %v3194_v14 = vadd.f32 %v7294_v33, %v2776_v15 }
 0x1e0   : > { %v3878_v53 = vpop.f32.mrf.mxu0 }
 0x1e1   : > { %v4061_v26 = vmax.f32 %v7388_v27, 0.0  ;;  %v3492_v51 = vpop.f32.mrf.mxu1  ;;  %v3993_v41 = vadd.f32 %v3878_v53, %v3575_v58  ;;  %v7417_v34 = vadd.f32 %v7376_v4, %v3995_v20  ;;  %v3581_v53 = vadd.f32 %v5214_v49, %v7276_v18 }
 0x1e2   : > { %v5251_v48 = vpop.f32.mrf.mxu0 }
 0x1e3   : > { %v4092_v57 = vadd.f32 %v4061_v26, %v4060_v8  ;;  %v7408_v17 = vadd.f32 %v7376_v4, %v3993_v41  ;;  %v5219_v13 = vpop.f32.mrf.mxu1  ;;  %v3996_v11 = vadd.f32 %v5251_v48, %v3578_v42  ;;  %v3582_v48 = vadd.f32 %v5215_v29, %v7291_v37 }
 0x1e4   : > { %v3881_v47 = vpop.f32.mrf.mxu0  ;;  %v4066_v49 = vmax.f32 %v7417_v34, 0.0 }
 0x1e5   : > { %v4093_v36 = vadd.f32 %v4092_v57, %v4062_v35  ;;  %v3495_v5 = vpop.f32.mrf.mxu1  ;;  %v3994_v2 = vadd.f32 %v3881_v47, %v3576_v45  ;;  %v4064_v61 = vmax.f32 %v7408_v17, 0.0  ;;  %v7432_v44 = vadd.f32 %v7376_v4, %v3996_v11 }
 0x1e6   : > { %v5254_v62 = vpop.f32.mrf.mxu0  ;;  %v2779_v45 = vadd.f32 %v7256_v16, %v7141_v10  ;;  %v3580_v57 = vadd.f32 %v3479_v32, %v3194_v14  ;;  %v2780_v32 = vadd.f32 %v7270_v0, %v7147_v39  ;;  %v3585_v39 = vadd.f32 %v7390_v55, %v7307_v40 }
 0x1e7   : > { %v4094_v23 = vadd.f32 %v4093_v36, %v4063_v22  ;;  %v7423_v58 = vadd.f32 %v7376_v4, %v3994_v2  ;;  %v7425_v52 = vpop.f32.mrf.mxu1  ;;  %v3999_v20 = vadd.f32 %v5254_v62, %v3581_v53  ;;  %v4067_v2 = vmax.f32 %v7432_v44, 0.0 }
 0x1e8   : > { %v3894_v30 = vpop.f32.mrf.mxu0  ;;  %v3197_v36 = vadd.f32 %v7310_v50, %v2779_v45 }
 0x1e9   : > { %v4095_v31 = vadd.f32 %v4094_v23, %v4064_v61  ;;  %v4065_v41 = vmax.f32 %v7423_v58, 0.0  ;;  %v3508_v60 = vpop.f32.mrf.mxu1  ;;  %v3997_v42 = vadd.f32 %v3894_v30, %v3579_v12  ;;  %v7451_v62 = vadd.f32 %v7376_v4, %v3999_v20 }
 0x1ea   : > { %v5255_v33 = vpop.f32.mrf.mxu0  ;;  %v3583_v15 = vadd.f32 %v3492_v51, %v3197_v36  ;;  %v3198_v30 = vadd.f32 %v7317_v46, %v2780_v32 }
 0x1eb   : > { %v4096_v18 = vadd.f32 %v4095_v31, %v4065_v41  ;;  %v7442_v54 = vadd.f32 %v7376_v4, %v3997_v42  ;;  %v5223_v47 = vpop.f32.mrf.mxu1  ;;  %v4000_v29 = vadd.f32 %v5255_v33, %v3582_v48  ;;  %v3586_v33 = vadd.f32 %v5219_v13, %v7314_v63 }
 0x1ec   : > { %v3897_v11 = vpop.f32.mrf.mxu0  ;;  %v3584_v46 = vadd.f32 %v3495_v5, %v3198_v30  ;;  %v4070_v40 = vmax.f32 %v7451_v62, 0.0  ;;  %v2784_v5 = vadd.f32 %v7300_v3, %v7163_v6  ;;  %v3589_v6 = vadd.f32 %v7425_v52, %v7321_v21 }
 0x1ed   : > { %v4097_v10 = vadd.f32 %v4096_v18, %v4066_v49  ;;  %v3511_v16 = vpop.f32.mrf.mxu1  ;;  %v3998_v37 = vadd.f32 %v3897_v11, %v3580_v57  ;;  %v4068_v23 = vmax.f32 %v7442_v54, 0.0  ;;  %v7467_v31 = vadd.f32 %v7376_v4, %v4000_v29 }
 0x1ee   : > { %v5258_v12 = vpop.f32.mrf.mxu0  ;;  %v2783_v57 = vadd.f32 %v7285_v19, %v7153_v28 }
 0x1ef   : > { %v4098_v50 = vadd.f32 %v4097_v10, %v4067_v2  ;;  %v7457_v14 = vadd.f32 %v7376_v4, %v3998_v37  ;;  %v7459_v53 = vpop.f32.mrf.mxu1  ;;  %v4003_v20 = vadd.f32 %v5258_v12, %v3585_v39  ;;  %v7946_v37 = vmax.f32 %v7467_v31, 0.0 }
 0x1f0   : > { %v3910_v0 = vpop.f32.mrf.mxu0  ;;  %v3201_v10 = vadd.f32 %v7324_v25, %v2783_v57  ;;  %v8245_v24 = vmax.f32 %v7467_v31, 0.0 }
 0x1f1   : > { %v4099_v51 = vadd.f32 %v4098_v50, %v4068_v23  ;;  %v4069_v42 = vmax.f32 %v7457_v14, 0.0  ;;  %v3524_v45 = vpop.f32.mrf.mxu1  ;;  %v4001_v48 = vadd.f32 %v3910_v0, %v3583_v15  ;;  %v7486_v12 = vadd.f32 %v7376_v4, %v4003_v20 }
 0x1f2   : > { %v5259_v18 = vpop.f32.mrf.mxu0  ;;  %v3587_v32 = vadd.f32 %v3508_v60, %v3201_v10  ;;  %v3202_v0 = vadd.f32 %v7331_v59, %v2784_v5 }
 0x1f3   : > { %v4100_v55 = vadd.f32 %v4099_v51, %v4069_v42  ;;  %v7477_v36 = vadd.f32 %v7376_v4, %v4001_v48  ;;  %v5227_v11 = vpop.f32.mrf.mxu1  ;;  %v4004_v19 = vadd.f32 %v5259_v18, %v3586_v33  ;;  %v3590_v18 = vadd.f32 %v5223_v47, %v7328_v7  ;;  %v8223_v47 = vld [vmem:[#allocation40_spill] sm:$0xff] }
 0x1f4   : > { %v3913_v29 = vpop.f32.mrf.mxu0  ;;  %v3588_v59 = vadd.f32 %v3511_v16, %v3202_v0  ;;  %v7939_v21 = vmax.f32 %v7486_v12, 0.0  ;;  %v8224_v16 = vld [vmem:[#allocation57_spill] sm:$0xff] }
 0x1f5   : > { %v4101_v28 = vadd.f32 %v4100_v55, %v4070_v40  ;;  %v3527_v63 = vpop.f32.mrf.mxu1  ;;  %v4002_v13 = vadd.f32 %v3913_v29, %v3584_v46  ;;  %v7945_v50 = vmax.f32 %v7477_v36, 0.0  ;;  %v7502_v51 = vadd.f32 %v7376_v4, %v4004_v19 }
 0x1f6   : > { %v5262_v15 = vpop.f32.mrf.mxu0  ;;  %v2787_v46 = vadd.f32 %v7312_v56, %v7173_v1  ;;  %v2788_v5 = vadd.f32 %v8224_v16, %v8223_v47 }
 0x1f7   : > { %v4102_v25 = vadd.f32 %v4101_v28, %v7946_v37  ;;  %v7492_v30 = vadd.f32 %v7376_v4, %v4002_v13  ;;  %v7494_v39 = vpop.f32.mrf.mxu1  ;;  %v4007_v20 = vadd.f32 %v5262_v15, %v3589_v6  ;;  %v7938_v13 = vmax.f32 %v7502_v51, 0.0 }
 0x1f8   : > { %v3926_v3 = vpop.f32.mrf.mxu0  ;;  %v3205_v28 = vadd.f32 %v7338_v43, %v2787_v46  ;;  %v8226_v46 = vld [vmem:[#allocation11_spill] sm:$0xff]  ;;  %v8249_v44 = vmax.f32 %v7502_v51, 0.0 }
 0x1f9   : > { %v4103_v60 = vadd.f32 %v4102_v25, %v7945_v50  ;;  %v7944_v48 = vmax.f32 %v7492_v30, 0.0  ;;  %v3540_v57 = vpop.f32.mrf.mxu1  ;;  %v4005_v33 = vadd.f32 %v3926_v3, %v3587_v32  ;;  %v7521_v15 = vadd.f32 %v7376_v4, %v4007_v20 }
 0x1fa   : > { %v5263_v55 = vpop.f32.mrf.mxu0  ;;  %v3591_v32 = vadd.f32 %v3524_v45, %v3205_v28  ;;  %v8227_v28 = vld [vmem:[#allocation46_spill] sm:$0xff] }
 0x1fb   : > { %v4104_v52 = vadd.f32 %v4103_v60, %v7944_v48  ;;  %v7512_v10 = vadd.f32 %v7376_v4, %v4005_v33  ;;  %v5231_v29 = vpop.f32.mrf.mxu1  ;;  %v4008_v56 = vadd.f32 %v5263_v55, %v3590_v18  ;;  %v8225_v60 = vld [vmem:[#allocation63_spill] sm:$0xff]  ;;  %v3593_v18 = vadd.f32 %v7459_v53, %v8226_v46 }
 0x1fc   : > { %v3929_v19 = vpop.f32.mrf.mxu0  ;;  %v3206_v33 = vadd.f32 %v8225_v60, %v2788_v5  ;;  %v7941_v60 = vmax.f32 %v7521_v15, 0.0 }
 0x1fd   : > { %v4105_v1 = vadd.f32 %v4104_v52, %v7939_v21  ;;  %v4006_v7 = vadd.f32 %v3929_v19, %v3588_v59  ;;  %v7937_v0 = vmax.f32 %v7512_v10, 0.0  ;;  %v3543_v6 = vpop.f32.mrf.mxu1  ;;  %v7535_v55 = vadd.f32 %v7376_v4, %v4008_v56  ;;  %v8228_v19 = vld [vmem:[#allocation73_spill] sm:$0xff] }
 0x1fe   : > { %v5266_v25 = vpop.f32.mrf.mxu0  ;;  %v3592_v16 = vadd.f32 %v3527_v63, %v3206_v33 }
 0x1ff   : > { %v4106_v43 = vadd.f32 %v4105_v1, %v7938_v13  ;;  %v7527_v3 = vadd.f32 %v7376_v4, %v4006_v7  ;;  %v2791_v1 = vadd.f32 %v8228_v19, %v8227_v28  ;;  %v8229_v7 = vld [vmem:[#allocation34_spill] sm:$0xff]  ;;  %v5234_v46 = vpop.f32.mrf.mxu1  ;;  %v8231_v28 = vld [vmem:[#allocation19_spill] sm:$0xff]  ;;  %v8232_v19 = vld [vmem:[#allocation12_spill] sm:$0xff]  ;;  %v8253_v31 = vmax.f32 %v7535_v55, 0.0 }
 0x200   : > { %v3942_v59 = vpop.f32.mrf.mxu0  ;;  %v3594_v47 = vadd.f32 %v5227_v11, %v8229_v7  ;;  %v2792_v7 = vadd.f32 %v8232_v19, %v8231_v28  ;;  %v8235_v19 = vld [vmem:[#allocation43_spill] sm:$0xff] }
 0x201   : > { %v4107_v45 = vadd.f32 %v4106_v43, %v7937_v0  ;;  %v7942_v52 = vmax.f32 %v7527_v3, 0.0  ;;  %v4009_v20 = vadd.f32 %v3942_v59, %v3591_v32  ;;  %v4011_v43 = vadd.f32 %v5266_v25, %v3593_v18  ;;  %v8230_v0 = vld [vmem:[#allocation68_spill] sm:$0xff]  ;;  %v3556_v18 = vpop.f32.mrf.mxu1 }
 0x202   : > { %v5267_v5 = vpop.f32.mrf.mxu0  ;;  %v3209_v13 = vadd.f32 %v8230_v0, %v2791_v1  ;;  %v7940_v59 = vmax.f32 %v7535_v55, 0.0 }
 0x203   : > { %v4108_v53 = vadd.f32 %v4107_v45, %v7942_v52  ;;  %v7545_v56 = vadd.f32 %v7376_v4, %v4009_v20  ;;  %v4012_v63 = vadd.f32 %v5267_v5, %v3594_v47  ;;  %v7554_v25 = vadd.f32 %v7376_v4, %v4011_v43 }
 0x204   : > { %v3945_v32 = vpop.f32.mrf.mxu0  ;;  %v3595_v21 = vadd.f32 %v3540_v57, %v3209_v13 }
 0x205   : > { %v4109_v11 = vadd.f32 %v4108_v53, %v7941_v60  ;;  %v4010_v33 = vadd.f32 %v3945_v32, %v3592_v16  ;;  %v7943_v20 = vmax.f32 %v7545_v56, 0.0  ;;  %v8233_v53 = vld [vmem:[#allocation24_spill] sm:$0xff]  ;;  %v8234_v16 = vld [vmem:[#allocation74_spill] sm:$0xff]  ;;  %v7568_v13 = vadd.f32 %v7376_v4, %v4012_v63 }
 0x206   : > { %v5270_v45 = vpop.f32.mrf.mxu0  ;;  %v3210_v47 = vadd.f32 %v8233_v53, %v2792_v7  ;;  %v3597_v5 = vadd.f32 %v7494_v39, %v8234_v16  ;;  %v4082_v53 = vmax.f32 %v7554_v25, 0.0  ;;  %v5235_v39 = vpop.f32.mrf.mxu1 }
 0x207   : > { %v4110_v0 = vadd.f32 %v4109_v11, %v7940_v59  ;;  %v7560_v1 = vadd.f32 %v7376_v4, %v4010_v33  ;;  %v8236_v11 = vld [vmem:[#allocation31_spill] sm:$0xff]  ;;  %v8237_v33 = vld [vmem:[#allocation53_spill] sm:$0xff]  ;;  %v8255_v51 = vmax.f32 %v7568_v13, 0.0 }
 0x208   : > { %v3958_v32 = vpop.f32.mrf.mxu0  ;;  %v2795_v59 = vadd.f32 %v8236_v11, %v8235_v19  ;;  %v3598_v60 = vadd.f32 %v5231_v29, %v8237_v33  ;;  %v3596_v52 = vadd.f32 %v3543_v6, %v3210_v47  ;;  %v8239_v19 = vld [vmem:[#allocation45_spill] sm:$0xff]  ;;  %v8240_v11 = vld [vmem:[#allocation14_spill] sm:$0xff] }
 0x209   : > { %v4111_v57 = vadd.f32 %v4110_v0, %v7943_v20  ;;  %v4081_v43 = vmax.f32 %v7560_v1, 0.0  ;;  %v4013_v28 = vadd.f32 %v3958_v32, %v3595_v21  ;;  %v4015_v0 = vadd.f32 %v5270_v45, %v3597_v5  ;;  %v8238_v20 = vld [vmem:[#allocation75_spill] sm:$0xff] }
 0x20a   : > { %v5271_v7 = vpop.f32.mrf.mxu0  ;;  %v3213_v48 = vadd.f32 %v8238_v20, %v2795_v59  ;;  %v7947_v32 = vmax.f32 %v7568_v13, 0.0  ;;  %v2796_v33 = vadd.f32 %v8240_v11, %v8239_v19  ;;  %v8243_v19 = vld [vmem:[#allocation25_spill] sm:$0xff] }
 0x20b   : > { %v4112_v16 = vadd.f32 %v4111_v57, %v4081_v43  ;;  %v7578_v63 = vadd.f32 %v7376_v4, %v4013_v28  ;;  %v4016_v6 = vadd.f32 %v5271_v7, %v3598_v60  ;;  %v3559_v57 = vpop.f32.mrf.mxu1  ;;  %v7587_v45 = vadd.f32 %v7376_v4, %v4015_v0  ;;  %v8241_v28 = vld [vmem:[#allocation16_spill] sm:$0xff] }
 0x20c   : > { %v3961_v21 = vpop.f32.mrf.mxu0  ;;  %v3599_v50 = vadd.f32 %v3556_v18, %v3213_v48  ;;  %v3214_v60 = vadd.f32 %v8241_v28, %v2796_v33  ;;  %v3602_v11 = vadd.f32 %v5235_v39, %v8243_v19 }
 0x20d   : > { %v4113_v29 = vadd.f32 %v4112_v16, %v4082_v53  ;;  %v4014_v47 = vadd.f32 %v3961_v21, %v3596_v52  ;;  %v4084_v5 = vmax.f32 %v7578_v63, 0.0  ;;  %v8242_v52 = vld [vmem:[#allocation50_spill] sm:$0xff]  ;;  %v7600_v18 = vadd.f32 %v7376_v4, %v4016_v6 }
 0x20e   : > { %v5274_v37 = vpop.f32.mrf.mxu0  ;;  %v3601_v7 = vadd.f32 %v5234_v46, %v8242_v52 }
 0x20f   : > { %v4114_v59 = vadd.f32 %v4113_v29, %v7947_v32  ;;  %v7593_v20 = vadd.f32 %v7376_v4, %v4014_v47  ;;  %v3600_v29 = vadd.f32 %v3559_v57, %v3214_v60  ;;  %v4086_v47 = vmax.f32 %v7587_v45, 0.0 }
 0x210   : > { %v3974_v16 = vpop.f32.mrf.mxu0  ;;  %v4019_v46 = vadd.f32 %v5274_v37, %v3601_v7  ;;  %v7951_v6 = vmax.f32 %v7600_v18, 0.0 }
 0x211   : > { %v4115_v48 = vadd.f32 %v4114_v59, %v4084_v5  ;;  %v4085_v0 = vmax.f32 %v7593_v20, 0.0  ;;  %v4017_v21 = vadd.f32 %v3974_v16, %v3599_v50 }
 0x212   : > { %v5275_v32 = vpop.f32.mrf.mxu0  ;;  %v7614_v39 = vadd.f32 %v7376_v4, %v4019_v46 }
 0x213   : > { %v4116_v33 = vadd.f32 %v4115_v48, %v4085_v0  ;;  %v7608_v28 = vadd.f32 %v7376_v4, %v4017_v21  ;;  %v4020_v50 = vadd.f32 %v5275_v32, %v3602_v11 }
 0x214   : > { %v3977_v59 = vpop.f32.mrf.mxu0  ;;  %v7950_v21 = vmax.f32 %v7614_v39, 0.0  ;;  %v8259_v63 = vmax.f32 %v7614_v39, 0.0 }
 0x215   : > { %v4117_v52 = vadd.f32 %v4116_v33, %v4086_v47  ;;  %v4018_v16 = vadd.f32 %v3977_v59, %v3600_v29  ;;  %v7949_v57 = vmax.f32 %v7608_v28, 0.0  ;;  %v7625_v48 = vadd.f32 %v7376_v4, %v4020_v50 }
 0x216   : > { %v8257_v1 = vmax.f32 %v7608_v28, 0.0 }
 0x217   : > { %v4118_v60 = vadd.f32 %v4117_v52, %v7951_v6  ;;  %v7620_v37 = vadd.f32 %v7376_v4, %v4018_v16  ;;  %v4091_v11 = vmax.f32 %v7625_v48, 0.0 }
 0x219   : > { %v4119_v7 = vadd.f32 %v4118_v60, %v7949_v57  ;;  %v7948_v32 = vmax.f32 %v7620_v37, 0.0 }
 0x21b   : > { %v4120_v19 = vadd.f32 %v4119_v7, %v7948_v32  ;;  %v4216_v7 = vld [vmem:[%s7796_s4] sm:$0x1] }
 0x21d   : > { %v4121_v29 = vadd.f32 %v4120_v19, %v7950_v21 }
 0x21f   : > { %v4122_v33 = vadd.f32 %v4121_v29, %v4091_v11 }
 0x221   : > { %v4123_v46 = vrot.slane %v4122_v33, 4 }
 0x223   : > { %v4124_v59 = vadd.f32 %v4123_v46, %v4122_v33  ;;  %v8244_v46 = vld [vmem:[#allocation5_spill] sm:$0xff] }
 0x225   : > { %v4125_v52 = vrot.slane %v4124_v59, 2 }
 0x227   : > { %v4126_v4 = vadd.f32 %v4125_v52, %v4124_v59  ;;  %v4226_v59 = vsub.s32 0, %v8244_v46 }
 0x229   : > { %v4127_v50 = vrot.slane %v4126_v4, 1 }
 0x22b   : > { %v4128_v16 = vadd.f32 %v4127_v50, %v4126_v4 }
 0x22d   : > { %v4129_v60 = vmul.f32 0.00390625, %v4128_v16 }
 0x22f   : > { %5309 = vmatmul.mubr.f32.vlgmr.msra.gmra.mxu1 %v4129_v60 }
 0x2ef   : > { %v4212_v32 = vpop.f32.mrf.mxu1 }
 0x2f0   : > { %v4217_v57 = vadd.f32 %v4216_v7, %v4212_v32 }
 0x2f1   : > { %v5310_v19 = vpop.f32.mrf.mxu1 }
 0x2f2   : > { %v4218_v21 = vsub.f32 0.0, %v4217_v57 }
 0x2f4   : > { %v4219_v6 = vmul.f32 1.442695, %v4218_v21 }
 0x2f6   : > { %5398 = vpow2.f32 %v4219_v6 }
 0x303   : > { %v5399_v29 = vpop.eup %5398 }
 0x304   : > { %v4221_v33 = vadd.f32 1.0, %v5399_v29 }
 0x306   : > { %5400 = vrcp.f32 %v4221_v33 }
 0x313   : > { %v5401_v52 = vpop.eup %5400 }
 0x314   : > { %v4227_v4 = vrot.slane %v5401_v52, %v4226_v59 }
 0x316   : > { %v4228_v50 = vmul.f32 %v4227_v4, %v4060_v8  ;;  %v4229_v32 = vmul.f32 %v4227_v4, %v4061_v26  ;;  %v4230_v57 = vmul.f32 %v4227_v4, %v4062_v35  ;;  %v4231_v6 = vmul.f32 %v4227_v4, %v4063_v22 }
 0x317   : > { %v4232_v21 = vmul.f32 %v4227_v4, %v4064_v61  ;;  %v4233_v16 = vmul.f32 %v4227_v4, %v4065_v41  ;;  %v4234_v60 = vmul.f32 %v4227_v4, %v4066_v49  ;;  %v4235_v38 = vmul.f32 %v4227_v4, %v4067_v2 }
 0x318   : > { %v4236_v27 = vmul.f32 %v4227_v4, %v4068_v23  ;;  %v4237_v9 = vmul.f32 %v4227_v4, %v4069_v42  ;;  %v4238_v8 = vmul.f32 %v4227_v4, %v4070_v40  ;;  %v4239_v26 = vmul.f32 %v4227_v4, %v8245_v24  ;;  %4260 = vst [vmem:[%s7667_s11] sm:$0xff] %v4228_v50 }
 0x319   : > { %4261 = vst [vmem:[%s7667_s11 + $0x8] sm:$0xff] %v4229_v32  ;;  %4262 = vst [vmem:[%s7667_s11 + $0x10] sm:$0xff] %v4230_v57  ;;  %v8246_v35 = vmax.f32 %v7477_v36, 0.0  ;;  %v8247_v22 = vmax.f32 %v7492_v30, 0.0  ;;  %v8248_v61 = vmax.f32 %v7486_v12, 0.0  ;;  %v4243_v41 = vmul.f32 %v4227_v4, %v8249_v44 }
 0x31a   : > { %4263 = vst [vmem:[%s7667_s11 + $0x18] sm:$0xff] %v4231_v6  ;;  %4264 = vst [vmem:[%s7667_s11 + $0x20] sm:$0xff] %v4232_v21  ;;  %v8250_v49 = vmax.f32 %v7512_v10, 0.0  ;;  %v8251_v2 = vmax.f32 %v7527_v3, 0.0  ;;  %v8252_v23 = vmax.f32 %v7521_v15, 0.0  ;;  %v4247_v42 = vmul.f32 %v4227_v4, %v8253_v31 }
 0x31b   : > { %v4240_v17 = vmul.f32 %v4227_v4, %v8246_v35  ;;  %v4241_v34 = vmul.f32 %v4227_v4, %v8247_v22  ;;  %v4242_v58 = vmul.f32 %v4227_v4, %v8248_v61  ;;  %4265 = vst [vmem:[%s7667_s11 + $0x28] sm:$0xff] %v4233_v16  ;;  %4266 = vst [vmem:[%s7667_s11 + $0x30] sm:$0xff] %v4234_v60  ;;  %v8254_v40 = vmax.f32 %v7545_v56, 0.0 }
 0x31c   : > { %4267 = vst [vmem:[%s7667_s11 + $0x38] sm:$0xff] %v4235_v38  ;;  %v4244_v54 = vmul.f32 %v4227_v4, %v8250_v49  ;;  %v4245_v62 = vmul.f32 %v4227_v4, %v8251_v2  ;;  %v4246_v14 = vmul.f32 %v4227_v4, %v8252_v23  ;;  %4268 = vst [vmem:[%s7667_s11 + $0x40] sm:$0xff] %v4236_v27  ;;  %v8256_v56 = vmax.f32 %v7600_v18, 0.0 }
 0x31d   : > { %4269 = vst [vmem:[%s7667_s11 + $0x48] sm:$0xff] %v4237_v9  ;;  %4270 = vst [vmem:[%s7667_s11 + $0x50] sm:$0xff] %v4238_v8  ;;  %v4248_v36 = vmul.f32 %v4227_v4, %v8254_v40  ;;  %v4249_v12 = vmul.f32 %v4227_v4, %v4081_v43  ;;  %v4250_v30 = vmul.f32 %v4227_v4, %v4082_v53  ;;  %v8258_v43 = vmax.f32 %v7620_v37, 0.0 }
 0x31e   : > { %4271 = vst [vmem:[%s7667_s11 + $0x58] sm:$0xff] %v4239_v26  ;;  %v4251_v10 = vmul.f32 %v4227_v4, %v8255_v51  ;;  %4272 = vst [vmem:[%s7667_s11 + $0x60] sm:$0xff] %v4240_v17  ;;  %v4252_v15 = vmul.f32 %v4227_v4, %v4084_v5  ;;  %v4253_v3 = vmul.f32 %v4227_v4, %v4085_v0 }
 0x31f   : > { %4273 = vst [vmem:[%s7667_s11 + $0x68] sm:$0xff] %v4241_v34  ;;  %4274 = vst [vmem:[%s7667_s11 + $0x70] sm:$0xff] %v4242_v58  ;;  %v4254_v55 = vmul.f32 %v4227_v4, %v4086_v47  ;;  %v4255_v25 = vmul.f32 %v4227_v4, %v8256_v56  ;;  %v4256_v13 = vmul.f32 %v4227_v4, %v8257_v1 }
 0x320   : > { %4275 = vst [vmem:[%s7667_s11 + $0x78] sm:$0xff] %v4243_v41  ;;  %4276 = vst [vmem:[%s7667_s11 + $0x80] sm:$0xff] %v4244_v54  ;;  %v4257_v53 = vmul.f32 %v4227_v4, %v8258_v43  ;;  %v4258_v45 = vmul.f32 %v4227_v4, %v8259_v63  ;;  %v4259_v5 = vmul.f32 %v4227_v4, %v4091_v11 }
 0x321   : > { %4277 = vst [vmem:[%s7667_s11 + $0x88] sm:$0xff] %v4245_v62  ;;  %4278 = vst [vmem:[%s7667_s11 + $0x90] sm:$0xff] %v4246_v14 }
 0x322   : > { %4279 = vst [vmem:[%s7667_s11 + $0x98] sm:$0xff] %v4247_v42  ;;  %4280 = vst [vmem:[%s7667_s11 + $0xa0] sm:$0xff] %v4248_v36 }
 0x323   : > { %4281 = vst [vmem:[%s7667_s11 + $0xa8] sm:$0xff] %v4249_v12  ;;  %4282 = vst [vmem:[%s7667_s11 + $0xb0] sm:$0xff] %v4250_v30 }
 0x324   : > { %4283 = vst [vmem:[%s7667_s11 + $0xb8] sm:$0xff] %v4251_v10  ;;  %4284 = vst [vmem:[%s7667_s11 + $0xc0] sm:$0xff] %v4252_v15 }
 0x325   : > { %4285 = vst [vmem:[%s7667_s11 + $0xc8] sm:$0xff] %v4253_v3  ;;  %4286 = vst [vmem:[%s7667_s11 + $0xd0] sm:$0xff] %v4254_v55 }
 0x326   : > { %4287 = vst [vmem:[%s7667_s11 + $0xd8] sm:$0xff] %v4255_v25  ;;  %4288 = vst [vmem:[%s7667_s11 + $0xe0] sm:$0xff] %v4256_v13 }
 0x327   : > { %4289 = vst [vmem:[%s7667_s11 + $0xe8] sm:$0xff] %v4257_v53  ;;  %4290 = vst [vmem:[%s7667_s11 + $0xf0] sm:$0xff] %v4258_v45 }
 0x328   : > { %4291 = vst [vmem:[%s7667_s11 + $0xf8] sm:$0xff] %v4259_v5 }
 0x329   : > { %5420 = shalt.err (!%p5417_p3)
}
 0x32a   : > { %s5421_s15 = scalar_lea.hbm %s7726_s16, 4096  ;;  %s5425_s8 = scalar_lea.hbm %s7797_s5, 8192 }
 0x32b   : > { %p5422_p4 = scmp.ne.s32.totalorder %s7726_s16, %s5421_s15  ;;  %p5426_p9 = scmp.lt.s32.totalorder %s7726_s16, %s7797_s5 }
 0x32c   : > { %p5427_p10 = scmp.lt.s32.totalorder %s5425_s8, %s5421_s15 }
 0x32d   : > { %p5423_p7 = pnand %p5422_p4, %p5542_p5 }
 0x32e   : > { %p5428_p11 = por %p5427_p10, %p5426_p9 }
 0x32f   : > { %p5424_p8 = pneg %p5423_p7 }
 0x331   : > { %p5429_p12 = pnand %p5428_p11, %p5424_p8 }
 0x333   : > { %5432 = shalt.err (!%p5429_p12)
}
 0x334   : > { %s5472_s11 = smov 128   ;;  %s5473_s12 = smov 8  }
 0x335   : > { %5319 = dma.vmem_to_hbm [thread:$0]  (%p5542_p5), %s7728_s13, 4096, %s7726_s16, %s7752_s17, %s5472_s11, %s5472_s11, %s5473_s12  }
 0x336 PF: > { %p5325_p13 = scmp.ge.s32.totalorder %s5467_s21, 2  ;;  %s4321_s22 = sand.u32 1, %s5455_s18  }
 0x337   : > { %s4322_s14 = scalar_lea.sflag [#allocation3], %s4321_s22 }
 0x338   : > { %p5322_p0 = pnand %p5325_p13, %p5546_p6 }
 0x33a   : > { %p5323_p1 = pneg %p5322_p0 }
 0x33c   : > { %5450 = dma.done.wait (%p5323_p1), %s4322_s14, 4096  }
 0x33d   : > { %5452 = vsyncadd (%p5323_p1), %s4322_s14, 4294963200  ;;  %p15_p2 = scmp.ge.s32.totalorder %s5529_s24, 4   ;;  %s8260_s18 = smov %s5459_s19 }
 0x33e   : > { %s8261_s19 = smov %s5463_s20  ;;  %s8262_s20 = smov %s5540_s27 }
 0x33f   : > { %s8263_s21 = smov %s5529_s24  ;;  %17 = sbr.rel (!%p15_p2) target bundleno = 3 (0x3), region = 83 }
 0x344   :  { %4327 = vsyncpa [#allocation3], 1 }
 0x345   :  { %4329 = vsyncpa [#allocation3 + $0x1], 1 }

</bundles_post_ra>
